<compile_context>
chip_gen: v7x
topology: tpu7x:2x2x1
jax: 0.10.0
libtpu: 0.0.40
codegen_flags: <defaults>
</compile_context>

<pallas_src>
import functools

import numpy as np
import jax
import jax.numpy as jnp
from jax.experimental import pallas as pl
from jax.experimental.pallas import tpu as pltpu


_SQRT_2_OVER_PI = 0.7978845608028654


def _gelu_tanh(x):
    # TODO(synk): PyTorch nn.GELU defaults to the exact erf form; the tanh
    # approximation is used here (erf lowering inside Mosaic is not guaranteed).
    return 0.5 * x * (1.0 + jnp.tanh(_SQRT_2_OVER_PI * (x + 0.044715 * x * x * x)))


def _block_kernel(x_ref, colmask_ref, ln1_g_ref, ln1_b_ref, dw_ref, bn_s_ref,
                  bn_t_ref, wqkv_ref, wproj_ref, projb_ref, ln2_g_ref,
                  ln2_b_ref, w1_ref, b1_ref, w2_ref, b2_ref, o_ref, sp_pad,
                  *, h, w, num_heads, eps, margin):
    HW = h * w
    T = HW + 1
    C = x_ref.shape[-1]
    hd_dim = C // num_heads
    pad_rows = sp_pad.shape[0]

    def layer_norm(v, g, b):
        mu = jnp.mean(v, axis=-1, keepdims=True)
        dlt = v - mu
        var = jnp.mean(dlt * dlt, axis=-1, keepdims=True)
        return dlt * jax.lax.rsqrt(var + eps) * g + b

    # Token layout inside the kernel: rows [0, HW) = spatial tokens (8-row
    # aligned slab), row HW = cls token (moved to the end at trace time).
    x_all = x_ref[0]                                               # (T, C)
    xn1 = layer_norm(x_all, ln1_g_ref[...], ln1_b_ref[...])        # (T, C)
    sp_ln = xn1[0:HW, :]                                           # (HW, C)
    cls_ln = xn1[HW:T, :]                                          # (1, C)

    # Stage the LN'd spatial map into the zero-margined scratch (fused im2col:
    # the 3x3 depthwise conv becomes 9 shifted reads of this buffer).  Only the
    # small margins are (re)zeroed; the interior is fully overwritten each step.
    sp_pad[0:margin, :] = jnp.zeros((margin, C), jnp.float32)
    sp_pad[margin + HW:pad_rows, :] = jnp.zeros((pad_rows - margin - HW, C),
                                                jnp.float32)
    sp_pad[margin:margin + HW, :] = sp_ln

    # Depthwise 3x3 conv + folded eval-mode BatchNorm for q / k / v.
    accs = [jnp.zeros((HW, C), jnp.float32) for _ in range(3)]
    for di in range(3):
        for dj in range(3):
            tap = di * 3 + dj
            start = margin + (di - 1) * w + (dj - 1)
            patch = sp_pad[start:start + HW, :]                    # (HW, C)
            if dj == 0:
                patch = patch * colmask_ref[0]                     # left border
            elif dj == 2:
                patch = patch * colmask_ref[1]                     # right border
            for p in range(3):
                accs[p] = accs[p] + patch * dw_ref[p, tap:tap + 1, :]

    def conv_tokens(p):
        y = accs[p] * bn_s_ref[p] + bn_t_ref[p]                    # (HW, C)
        return jnp.concatenate([y, cls_ln], axis=0)                # (T, C)

    tq = conv_tokens(0)
    tk = conv_tokens(1)
    tv = conv_tokens(2)

    # Fused full-width input projections (the attention scale dim_out**-0.5 is
    # pre-folded into Wq at pack time).
    q_all = jnp.dot(tq, wqkv_ref[0], preferred_element_type=jnp.float32)  # (T, C)
    k_all = jnp.dot(tk, wqkv_ref[1], preferred_element_type=jnp.float32)
    v_all = jnp.dot(tv, wqkv_ref[2], preferred_element_type=jnp.float32)

    # Per-head attention; heads are re-concatenated and fed into a single
    # fused (T,C)@(C,C) output projection.
    heads = []
    for hd in range(num_heads):
        lo = hd * hd_dim
        qh = q_all[:, lo:lo + hd_dim]
        kh = k_all[:, lo:lo + hd_dim]
        vh = v_all[:, lo:lo + hd_dim]
        s = jax.lax.dot_general(qh, kh, (((1,), (1,)), ((), ())),
                                preferred_element_type=jnp.float32)   # (T, T)
        m = jnp.max(s, axis=-1, keepdims=True)
        e = jnp.exp(s - m)
        denom = jnp.sum(e, axis=-1, keepdims=True)                    # (T, 1)
        oh = jnp.dot(e, vh, preferred_element_type=jnp.float32)       # (T, d)
        heads.append(oh * pl.reciprocal(denom, approx=True))
    o_cat = jnp.concatenate(heads, axis=-1)                           # (T, C)
    attn = jnp.dot(o_cat, wproj_ref[...],
                   preferred_element_type=jnp.float32) + projb_ref[...]

    # Residual 1, LayerNorm 2, MLP (GELU), residual 2.
    x1 = x_all + attn
    xn2 = layer_norm(x1, ln2_g_ref[...], ln2_b_ref[...])
    h1 = jnp.dot(xn2, w1_ref[...], preferred_element_type=jnp.float32) + b1_ref[...]
    mlp = jnp.dot(_gelu_tanh(h1), w2_ref[...],
                  preferred_element_type=jnp.float32) + b2_ref[...]
    o_ref[0] = (x1 + mlp).astype(o_ref.dtype)


@functools.partial(jax.jit, static_argnames=("h", "w", "num_heads"))
def block_forward(x, params, *, h, w, num_heads):
    """Block.forward (with_cls_token=True, method='dw_bn', eval mode)."""
    B, T, C = x.shape
    HW = h * w
    assert T == HW + 1, "with_cls_token=True => T == h*w + 1"
    assert C % num_heads == 0
    hidden = params["fc1_w"].shape[0]
    eps = 1e-5

    # Move the cls token to the END of the token axis so the big spatial slab
    # sits at sublane offset 0 inside the kernel (attention / LN / MLP are
    # permutation-equivariant over tokens, so this is a pure layout change).
    x_perm = jnp.concatenate([x[:, 1:, :], x[:, :1, :]], axis=1)

    # --- pack / fold parameters into kernel-friendly layouts (trace-time) -------
    def dw_flat(wc):                        # (C,1,3,3) -> (9, C), tap = 3*di + dj
        return wc.reshape(C, 9).T
    dw = jnp.stack([dw_flat(params["conv_q_w"]),
                    dw_flat(params["conv_k_w"]),
                    dw_flat(params["conv_v_w"])], axis=0)              # (3, 9, C)

    def bn_fold(g, b, m, v):                # eval-mode BatchNorm -> scale, shift
        s = g * jax.lax.rsqrt(v + eps)
        return s, b - m * s
    sq, shq = bn_fold(params["bn_q_g"], params["bn_q_b"], params["bn_q_m"], params["bn_q_v"])
    sk, shk = bn_fold(params["bn_k_g"], params["bn_k_b"], params["bn_k_m"], params["bn_k_v"])
    sv, shv = bn_fold(params["bn_v_g"], params["bn_v_b"], params["bn_v_m"], params["bn_v_v"])
    bn_s = jnp.stack([sq, sk, sv]).reshape(3, 1, C)
    bn_t = jnp.stack([shq, shk, shv]).reshape(3, 1, C)

    # NOTE: the reference uses scale = dim_out**-0.5 (NOT head_dim**-0.5);
    # it is folded into Wq so the (T,T) score tensor never needs scaling.
    scale = float(C) ** -0.5
    wqkv = jnp.stack([params["wq"].T * scale,
                      params["wk"].T,
                      params["wv"].T], axis=0)                         # (3, C, C)

    # Column-validity masks for the dj=0 / dj=2 conv taps (left/right border).
    jj = np.arange(HW) % w
    colmask = np.stack([(jj >= 1), (jj < w - 1)]).astype(np.float32)
    colmask = jnp.asarray(colmask.reshape(2, HW, 1))

    margin = ((w + 1 + 7) // 8) * 8                      # zero margin above the map
    pad_rows = ((margin + HW + w + 1) + 7) // 8 * 8      # total scratch rows

    kernel = functools.partial(_block_kernel, h=h, w=w, num_heads=num_heads,
                               eps=eps, margin=margin)

    def const(nd):
        return lambda b: (0,) * nd

    # Rough VMEM budget (resident weights + double-buffered x/out + scratch +
    # conv/attention/MLP temporaries), clamped to a range safe on v5e/v6e/v7x.
    est = 4 * (3 * 9 * C + 6 * C + 3 * C * C + C * C + 2 * C * hidden
               + 2 * hidden + 8 * C + 2 * HW
               + 4 * T * C + pad_rows * C
               + 14 * T * C + 3 * T * T + 2 * T * hidden)
    vmem_limit = int(min(64 * 1024 * 1024, max(32 * 1024 * 1024, 2 * est)))

    out_perm = pl.pallas_call(
        kernel,
        out_shape=jax.ShapeDtypeStruct((B, T, C), jnp.float32),
        grid=(B,),
        in_specs=[
            pl.BlockSpec((1, T, C), lambda b: (b, 0, 0)),      # x (cls token last)
            pl.BlockSpec((2, HW, 1), const(3)),                # conv border masks
            pl.BlockSpec((1, C), const(2)),                    # ln1 gamma
            pl.BlockSpec((1, C), const(2)),                    # ln1 beta
            pl.BlockSpec((3, 9, C), const(3)),                 # depthwise conv weights
            pl.BlockSpec((3, 1, C), const(3)),                 # folded BN scale
            pl.BlockSpec((3, 1, C), const(3)),                 # folded BN shift
            pl.BlockSpec((3, C, C), const(3)),                 # fused Wq*scale/Wk/Wv
            pl.BlockSpec((C, C), const(2)),                    # fused output proj W^T
            pl.BlockSpec((1, C), const(2)),                    # proj bias
            pl.BlockSpec((1, C), const(2)),                    # ln2 gamma
            pl.BlockSpec((1, C), const(2)),                    # ln2 beta
            pl.BlockSpec((C, hidden), const(2)),               # fc1 weight^T
            pl.BlockSpec((1, hidden), const(2)),               # fc1 bias
            pl.BlockSpec((hidden, C), const(2)),               # fc2 weight^T
            pl.BlockSpec((1, C), const(2)),                    # fc2 bias
        ],
        out_specs=pl.BlockSpec((1, T, C), lambda b: (b, 0, 0)),
        scratch_shapes=[pltpu.VMEM((pad_rows, C), jnp.float32)],
        compiler_params=pltpu.CompilerParams(
            dimension_semantics=("parallel",),
            vmem_limit_bytes=vmem_limit),
    )(
        x_perm, colmask,
        params["ln1_g"].reshape(1, C), params["ln1_b"].reshape(1, C),
        dw, bn_s, bn_t, wqkv, params["proj_w"].T,
        params["proj_b"].reshape(1, C),
        params["ln2_g"].reshape(1, C), params["ln2_b"].reshape(1, C),
        params["fc1_w"].T, params["fc1_b"].reshape(1, hidden),
        params["fc2_w"].T, params["fc2_b"].reshape(1, C),
    )

    # Restore the original token order (cls token first).
    return jnp.concatenate([out_perm[:, HW:, :], out_perm[:, :HW, :]], axis=1)


# ------------------------- pure-JAX reference (for the self-check) --------------
def _layer_norm_ref(x, g, b, eps=1e-5):
    mu = jnp.mean(x, axis=-1, keepdims=True)
    d = x - mu
    var = jnp.mean(d * d, axis=-1, keepdims=True)
    return d * jax.lax.rsqrt(var + eps) * g + b


def block_reference(x, p, *, h, w, num_heads):
    B, T, C = x.shape
    eps = 1e-5
    xn = _layer_norm_ref(x, p["ln1_g"], p["ln1_b"])
    cls, xs = xn[:, :1, :], xn[:, 1:, :]
    xsp = xs.reshape(B, h, w, C).transpose(0, 3, 1, 2)      # b c h w

    def conv_proj(wc, g, b, m, v):
        y = jax.lax.conv_general_dilated(
            xsp, wc, (1, 1), ((1, 1), (1, 1)),
            dimension_numbers=("NCHW", "OIHW", "NCHW"), feature_group_count=C)
        y = (y - m.reshape(1, C, 1, 1)) * jax.lax.rsqrt(v.reshape(1, C, 1, 1) + eps)
        y = y * g.reshape(1, C, 1, 1) + b.reshape(1, C, 1, 1)
        y = y.reshape(B, C, h * w).transpose(0, 2, 1)
        return jnp.concatenate([cls, y], axis=1)

    tq = conv_proj(p["conv_q_w"], p["bn_q_g"], p["bn_q_b"], p["bn_q_m"], p["bn_q_v"])
    tk = conv_proj(p["conv_k_w"], p["bn_k_g"], p["bn_k_b"], p["bn_k_m"], p["bn_k_v"])
    tv = conv_proj(p["conv_v_w"], p["bn_v_g"], p["bn_v_b"], p["bn_v_m"], p["bn_v_v"])

    d = C // num_heads

    def split(z):
        return z.reshape(B, T, num_heads, d).transpose(0, 2, 1, 3)

    q = split(tq @ p["wq"].T)
    k = split(tk @ p["wk"].T)
    v = split(tv @ p["wv"].T)
    s = jnp.einsum("bhld,bhtd->bhlt", q, k) * (C ** -0.5)
    a = jax.nn.softmax(s, axis=-1)
    o = jnp.einsum("bhlt,bhtd->bhld", a, v)
    o = o.transpose(0, 2, 1, 3).reshape(B, T, C)
    attn = o @ p["proj_w"].T + p["proj_b"]

    x1 = x + attn
    xn2 = _layer_norm_ref(x1, p["ln2_g"], p["ln2_b"])
    h1 = _gelu_tanh(xn2 @ p["fc1_w"].T + p["fc1_b"])
    return x1 + h1 @ p["fc2_w"].T + p["fc2_b"]


if __name__ == "__main__":
    B, dim, num_heads, h, w = 2, 32, 4, 8, 8
    hidden = int(dim * 4.0)
    T = h * w + 1

    key = jax.random.PRNGKey(0)
    keys = iter(jax.random.split(key, 40))

    def nrm(shape, s=1.0):
        return s * jax.random.normal(next(keys), shape, dtype=jnp.float32)

    x = nrm((B, T, dim), 1.0)
    params = {
        "ln1_g": 1.0 + 0.1 * nrm((dim,)), "ln1_b": 0.1 * nrm((dim,)),
        "conv_q_w": nrm((dim, 1, 3, 3), 0.1),
        "conv_k_w": nrm((dim, 1, 3, 3), 0.1),
        "conv_v_w": nrm((dim, 1, 3, 3), 0.1),
        "wq": nrm((dim, dim), 0.1), "wk": nrm((dim, dim), 0.1),
        "wv": nrm((dim, dim), 0.1),
        "proj_w": nrm((dim, dim), 0.1), "proj_b": nrm((dim,), 0.02),
        "ln2_g": 1.0 + 0.1 * nrm((dim,)), "ln2_b": 0.1 * nrm((dim,)),
        "fc1_w": nrm((hidden, dim), 0.05), "fc1_b": nrm((hidden,), 0.02),
        "fc2_w": nrm((dim, hidden), 0.05), "fc2_b": nrm((dim,), 0.02),
    }
    for nm in ("q", "k", "v"):
        params[f"bn_{nm}_g"] = 1.0 + 0.1 * nrm((dim,))
        params[f"bn_{nm}_b"] = 0.1 * nrm((dim,))
        params[f"bn_{nm}_m"] = 0.1 * nrm((dim,))
        params[f"bn_{nm}_v"] = 0.5 + jax.random.uniform(next(keys), (dim,),
                                                        dtype=jnp.float32)

    out = block_forward(x, params, h=h, w=w, num_heads=num_heads)
    out = jax.block_until_ready(out)

    ref = block_reference(x, params, h=h, w=w, num_heads=num_heads)
    assert out.shape == ref.shape, (out.shape, ref.shape)
    assert jnp.allclose(out, ref, rtol=1e-2, atol=1e-2), (
        "mismatch vs reference: max abs err = "
        f"{float(jnp.max(jnp.abs(out - ref)))}")

    print("KERNEL_OK")
</pallas_src>

<mosaic_0001>
module attributes {stable_mosaic.version = 11 : i64} {
  func.func @_block_kernel(%arg0: i32, %arg1: memref<1x65x32xf32, #tpu.memory_space<vmem>>, %arg2: memref<2x64x1xf32, #tpu.memory_space<vmem>>, %arg3: memref<1x32xf32, #tpu.memory_space<vmem>>, %arg4: memref<1x32xf32, #tpu.memory_space<vmem>>, %arg5: memref<3x9x32xf32, #tpu.memory_space<vmem>>, %arg6: memref<3x1x32xf32, #tpu.memory_space<vmem>>, %arg7: memref<3x1x32xf32, #tpu.memory_space<vmem>>, %arg8: memref<3x32x32xf32, #tpu.memory_space<vmem>>, %arg9: memref<32x32xf32, #tpu.memory_space<vmem>>, %arg10: memref<1x32xf32, #tpu.memory_space<vmem>>, %arg11: memref<1x32xf32, #tpu.memory_space<vmem>>, %arg12: memref<1x32xf32, #tpu.memory_space<vmem>>, %arg13: memref<32x128xf32, #tpu.memory_space<vmem>>, %arg14: memref<1x128xf32, #tpu.memory_space<vmem>>, %arg15: memref<128x32xf32, #tpu.memory_space<vmem>>, %arg16: memref<1x32xf32, #tpu.memory_space<vmem>>, %arg17: memref<1x65x32xf32, #tpu.memory_space<vmem>>, %arg18: memref<96x32xf32, #tpu.memory_space<vmem>>) attributes {dimension_semantics = [#tpu.dimension_semantics<parallel>], iteration_bounds = array<i64: 2>, scalar_prefetch = 0 : i64, scratch_operands = 1 : i64, tpu.core_type = #tpu.core_type<tc>, window_params = [{transform_indices = @transform_0, window_bounds = array<i64: 1, 65, 32>}, {pipeline_mode = #tpu.pipeline_mode<synchronous>, transform_indices = @transform_1, window_bounds = array<i64: 2, 64, 1>}, {pipeline_mode = #tpu.pipeline_mode<synchronous>, transform_indices = @transform_2, window_bounds = array<i64: 1, 32>}, {pipeline_mode = #tpu.pipeline_mode<synchronous>, transform_indices = @transform_3, window_bounds = array<i64: 1, 32>}, {pipeline_mode = #tpu.pipeline_mode<synchronous>, transform_indices = @transform_4, window_bounds = array<i64: 3, 9, 32>}, {pipeline_mode = #tpu.pipeline_mode<synchronous>, transform_indices = @transform_5, window_bounds = array<i64: 3, 1, 32>}, {pipeline_mode = #tpu.pipeline_mode<synchronous>, transform_indices = @transform_6, window_bounds = array<i64: 3, 1, 32>}, {pipeline_mode = #tpu.pipeline_mode<synchronous>, transform_indices = @transform_7, window_bounds = array<i64: 3, 32, 32>}, {pipeline_mode = #tpu.pipeline_mode<synchronous>, transform_indices = @transform_8, window_bounds = array<i64: 32, 32>}, {pipeline_mode = #tpu.pipeline_mode<synchronous>, transform_indices = @transform_9, window_bounds = array<i64: 1, 32>}, {pipeline_mode = #tpu.pipeline_mode<synchronous>, transform_indices = @transform_10, window_bounds = array<i64: 1, 32>}, {pipeline_mode = #tpu.pipeline_mode<synchronous>, transform_indices = @transform_11, window_bounds = array<i64: 1, 32>}, {pipeline_mode = #tpu.pipeline_mode<synchronous>, transform_indices = @transform_12, window_bounds = array<i64: 32, 128>}, {pipeline_mode = #tpu.pipeline_mode<synchronous>, transform_indices = @transform_13, window_bounds = array<i64: 1, 128>}, {pipeline_mode = #tpu.pipeline_mode<synchronous>, transform_indices = @transform_14, window_bounds = array<i64: 128, 32>}, {pipeline_mode = #tpu.pipeline_mode<synchronous>, transform_indices = @transform_15, window_bounds = array<i64: 1, 32>}, {transform_indices = @transform_16, window_bounds = array<i64: 1, 65, 32>}]} {
    %c0 = arith.constant 0 : index
    %c0_0 = arith.constant 0 : index
    %c0_1 = arith.constant 0 : index
    %0 = vector.load %arg1[%c0, %c0_0, %c0_1] : memref<1x65x32xf32, #tpu.memory_space<vmem>>, vector<1x65x32xf32>
    %1 = vector.shape_cast %0 : vector<1x65x32xf32> to vector<65x32xf32>
    %c0_2 = arith.constant 0 : index
    %c0_3 = arith.constant 0 : index
    %2 = vector.load %arg3[%c0_2, %c0_3] : memref<1x32xf32, #tpu.memory_space<vmem>>, vector<1x32xf32>
    %c0_4 = arith.constant 0 : index
    %c0_5 = arith.constant 0 : index
    %3 = vector.load %arg4[%c0_4, %c0_5] : memref<1x32xf32, #tpu.memory_space<vmem>>, vector<1x32xf32>
    %cst = arith.constant dense<0.000000e+00> : vector<65xf32>
    %4 = vector.multi_reduction <add>, %1, %cst [1] : vector<65x32xf32> to vector<65xf32>
    %5 = vector.shape_cast %4 : vector<65xf32> to vector<65x1xf32>
    %cst_6 = arith.constant 3.200000e+01 : f32
    %6 = vector.broadcast %cst_6 : f32 to vector<65x1xf32>
    %7 = arith.divf %5, %6 : vector<65x1xf32>
    %8 = vector.broadcast %7 : vector<65x1xf32> to vector<65x32xf32>
    %9 = arith.subf %1, %8 : vector<65x32xf32>
    %10 = arith.mulf %9, %9 : vector<65x32xf32>
    %cst_7 = arith.constant dense<0.000000e+00> : vector<65xf32>
    %11 = vector.multi_reduction <add>, %10, %cst_7 [1] : vector<65x32xf32> to vector<65xf32>
    %12 = vector.shape_cast %11 : vector<65xf32> to vector<65x1xf32>
    %cst_8 = arith.constant 3.200000e+01 : f32
    %13 = vector.broadcast %cst_8 : f32 to vector<65x1xf32>
    %14 = arith.divf %12, %13 : vector<65x1xf32>
    %cst_9 = arith.constant 9.99999974E-6 : f32
    %15 = vector.broadcast %cst_9 : f32 to vector<65x1xf32>
    %16 = arith.addf %14, %15 : vector<65x1xf32>
    %17 = math.rsqrt %16 : vector<65x1xf32>
    %18 = vector.broadcast %17 : vector<65x1xf32> to vector<65x32xf32>
    %19 = arith.mulf %9, %18 : vector<65x32xf32>
    %20 = vector.broadcast %2 : vector<1x32xf32> to vector<65x32xf32>
    %21 = arith.mulf %19, %20 : vector<65x32xf32>
    %22 = vector.broadcast %3 : vector<1x32xf32> to vector<65x32xf32>
    %23 = arith.addf %21, %22 : vector<65x32xf32>
    %24 = vector.extract_strided_slice %23 {offsets = [0, 0], sizes = [64, 32], strides = [1, 1]} : vector<65x32xf32> to vector<64x32xf32>
    %25 = vector.extract_strided_slice %23 {offsets = [64, 0], sizes = [1, 32], strides = [1, 1]} : vector<65x32xf32> to vector<1x32xf32>
    %cst_10 = arith.constant 0.000000e+00 : f32
    %26 = vector.broadcast %cst_10 : f32 to vector<16x32xf32>
    %c0_11 = arith.constant 0 : index
    %c0_12 = arith.constant 0 : index
    %27 = vector.load %arg18[%c0_11, %c0_12] : memref<96x32xf32, #tpu.memory_space<vmem>>, vector<16x32xf32>
    tpu.vector_store %arg18[%c0_11, %c0_12], %26 {strides = array<i32>} : memref<96x32xf32, #tpu.memory_space<vmem>>, vector<16x32xf32>,
    %cst_13 = arith.constant 0.000000e+00 : f32
    %28 = vector.broadcast %cst_13 : f32 to vector<16x32xf32>
    %c80 = arith.constant 80 : index
    %c0_14 = arith.constant 0 : index
    %29 = vector.load %arg18[%c80, %c0_14] : memref<96x32xf32, #tpu.memory_space<vmem>>, vector<16x32xf32>
    tpu.vector_store %arg18[%c80, %c0_14], %28 {strides = array<i32>} : memref<96x32xf32, #tpu.memory_space<vmem>>, vector<16x32xf32>,
    %c16 = arith.constant 16 : index
    %c0_15 = arith.constant 0 : index
    %30 = vector.load %arg18[%c16, %c0_15] : memref<96x32xf32, #tpu.memory_space<vmem>>, vector<64x32xf32>
    tpu.vector_store %arg18[%c16, %c0_15], %24 {strides = array<i32>} : memref<96x32xf32, #tpu.memory_space<vmem>>, vector<64x32xf32>,
    %cst_16 = arith.constant 0.000000e+00 : f32
    %31 = vector.broadcast %cst_16 : f32 to vector<64x32xf32>
    %cst_17 = arith.constant 0.000000e+00 : f32
    %32 = vector.broadcast %cst_17 : f32 to vector<64x32xf32>
    %cst_18 = arith.constant 0.000000e+00 : f32
    %33 = vector.broadcast %cst_18 : f32 to vector<64x32xf32>
    %c7 = arith.constant 7 : index
    %c0_19 = arith.constant 0 : index
    %34 = vector.load %arg18[%c7, %c0_19] : memref<96x32xf32, #tpu.memory_space<vmem>>, vector<64x32xf32>
    %c0_20 = arith.constant 0 : index
    %c0_21 = arith.constant 0 : index
    %c0_22 = arith.constant 0 : index
    %35 = vector.load %arg2[%c0_20, %c0_21, %c0_22] : memref<2x64x1xf32, #tpu.memory_space<vmem>>, vector<1x64x1xf32>
    %36 = vector.shape_cast %35 : vector<1x64x1xf32> to vector<64x1xf32>
    %37 = vector.broadcast %36 : vector<64x1xf32> to vector<64x32xf32>
    %38 = arith.mulf %34, %37 : vector<64x32xf32>
    %c0_23 = arith.constant 0 : index
    %c0_24 = arith.constant 0 : index
    %c0_25 = arith.constant 0 : index
    %39 = vector.load %arg5[%c0_23, %c0_24, %c0_25] : memref<3x9x32xf32, #tpu.memory_space<vmem>>, vector<1x1x32xf32>
    %40 = vector.shape_cast %39 : vector<1x1x32xf32> to vector<1x32xf32>
    %41 = vector.broadcast %40 : vector<1x32xf32> to vector<64x32xf32>
    %42 = arith.mulf %38, %41 : vector<64x32xf32>
    %43 = arith.addf %31, %42 : vector<64x32xf32>
    %c1 = arith.constant 1 : index
    %c0_26 = arith.constant 0 : index
    %c0_27 = arith.constant 0 : index
    %44 = vector.load %arg5[%c1, %c0_26, %c0_27] : memref<3x9x32xf32, #tpu.memory_space<vmem>>, vector<1x1x32xf32>
    %45 = vector.shape_cast %44 : vector<1x1x32xf32> to vector<1x32xf32>
    %46 = vector.broadcast %45 : vector<1x32xf32> to vector<64x32xf32>
    %47 = arith.mulf %38, %46 : vector<64x32xf32>
    %48 = arith.addf %32, %47 : vector<64x32xf32>
    %c2 = arith.constant 2 : index
    %c0_28 = arith.constant 0 : index
    %c0_29 = arith.constant 0 : index
    %49 = vector.load %arg5[%c2, %c0_28, %c0_29] : memref<3x9x32xf32, #tpu.memory_space<vmem>>, vector<1x1x32xf32>
    %50 = vector.shape_cast %49 : vector<1x1x32xf32> to vector<1x32xf32>
    %51 = vector.broadcast %50 : vector<1x32xf32> to vector<64x32xf32>
    %52 = arith.mulf %38, %51 : vector<64x32xf32>
    %53 = arith.addf %33, %52 : vector<64x32xf32>
    %c8 = arith.constant 8 : index
    %c0_30 = arith.constant 0 : index
    %54 = vector.load %arg18[%c8, %c0_30] : memref<96x32xf32, #tpu.memory_space<vmem>>, vector<64x32xf32>
    %c0_31 = arith.constant 0 : index
    %c1_32 = arith.constant 1 : index
    %c0_33 = arith.constant 0 : index
    %55 = vector.load %arg5[%c0_31, %c1_32, %c0_33] : memref<3x9x32xf32, #tpu.memory_space<vmem>>, vector<1x1x32xf32>
    %56 = vector.shape_cast %55 : vector<1x1x32xf32> to vector<1x32xf32>
    %57 = vector.broadcast %56 : vector<1x32xf32> to vector<64x32xf32>
    %58 = arith.mulf %54, %57 : vector<64x32xf32>
    %59 = arith.addf %43, %58 : vector<64x32xf32>
    %c1_34 = arith.constant 1 : index
    %c1_35 = arith.constant 1 : index
    %c0_36 = arith.constant 0 : index
    %60 = vector.load %arg5[%c1_34, %c1_35, %c0_36] : memref<3x9x32xf32, #tpu.memory_space<vmem>>, vector<1x1x32xf32>
    %61 = vector.shape_cast %60 : vector<1x1x32xf32> to vector<1x32xf32>
    %62 = vector.broadcast %61 : vector<1x32xf32> to vector<64x32xf32>
    %63 = arith.mulf %54, %62 : vector<64x32xf32>
    %64 = arith.addf %48, %63 : vector<64x32xf32>
    %c2_37 = arith.constant 2 : index
    %c1_38 = arith.constant 1 : index
    %c0_39 = arith.constant 0 : index
    %65 = vector.load %arg5[%c2_37, %c1_38, %c0_39] : memref<3x9x32xf32, #tpu.memory_space<vmem>>, vector<1x1x32xf32>
    %66 = vector.shape_cast %65 : vector<1x1x32xf32> to vector<1x32xf32>
    %67 = vector.broadcast %66 : vector<1x32xf32> to vector<64x32xf32>
    %68 = arith.mulf %54, %67 : vector<64x32xf32>
    %69 = arith.addf %53, %68 : vector<64x32xf32>
    %c9 = arith.constant 9 : index
    %c0_40 = arith.constant 0 : index
    %70 = vector.load %arg18[%c9, %c0_40] : memref<96x32xf32, #tpu.memory_space<vmem>>, vector<64x32xf32>
    %c1_41 = arith.constant 1 : index
    %c0_42 = arith.constant 0 : index
    %c0_43 = arith.constant 0 : index
    %71 = vector.load %arg2[%c1_41, %c0_42, %c0_43] : memref<2x64x1xf32, #tpu.memory_space<vmem>>, vector<1x64x1xf32>
    %72 = vector.shape_cast %71 : vector<1x64x1xf32> to vector<64x1xf32>
    %73 = vector.broadcast %72 : vector<64x1xf32> to vector<64x32xf32>
    %74 = arith.mulf %70, %73 : vector<64x32xf32>
    %c0_44 = arith.constant 0 : index
    %c2_45 = arith.constant 2 : index
    %c0_46 = arith.constant 0 : index
    %75 = vector.load %arg5[%c0_44, %c2_45, %c0_46] : memref<3x9x32xf32, #tpu.memory_space<vmem>>, vector<1x1x32xf32>
    %76 = vector.shape_cast %75 : vector<1x1x32xf32> to vector<1x32xf32>
    %77 = vector.broadcast %76 : vector<1x32xf32> to vector<64x32xf32>
    %78 = arith.mulf %74, %77 : vector<64x32xf32>
    %79 = arith.addf %59, %78 : vector<64x32xf32>
    %c1_47 = arith.constant 1 : index
    %c2_48 = arith.constant 2 : index
    %c0_49 = arith.constant 0 : index
    %80 = vector.load %arg5[%c1_47, %c2_48, %c0_49] : memref<3x9x32xf32, #tpu.memory_space<vmem>>, vector<1x1x32xf32>
    %81 = vector.shape_cast %80 : vector<1x1x32xf32> to vector<1x32xf32>
    %82 = vector.broadcast %81 : vector<1x32xf32> to vector<64x32xf32>
    %83 = arith.mulf %74, %82 : vector<64x32xf32>
    %84 = arith.addf %64, %83 : vector<64x32xf32>
    %c2_50 = arith.constant 2 : index
    %c2_51 = arith.constant 2 : index
    %c0_52 = arith.constant 0 : index
    %85 = vector.load %arg5[%c2_50, %c2_51, %c0_52] : memref<3x9x32xf32, #tpu.memory_space<vmem>>, vector<1x1x32xf32>
    %86 = vector.shape_cast %85 : vector<1x1x32xf32> to vector<1x32xf32>
    %87 = vector.broadcast %86 : vector<1x32xf32> to vector<64x32xf32>
    %88 = arith.mulf %74, %87 : vector<64x32xf32>
    %89 = arith.addf %69, %88 : vector<64x32xf32>
    %c15 = arith.constant 15 : index
    %c0_53 = arith.constant 0 : index
    %90 = vector.load %arg18[%c15, %c0_53] : memref<96x32xf32, #tpu.memory_space<vmem>>, vector<64x32xf32>
    %c0_54 = arith.constant 0 : index
    %c0_55 = arith.constant 0 : index
    %c0_56 = arith.constant 0 : index
    %91 = vector.load %arg2[%c0_54, %c0_55, %c0_56] : memref<2x64x1xf32, #tpu.memory_space<vmem>>, vector<1x64x1xf32>
    %92 = vector.shape_cast %91 : vector<1x64x1xf32> to vector<64x1xf32>
    %93 = vector.broadcast %92 : vector<64x1xf32> to vector<64x32xf32>
    %94 = arith.mulf %90, %93 : vector<64x32xf32>
    %c0_57 = arith.constant 0 : index
    %c3 = arith.constant 3 : index
    %c0_58 = arith.constant 0 : index
    %95 = vector.load %arg5[%c0_57, %c3, %c0_58] : memref<3x9x32xf32, #tpu.memory_space<vmem>>, vector<1x1x32xf32>
    %96 = vector.shape_cast %95 : vector<1x1x32xf32> to vector<1x32xf32>
    %97 = vector.broadcast %96 : vector<1x32xf32> to vector<64x32xf32>
    %98 = arith.mulf %94, %97 : vector<64x32xf32>
    %99 = arith.addf %79, %98 : vector<64x32xf32>
    %c1_59 = arith.constant 1 : index
    %c3_60 = arith.constant 3 : index
    %c0_61 = arith.constant 0 : index
    %100 = vector.load %arg5[%c1_59, %c3_60, %c0_61] : memref<3x9x32xf32, #tpu.memory_space<vmem>>, vector<1x1x32xf32>
    %101 = vector.shape_cast %100 : vector<1x1x32xf32> to vector<1x32xf32>
    %102 = vector.broadcast %101 : vector<1x32xf32> to vector<64x32xf32>
    %103 = arith.mulf %94, %102 : vector<64x32xf32>
    %104 = arith.addf %84, %103 : vector<64x32xf32>
    %c2_62 = arith.constant 2 : index
    %c3_63 = arith.constant 3 : index
    %c0_64 = arith.constant 0 : index
    %105 = vector.load %arg5[%c2_62, %c3_63, %c0_64] : memref<3x9x32xf32, #tpu.memory_space<vmem>>, vector<1x1x32xf32>
    %106 = vector.shape_cast %105 : vector<1x1x32xf32> to vector<1x32xf32>
    %107 = vector.broadcast %106 : vector<1x32xf32> to vector<64x32xf32>
    %108 = arith.mulf %94, %107 : vector<64x32xf32>
    %109 = arith.addf %89, %108 : vector<64x32xf32>
    %c16_65 = arith.constant 16 : index
    %c0_66 = arith.constant 0 : index
    %110 = vector.load %arg18[%c16_65, %c0_66] : memref<96x32xf32, #tpu.memory_space<vmem>>, vector<64x32xf32>
    %c0_67 = arith.constant 0 : index
    %c4 = arith.constant 4 : index
    %c0_68 = arith.constant 0 : index
    %111 = vector.load %arg5[%c0_67, %c4, %c0_68] : memref<3x9x32xf32, #tpu.memory_space<vmem>>, vector<1x1x32xf32>
    %112 = vector.shape_cast %111 : vector<1x1x32xf32> to vector<1x32xf32>
    %113 = vector.broadcast %112 : vector<1x32xf32> to vector<64x32xf32>
    %114 = arith.mulf %110, %113 : vector<64x32xf32>
    %115 = arith.addf %99, %114 : vector<64x32xf32>
    %c1_69 = arith.constant 1 : index
    %c4_70 = arith.constant 4 : index
    %c0_71 = arith.constant 0 : index
    %116 = vector.load %arg5[%c1_69, %c4_70, %c0_71] : memref<3x9x32xf32, #tpu.memory_space<vmem>>, vector<1x1x32xf32>
    %117 = vector.shape_cast %116 : vector<1x1x32xf32> to vector<1x32xf32>
    %118 = vector.broadcast %117 : vector<1x32xf32> to vector<64x32xf32>
    %119 = arith.mulf %110, %118 : vector<64x32xf32>
    %120 = arith.addf %104, %119 : vector<64x32xf32>
    %c2_72 = arith.constant 2 : index
    %c4_73 = arith.constant 4 : index
    %c0_74 = arith.constant 0 : index
    %121 = vector.load %arg5[%c2_72, %c4_73, %c0_74] : memref<3x9x32xf32, #tpu.memory_space<vmem>>, vector<1x1x32xf32>
    %122 = vector.shape_cast %121 : vector<1x1x32xf32> to vector<1x32xf32>
    %123 = vector.broadcast %122 : vector<1x32xf32> to vector<64x32xf32>
    %124 = arith.mulf %110, %123 : vector<64x32xf32>
    %125 = arith.addf %109, %124 : vector<64x32xf32>
    %c17 = arith.constant 17 : index
    %c0_75 = arith.constant 0 : index
    %126 = vector.load %arg18[%c17, %c0_75] : memref<96x32xf32, #tpu.memory_space<vmem>>, vector<64x32xf32>
    %c1_76 = arith.constant 1 : index
    %c0_77 = arith.constant 0 : index
    %c0_78 = arith.constant 0 : index
    %127 = vector.load %arg2[%c1_76, %c0_77, %c0_78] : memref<2x64x1xf32, #tpu.memory_space<vmem>>, vector<1x64x1xf32>
    %128 = vector.shape_cast %127 : vector<1x64x1xf32> to vector<64x1xf32>
    %129 = vector.broadcast %128 : vector<64x1xf32> to vector<64x32xf32>
    %130 = arith.mulf %126, %129 : vector<64x32xf32>
    %c0_79 = arith.constant 0 : index
    %c5 = arith.constant 5 : index
    %c0_80 = arith.constant 0 : index
    %131 = vector.load %arg5[%c0_79, %c5, %c0_80] : memref<3x9x32xf32, #tpu.memory_space<vmem>>, vector<1x1x32xf32>
    %132 = vector.shape_cast %131 : vector<1x1x32xf32> to vector<1x32xf32>
    %133 = vector.broadcast %132 : vector<1x32xf32> to vector<64x32xf32>
    %134 = arith.mulf %130, %133 : vector<64x32xf32>
    %135 = arith.addf %115, %134 : vector<64x32xf32>
    %c1_81 = arith.constant 1 : index
    %c5_82 = arith.constant 5 : index
    %c0_83 = arith.constant 0 : index
    %136 = vector.load %arg5[%c1_81, %c5_82, %c0_83] : memref<3x9x32xf32, #tpu.memory_space<vmem>>, vector<1x1x32xf32>
    %137 = vector.shape_cast %136 : vector<1x1x32xf32> to vector<1x32xf32>
    %138 = vector.broadcast %137 : vector<1x32xf32> to vector<64x32xf32>
    %139 = arith.mulf %130, %138 : vector<64x32xf32>
    %140 = arith.addf %120, %139 : vector<64x32xf32>
    %c2_84 = arith.constant 2 : index
    %c5_85 = arith.constant 5 : index
    %c0_86 = arith.constant 0 : index
    %141 = vector.load %arg5[%c2_84, %c5_85, %c0_86] : memref<3x9x32xf32, #tpu.memory_space<vmem>>, vector<1x1x32xf32>
    %142 = vector.shape_cast %141 : vector<1x1x32xf32> to vector<1x32xf32>
    %143 = vector.broadcast %142 : vector<1x32xf32> to vector<64x32xf32>
    %144 = arith.mulf %130, %143 : vector<64x32xf32>
    %145 = arith.addf %125, %144 : vector<64x32xf32>
    %c23 = arith.constant 23 : index
    %c0_87 = arith.constant 0 : index
    %146 = vector.load %arg18[%c23, %c0_87] : memref<96x32xf32, #tpu.memory_space<vmem>>, vector<64x32xf32>
    %c0_88 = arith.constant 0 : index
    %c0_89 = arith.constant 0 : index
    %c0_90 = arith.constant 0 : index
    %147 = vector.load %arg2[%c0_88, %c0_89, %c0_90] : memref<2x64x1xf32, #tpu.memory_space<vmem>>, vector<1x64x1xf32>
    %148 = vector.shape_cast %147 : vector<1x64x1xf32> to vector<64x1xf32>
    %149 = vector.broadcast %148 : vector<64x1xf32> to vector<64x32xf32>
    %150 = arith.mulf %146, %149 : vector<64x32xf32>
    %c0_91 = arith.constant 0 : index
    %c6 = arith.constant 6 : index
    %c0_92 = arith.constant 0 : index
    %151 = vector.load %arg5[%c0_91, %c6, %c0_92] : memref<3x9x32xf32, #tpu.memory_space<vmem>>, vector<1x1x32xf32>
    %152 = vector.shape_cast %151 : vector<1x1x32xf32> to vector<1x32xf32>
    %153 = vector.broadcast %152 : vector<1x32xf32> to vector<64x32xf32>
    %154 = arith.mulf %150, %153 : vector<64x32xf32>
    %155 = arith.addf %135, %154 : vector<64x32xf32>
    %c1_93 = arith.constant 1 : index
    %c6_94 = arith.constant 6 : index
    %c0_95 = arith.constant 0 : index
    %156 = vector.load %arg5[%c1_93, %c6_94, %c0_95] : memref<3x9x32xf32, #tpu.memory_space<vmem>>, vector<1x1x32xf32>
    %157 = vector.shape_cast %156 : vector<1x1x32xf32> to vector<1x32xf32>
    %158 = vector.broadcast %157 : vector<1x32xf32> to vector<64x32xf32>
    %159 = arith.mulf %150, %158 : vector<64x32xf32>
    %160 = arith.addf %140, %159 : vector<64x32xf32>
    %c2_96 = arith.constant 2 : index
    %c6_97 = arith.constant 6 : index
    %c0_98 = arith.constant 0 : index
    %161 = vector.load %arg5[%c2_96, %c6_97, %c0_98] : memref<3x9x32xf32, #tpu.memory_space<vmem>>, vector<1x1x32xf32>
    %162 = vector.shape_cast %161 : vector<1x1x32xf32> to vector<1x32xf32>
    %163 = vector.broadcast %162 : vector<1x32xf32> to vector<64x32xf32>
    %164 = arith.mulf %150, %163 : vector<64x32xf32>
    %165 = arith.addf %145, %164 : vector<64x32xf32>
    %c24 = arith.constant 24 : index
    %c0_99 = arith.constant 0 : index
    %166 = vector.load %arg18[%c24, %c0_99] : memref<96x32xf32, #tpu.memory_space<vmem>>, vector<64x32xf32>
    %c0_100 = arith.constant 0 : index
    %c7_101 = arith.constant 7 : index
    %c0_102 = arith.constant 0 : index
    %167 = vector.load %arg5[%c0_100, %c7_101, %c0_102] : memref<3x9x32xf32, #tpu.memory_space<vmem>>, vector<1x1x32xf32>
    %168 = vector.shape_cast %167 : vector<1x1x32xf32> to vector<1x32xf32>
    %169 = vector.broadcast %168 : vector<1x32xf32> to vector<64x32xf32>
    %170 = arith.mulf %166, %169 : vector<64x32xf32>
    %171 = arith.addf %155, %170 : vector<64x32xf32>
    %c1_103 = arith.constant 1 : index
    %c7_104 = arith.constant 7 : index
    %c0_105 = arith.constant 0 : index
    %172 = vector.load %arg5[%c1_103, %c7_104, %c0_105] : memref<3x9x32xf32, #tpu.memory_space<vmem>>, vector<1x1x32xf32>
    %173 = vector.shape_cast %172 : vector<1x1x32xf32> to vector<1x32xf32>
    %174 = vector.broadcast %173 : vector<1x32xf32> to vector<64x32xf32>
    %175 = arith.mulf %166, %174 : vector<64x32xf32>
    %176 = arith.addf %160, %175 : vector<64x32xf32>
    %c2_106 = arith.constant 2 : index
    %c7_107 = arith.constant 7 : index
    %c0_108 = arith.constant 0 : index
    %177 = vector.load %arg5[%c2_106, %c7_107, %c0_108] : memref<3x9x32xf32, #tpu.memory_space<vmem>>, vector<1x1x32xf32>
    %178 = vector.shape_cast %177 : vector<1x1x32xf32> to vector<1x32xf32>
    %179 = vector.broadcast %178 : vector<1x32xf32> to vector<64x32xf32>
    %180 = arith.mulf %166, %179 : vector<64x32xf32>
    %181 = arith.addf %165, %180 : vector<64x32xf32>
    %c25 = arith.constant 25 : index
    %c0_109 = arith.constant 0 : index
    %182 = vector.load %arg18[%c25, %c0_109] : memref<96x32xf32, #tpu.memory_space<vmem>>, vector<64x32xf32>
    %c1_110 = arith.constant 1 : index
    %c0_111 = arith.constant 0 : index
    %c0_112 = arith.constant 0 : index
    %183 = vector.load %arg2[%c1_110, %c0_111, %c0_112] : memref<2x64x1xf32, #tpu.memory_space<vmem>>, vector<1x64x1xf32>
    %184 = vector.shape_cast %183 : vector<1x64x1xf32> to vector<64x1xf32>
    %185 = vector.broadcast %184 : vector<64x1xf32> to vector<64x32xf32>
    %186 = arith.mulf %182, %185 : vector<64x32xf32>
    %c0_113 = arith.constant 0 : index
    %c8_114 = arith.constant 8 : index
    %c0_115 = arith.constant 0 : index
    %187 = vector.load %arg5[%c0_113, %c8_114, %c0_115] : memref<3x9x32xf32, #tpu.memory_space<vmem>>, vector<1x1x32xf32>
    %188 = vector.shape_cast %187 : vector<1x1x32xf32> to vector<1x32xf32>
    %189 = vector.broadcast %188 : vector<1x32xf32> to vector<64x32xf32>
    %190 = arith.mulf %186, %189 : vector<64x32xf32>
    %191 = arith.addf %171, %190 : vector<64x32xf32>
    %c1_116 = arith.constant 1 : index
    %c8_117 = arith.constant 8 : index
    %c0_118 = arith.constant 0 : index
    %192 = vector.load %arg5[%c1_116, %c8_117, %c0_118] : memref<3x9x32xf32, #tpu.memory_space<vmem>>, vector<1x1x32xf32>
    %193 = vector.shape_cast %192 : vector<1x1x32xf32> to vector<1x32xf32>
    %194 = vector.broadcast %193 : vector<1x32xf32> to vector<64x32xf32>
    %195 = arith.mulf %186, %194 : vector<64x32xf32>
    %196 = arith.addf %176, %195 : vector<64x32xf32>
    %c2_119 = arith.constant 2 : index
    %c8_120 = arith.constant 8 : index
    %c0_121 = arith.constant 0 : index
    %197 = vector.load %arg5[%c2_119, %c8_120, %c0_121] : memref<3x9x32xf32, #tpu.memory_space<vmem>>, vector<1x1x32xf32>
    %198 = vector.shape_cast %197 : vector<1x1x32xf32> to vector<1x32xf32>
    %199 = vector.broadcast %198 : vector<1x32xf32> to vector<64x32xf32>
    %200 = arith.mulf %186, %199 : vector<64x32xf32>
    %201 = arith.addf %181, %200 : vector<64x32xf32>
    %c0_122 = arith.constant 0 : index
    %c0_123 = arith.constant 0 : index
    %c0_124 = arith.constant 0 : index
    %202 = vector.load %arg6[%c0_122, %c0_123, %c0_124] : memref<3x1x32xf32, #tpu.memory_space<vmem>>, vector<1x1x32xf32>
    %203 = vector.shape_cast %202 : vector<1x1x32xf32> to vector<1x32xf32>
    %204 = vector.broadcast %203 : vector<1x32xf32> to vector<64x32xf32>
    %205 = arith.mulf %191, %204 : vector<64x32xf32>
    %c0_125 = arith.constant 0 : index
    %c0_126 = arith.constant 0 : index
    %c0_127 = arith.constant 0 : index
    %206 = vector.load %arg7[%c0_125, %c0_126, %c0_127] : memref<3x1x32xf32, #tpu.memory_space<vmem>>, vector<1x1x32xf32>
    %207 = vector.shape_cast %206 : vector<1x1x32xf32> to vector<1x32xf32>
    %208 = vector.broadcast %207 : vector<1x32xf32> to vector<64x32xf32>
    %209 = arith.addf %205, %208 : vector<64x32xf32>
    %210 = tpu.concatenate %209, %25 in 0 : vector<64x32xf32>, vector<1x32xf32> -> vector<65x32xf32>
    %c1_128 = arith.constant 1 : index
    %c0_129 = arith.constant 0 : index
    %c0_130 = arith.constant 0 : index
    %211 = vector.load %arg6[%c1_128, %c0_129, %c0_130] : memref<3x1x32xf32, #tpu.memory_space<vmem>>, vector<1x1x32xf32>
    %212 = vector.shape_cast %211 : vector<1x1x32xf32> to vector<1x32xf32>
    %213 = vector.broadcast %212 : vector<1x32xf32> to vector<64x32xf32>
    %214 = arith.mulf %196, %213 : vector<64x32xf32>
    %c1_131 = arith.constant 1 : index
    %c0_132 = arith.constant 0 : index
    %c0_133 = arith.constant 0 : index
    %215 = vector.load %arg7[%c1_131, %c0_132, %c0_133] : memref<3x1x32xf32, #tpu.memory_space<vmem>>, vector<1x1x32xf32>
    %216 = vector.shape_cast %215 : vector<1x1x32xf32> to vector<1x32xf32>
    %217 = vector.broadcast %216 : vector<1x32xf32> to vector<64x32xf32>
    %218 = arith.addf %214, %217 : vector<64x32xf32>
    %219 = tpu.concatenate %218, %25 in 0 : vector<64x32xf32>, vector<1x32xf32> -> vector<65x32xf32>
    %c2_134 = arith.constant 2 : index
    %c0_135 = arith.constant 0 : index
    %c0_136 = arith.constant 0 : index
    %220 = vector.load %arg6[%c2_134, %c0_135, %c0_136] : memref<3x1x32xf32, #tpu.memory_space<vmem>>, vector<1x1x32xf32>
    %221 = vector.shape_cast %220 : vector<1x1x32xf32> to vector<1x32xf32>
    %222 = vector.broadcast %221 : vector<1x32xf32> to vector<64x32xf32>
    %223 = arith.mulf %201, %222 : vector<64x32xf32>
    %c2_137 = arith.constant 2 : index
    %c0_138 = arith.constant 0 : index
    %c0_139 = arith.constant 0 : index
    %224 = vector.load %arg7[%c2_137, %c0_138, %c0_139] : memref<3x1x32xf32, #tpu.memory_space<vmem>>, vector<1x1x32xf32>
    %225 = vector.shape_cast %224 : vector<1x1x32xf32> to vector<1x32xf32>
    %226 = vector.broadcast %225 : vector<1x32xf32> to vector<64x32xf32>
    %227 = arith.addf %223, %226 : vector<64x32xf32>
    %228 = tpu.concatenate %227, %25 in 0 : vector<64x32xf32>, vector<1x32xf32> -> vector<65x32xf32>
    %c0_140 = arith.constant 0 : index
    %c0_141 = arith.constant 0 : index
    %c0_142 = arith.constant 0 : index
    %229 = vector.load %arg8[%c0_140, %c0_141, %c0_142] : memref<3x32x32xf32, #tpu.memory_space<vmem>>, vector<1x32x32xf32>
    %230 = vector.shape_cast %229 : vector<1x32x32xf32> to vector<32x32xf32>
    %cst_143 = arith.constant dense<0.000000e+00> : vector<65x32xf32>
    %231 = tpu.matmul %210, %230, %cst_143 {dimension_numbers = #tpu.dot_dimension_numbers<[1], [0], [0], [1], [0, 0, 1, 1], [], []>} : vector<65x32xf32>, vector<32x32xf32>, vector<65x32xf32> -> vector<65x32xf32>
    %c1_144 = arith.constant 1 : index
    %c0_145 = arith.constant 0 : index
    %c0_146 = arith.constant 0 : index
    %232 = vector.load %arg8[%c1_144, %c0_145, %c0_146] : memref<3x32x32xf32, #tpu.memory_space<vmem>>, vector<1x32x32xf32>
    %233 = vector.shape_cast %232 : vector<1x32x32xf32> to vector<32x32xf32>
    %cst_147 = arith.constant dense<0.000000e+00> : vector<65x32xf32>
    %234 = tpu.matmul %219, %233, %cst_147 {dimension_numbers = #tpu.dot_dimension_numbers<[1], [0], [0], [1], [0, 0, 1, 1], [], []>} : vector<65x32xf32>, vector<32x32xf32>, vector<65x32xf32> -> vector<65x32xf32>
    %c2_148 = arith.constant 2 : index
    %c0_149 = arith.constant 0 : index
    %c0_150 = arith.constant 0 : index
    %235 = vector.load %arg8[%c2_148, %c0_149, %c0_150] : memref<3x32x32xf32, #tpu.memory_space<vmem>>, vector<1x32x32xf32>
    %236 = vector.shape_cast %235 : vector<1x32x32xf32> to vector<32x32xf32>
    %cst_151 = arith.constant dense<0.000000e+00> : vector<65x32xf32>
    %237 = tpu.matmul %228, %236, %cst_151 {dimension_numbers = #tpu.dot_dimension_numbers<[1], [0], [0], [1], [0, 0, 1, 1], [], []>} : vector<65x32xf32>, vector<32x32xf32>, vector<65x32xf32> -> vector<65x32xf32>
    %238 = vector.extract_strided_slice %231 {offsets = [0, 0], sizes = [65, 8], strides = [1, 1]} : vector<65x32xf32> to vector<65x8xf32>
    %239 = vector.extract_strided_slice %234 {offsets = [0, 0], sizes = [65, 8], strides = [1, 1]} : vector<65x32xf32> to vector<65x8xf32>
    %240 = vector.extract_strided_slice %237 {offsets = [0, 0], sizes = [65, 8], strides = [1, 1]} : vector<65x32xf32> to vector<65x8xf32>
    %cst_152 = arith.constant dense<0.000000e+00> : vector<65x65xf32>
    %241 = tpu.matmul %238, %239, %cst_152 {dimension_numbers = #tpu.dot_dimension_numbers<[1], [1], [0], [0], [0, 0, 1, 0], [], []>} : vector<65x8xf32>, vector<65x8xf32>, vector<65x65xf32> -> vector<65x65xf32>
    %cst_153 = arith.constant dense<0xFF800000> : vector<65xf32>
    %242 = vector.multi_reduction <maximumf>, %241, %cst_153 [1] : vector<65x65xf32> to vector<65xf32>
    %243 = vector.shape_cast %242 : vector<65xf32> to vector<65x1xf32>
    %244 = vector.broadcast %243 : vector<65x1xf32> to vector<65x65xf32>
    %245 = arith.subf %241, %244 : vector<65x65xf32>
    %246 = math.exp %245 : vector<65x65xf32>
    %cst_154 = arith.constant dense<0.000000e+00> : vector<65xf32>
    %247 = vector.multi_reduction <add>, %246, %cst_154 [1] : vector<65x65xf32> to vector<65xf32>
    %248 = vector.shape_cast %247 : vector<65xf32> to vector<65x1xf32>
    %cst_155 = arith.constant dense<0.000000e+00> : vector<65x8xf32>
    %249 = tpu.matmul %246, %240, %cst_155 {dimension_numbers = #tpu.dot_dimension_numbers<[1], [0], [0], [1], [0, 0, 1, 1], [], []>} : vector<65x65xf32>, vector<65x8xf32>, vector<65x8xf32> -> vector<65x8xf32>
    %250 = tpu.reciprocal %248 {approx = true} : vector<65x1xf32> -> vector<65x1xf32>
    %251 = vector.broadcast %250 : vector<65x1xf32> to vector<65x8xf32>
    %252 = arith.mulf %249, %251 : vector<65x8xf32>
    %253 = vector.extract_strided_slice %231 {offsets = [0, 8], sizes = [65, 8], strides = [1, 1]} : vector<65x32xf32> to vector<65x8xf32>
    %254 = vector.extract_strided_slice %234 {offsets = [0, 8], sizes = [65, 8], strides = [1, 1]} : vector<65x32xf32> to vector<65x8xf32>
    %255 = vector.extract_strided_slice %237 {offsets = [0, 8], sizes = [65, 8], strides = [1, 1]} : vector<65x32xf32> to vector<65x8xf32>
    %cst_156 = arith.constant dense<0.000000e+00> : vector<65x65xf32>
    %256 = tpu.matmul %253, %254, %cst_156 {dimension_numbers = #tpu.dot_dimension_numbers<[1], [1], [0], [0], [0, 0, 1, 0], [], []>} : vector<65x8xf32>, vector<65x8xf32>, vector<65x65xf32> -> vector<65x65xf32>
    %cst_157 = arith.constant dense<0xFF800000> : vector<65xf32>
    %257 = vector.multi_reduction <maximumf>, %256, %cst_157 [1] : vector<65x65xf32> to vector<65xf32>
    %258 = vector.shape_cast %257 : vector<65xf32> to vector<65x1xf32>
    %259 = vector.broadcast %258 : vector<65x1xf32> to vector<65x65xf32>
    %260 = arith.subf %256, %259 : vector<65x65xf32>
    %261 = math.exp %260 : vector<65x65xf32>
    %cst_158 = arith.constant dense<0.000000e+00> : vector<65xf32>
    %262 = vector.multi_reduction <add>, %261, %cst_158 [1] : vector<65x65xf32> to vector<65xf32>
    %263 = vector.shape_cast %262 : vector<65xf32> to vector<65x1xf32>
    %cst_159 = arith.constant dense<0.000000e+00> : vector<65x8xf32>
    %264 = tpu.matmul %261, %255, %cst_159 {dimension_numbers = #tpu.dot_dimension_numbers<[1], [0], [0], [1], [0, 0, 1, 1], [], []>} : vector<65x65xf32>, vector<65x8xf32>, vector<65x8xf32> -> vector<65x8xf32>
    %265 = tpu.reciprocal %263 {approx = true} : vector<65x1xf32> -> vector<65x1xf32>
    %266 = vector.broadcast %265 : vector<65x1xf32> to vector<65x8xf32>
    %267 = arith.mulf %264, %266 : vector<65x8xf32>
    %268 = vector.extract_strided_slice %231 {offsets = [0, 16], sizes = [65, 8], strides = [1, 1]} : vector<65x32xf32> to vector<65x8xf32>
    %269 = vector.extract_strided_slice %234 {offsets = [0, 16], sizes = [65, 8], strides = [1, 1]} : vector<65x32xf32> to vector<65x8xf32>
    %270 = vector.extract_strided_slice %237 {offsets = [0, 16], sizes = [65, 8], strides = [1, 1]} : vector<65x32xf32> to vector<65x8xf32>
    %cst_160 = arith.constant dense<0.000000e+00> : vector<65x65xf32>
    %271 = tpu.matmul %268, %269, %cst_160 {dimension_numbers = #tpu.dot_dimension_numbers<[1], [1], [0], [0], [0, 0, 1, 0], [], []>} : vector<65x8xf32>, vector<65x8xf32>, vector<65x65xf32> -> vector<65x65xf32>
    %cst_161 = arith.constant dense<0xFF800000> : vector<65xf32>
    %272 = vector.multi_reduction <maximumf>, %271, %cst_161 [1] : vector<65x65xf32> to vector<65xf32>
    %273 = vector.shape_cast %272 : vector<65xf32> to vector<65x1xf32>
    %274 = vector.broadcast %273 : vector<65x1xf32> to vector<65x65xf32>
    %275 = arith.subf %271, %274 : vector<65x65xf32>
    %276 = math.exp %275 : vector<65x65xf32>
    %cst_162 = arith.constant dense<0.000000e+00> : vector<65xf32>
    %277 = vector.multi_reduction <add>, %276, %cst_162 [1] : vector<65x65xf32> to vector<65xf32>
    %278 = vector.shape_cast %277 : vector<65xf32> to vector<65x1xf32>
    %cst_163 = arith.constant dense<0.000000e+00> : vector<65x8xf32>
    %279 = tpu.matmul %276, %270, %cst_163 {dimension_numbers = #tpu.dot_dimension_numbers<[1], [0], [0], [1], [0, 0, 1, 1], [], []>} : vector<65x65xf32>, vector<65x8xf32>, vector<65x8xf32> -> vector<65x8xf32>
    %280 = tpu.reciprocal %278 {approx = true} : vector<65x1xf32> -> vector<65x1xf32>
    %281 = vector.broadcast %280 : vector<65x1xf32> to vector<65x8xf32>
    %282 = arith.mulf %279, %281 : vector<65x8xf32>
    %283 = vector.extract_strided_slice %231 {offsets = [0, 24], sizes = [65, 8], strides = [1, 1]} : vector<65x32xf32> to vector<65x8xf32>
    %284 = vector.extract_strided_slice %234 {offsets = [0, 24], sizes = [65, 8], strides = [1, 1]} : vector<65x32xf32> to vector<65x8xf32>
    %285 = vector.extract_strided_slice %237 {offsets = [0, 24], sizes = [65, 8], strides = [1, 1]} : vector<65x32xf32> to vector<65x8xf32>
    %cst_164 = arith.constant dense<0.000000e+00> : vector<65x65xf32>
    %286 = tpu.matmul %283, %284, %cst_164 {dimension_numbers = #tpu.dot_dimension_numbers<[1], [1], [0], [0], [0, 0, 1, 0], [], []>} : vector<65x8xf32>, vector<65x8xf32>, vector<65x65xf32> -> vector<65x65xf32>
    %cst_165 = arith.constant dense<0xFF800000> : vector<65xf32>
    %287 = vector.multi_reduction <maximumf>, %286, %cst_165 [1] : vector<65x65xf32> to vector<65xf32>
    %288 = vector.shape_cast %287 : vector<65xf32> to vector<65x1xf32>
    %289 = vector.broadcast %288 : vector<65x1xf32> to vector<65x65xf32>
    %290 = arith.subf %286, %289 : vector<65x65xf32>
    %291 = math.exp %290 : vector<65x65xf32>
    %cst_166 = arith.constant dense<0.000000e+00> : vector<65xf32>
    %292 = vector.multi_reduction <add>, %291, %cst_166 [1] : vector<65x65xf32> to vector<65xf32>
    %293 = vector.shape_cast %292 : vector<65xf32> to vector<65x1xf32>
    %cst_167 = arith.constant dense<0.000000e+00> : vector<65x8xf32>
    %294 = tpu.matmul %291, %285, %cst_167 {dimension_numbers = #tpu.dot_dimension_numbers<[1], [0], [0], [1], [0, 0, 1, 1], [], []>} : vector<65x65xf32>, vector<65x8xf32>, vector<65x8xf32> -> vector<65x8xf32>
    %295 = tpu.reciprocal %293 {approx = true} : vector<65x1xf32> -> vector<65x1xf32>
    %296 = vector.broadcast %295 : vector<65x1xf32> to vector<65x8xf32>
    %297 = arith.mulf %294, %296 : vector<65x8xf32>
    %298 = tpu.concatenate %252, %267, %282, %297 in 1 : vector<65x8xf32>, vector<65x8xf32>, vector<65x8xf32>, vector<65x8xf32> -> vector<65x32xf32>
    %c0_168 = arith.constant 0 : index
    %c0_169 = arith.constant 0 : index
    %299 = vector.load %arg9[%c0_168, %c0_169] : memref<32x32xf32, #tpu.memory_space<vmem>>, vector<32x32xf32>
    %cst_170 = arith.constant dense<0.000000e+00> : vector<65x32xf32>
    %300 = tpu.matmul %298, %299, %cst_170 {dimension_numbers = #tpu.dot_dimension_numbers<[1], [0], [0], [1], [0, 0, 1, 1], [], []>} : vector<65x32xf32>, vector<32x32xf32>, vector<65x32xf32> -> vector<65x32xf32>
    %c0_171 = arith.constant 0 : index
    %c0_172 = arith.constant 0 : index
    %301 = vector.load %arg10[%c0_171, %c0_172] : memref<1x32xf32, #tpu.memory_space<vmem>>, vector<1x32xf32>
    %302 = vector.broadcast %301 : vector<1x32xf32> to vector<65x32xf32>
    %303 = arith.addf %300, %302 : vector<65x32xf32>
    %304 = arith.addf %1, %303 : vector<65x32xf32>
    %c0_173 = arith.constant 0 : index
    %c0_174 = arith.constant 0 : index
    %305 = vector.load %arg11[%c0_173, %c0_174] : memref<1x32xf32, #tpu.memory_space<vmem>>, vector<1x32xf32>
    %c0_175 = arith.constant 0 : index
    %c0_176 = arith.constant 0 : index
    %306 = vector.load %arg12[%c0_175, %c0_176] : memref<1x32xf32, #tpu.memory_space<vmem>>, vector<1x32xf32>
    %cst_177 = arith.constant dense<0.000000e+00> : vector<65xf32>
    %307 = vector.multi_reduction <add>, %304, %cst_177 [1] : vector<65x32xf32> to vector<65xf32>
    %308 = vector.shape_cast %307 : vector<65xf32> to vector<65x1xf32>
    %cst_178 = arith.constant 3.200000e+01 : f32
    %309 = vector.broadcast %cst_178 : f32 to vector<65x1xf32>
    %310 = arith.divf %308, %309 : vector<65x1xf32>
    %311 = vector.broadcast %310 : vector<65x1xf32> to vector<65x32xf32>
    %312 = arith.subf %304, %311 : vector<65x32xf32>
    %313 = arith.mulf %312, %312 : vector<65x32xf32>
    %cst_179 = arith.constant dense<0.000000e+00> : vector<65xf32>
    %314 = vector.multi_reduction <add>, %313, %cst_179 [1] : vector<65x32xf32> to vector<65xf32>
    %315 = vector.shape_cast %314 : vector<65xf32> to vector<65x1xf32>
    %cst_180 = arith.constant 3.200000e+01 : f32
    %316 = vector.broadcast %cst_180 : f32 to vector<65x1xf32>
    %317 = arith.divf %315, %316 : vector<65x1xf32>
    %cst_181 = arith.constant 9.99999974E-6 : f32
    %318 = vector.broadcast %cst_181 : f32 to vector<65x1xf32>
    %319 = arith.addf %317, %318 : vector<65x1xf32>
    %320 = math.rsqrt %319 : vector<65x1xf32>
    %321 = vector.broadcast %320 : vector<65x1xf32> to vector<65x32xf32>
    %322 = arith.mulf %312, %321 : vector<65x32xf32>
    %323 = vector.broadcast %305 : vector<1x32xf32> to vector<65x32xf32>
    %324 = arith.mulf %322, %323 : vector<65x32xf32>
    %325 = vector.broadcast %306 : vector<1x32xf32> to vector<65x32xf32>
    %326 = arith.addf %324, %325 : vector<65x32xf32>
    %c0_182 = arith.constant 0 : index
    %c0_183 = arith.constant 0 : index
    %327 = vector.load %arg13[%c0_182, %c0_183] : memref<32x128xf32, #tpu.memory_space<vmem>>, vector<32x128xf32>
    %cst_184 = arith.constant dense<0.000000e+00> : vector<65x128xf32>
    %328 = tpu.matmul %326, %327, %cst_184 {dimension_numbers = #tpu.dot_dimension_numbers<[1], [0], [0], [1], [0, 0, 1, 1], [], []>} : vector<65x32xf32>, vector<32x128xf32>, vector<65x128xf32> -> vector<65x128xf32>
    %c0_185 = arith.constant 0 : index
    %c0_186 = arith.constant 0 : index
    %329 = vector.load %arg14[%c0_185, %c0_186] : memref<1x128xf32, #tpu.memory_space<vmem>>, vector<1x128xf32>
    %330 = vector.broadcast %329 : vector<1x128xf32> to vector<65x128xf32>
    %331 = arith.addf %328, %330 : vector<65x128xf32>
    %cst_187 = arith.constant 5.000000e-01 : f32
    %332 = vector.broadcast %cst_187 : f32 to vector<65x128xf32>
    %333 = arith.mulf %332, %331 : vector<65x128xf32>
    %cst_188 = arith.constant 4.471500e-02 : f32
    %334 = vector.broadcast %cst_188 : f32 to vector<65x128xf32>
    %335 = arith.mulf %334, %331 : vector<65x128xf32>
    %336 = arith.mulf %335, %331 : vector<65x128xf32>
    %337 = arith.mulf %336, %331 : vector<65x128xf32>
    %338 = arith.addf %331, %337 : vector<65x128xf32>
    %cst_189 = arith.constant 0.797884583 : f32
    %339 = vector.broadcast %cst_189 : f32 to vector<65x128xf32>
    %340 = arith.mulf %339, %338 : vector<65x128xf32>
    %341 = math.tanh %340 : vector<65x128xf32>
    %cst_190 = arith.constant 1.000000e+00 : f32
    %342 = vector.broadcast %cst_190 : f32 to vector<65x128xf32>
    %343 = arith.addf %342, %341 : vector<65x128xf32>
    %344 = arith.mulf %333, %343 : vector<65x128xf32>
    %c0_191 = arith.constant 0 : index
    %c0_192 = arith.constant 0 : index
    %345 = vector.load %arg15[%c0_191, %c0_192] : memref<128x32xf32, #tpu.memory_space<vmem>>, vector<128x32xf32>
    %cst_193 = arith.constant dense<0.000000e+00> : vector<65x32xf32>
    %346 = tpu.matmul %344, %345, %cst_193 {dimension_numbers = #tpu.dot_dimension_numbers<[1], [0], [0], [1], [0, 0, 1, 1], [], []>} : vector<65x128xf32>, vector<128x32xf32>, vector<65x32xf32> -> vector<65x32xf32>
    %c0_194 = arith.constant 0 : index
    %c0_195 = arith.constant 0 : index
    %347 = vector.load %arg16[%c0_194, %c0_195] : memref<1x32xf32, #tpu.memory_space<vmem>>, vector<1x32xf32>
    %348 = vector.broadcast %347 : vector<1x32xf32> to vector<65x32xf32>
    %349 = arith.addf %346, %348 : vector<65x32xf32>
    %350 = arith.addf %304, %349 : vector<65x32xf32>
    %c0_196 = arith.constant 0 : index
    %c0_197 = arith.constant 0 : index
    %c0_198 = arith.constant 0 : index
    %351 = vector.load %arg17[%c0_196, %c0_197, %c0_198] : memref<1x65x32xf32, #tpu.memory_space<vmem>>, vector<1x65x32xf32>
    %352 = vector.shape_cast %351 : vector<1x65x32xf32> to vector<65x32xf32>
    %353 = vector.shape_cast %350 : vector<65x32xf32> to vector<1x65x32xf32>
    tpu.vector_store %arg17[%c0_196, %c0_197, %c0_198], %353 {strides = array<i32>} : memref<1x65x32xf32, #tpu.memory_space<vmem>>, vector<1x65x32xf32>,
    return
  }
  func.func @transform_0(%arg0: i32) -> (i32, i32, i32) {
    %c0_i32 = arith.constant 0 : i32
    %c0_i32_0 = arith.constant 0 : i32
    %c0_i32_1 = arith.constant 0 : i32
    return %arg0, %c0_i32, %c0_i32_0 : i32, i32, i32
  }
  func.func @transform_1(%arg0: i32) -> (i32, i32, i32) {
    %c0_i32 = arith.constant 0 : i32
    %c0_i32_0 = arith.constant 0 : i32
    %c0_i32_1 = arith.constant 0 : i32
    %c0_i32_2 = arith.constant 0 : i32
    return %c0_i32, %c0_i32_0, %c0_i32_1 : i32, i32, i32
  }
  func.func @transform_2(%arg0: i32) -> (i32, i32) {
    %c0_i32 = arith.constant 0 : i32
    %c0_i32_0 = arith.constant 0 : i32
    %c0_i32_1 = arith.constant 0 : i32
    return %c0_i32, %c0_i32_0 : i32, i32
  }
  func.func @transform_3(%arg0: i32) -> (i32, i32) {
    %c0_i32 = arith.constant 0 : i32
    %c0_i32_0 = arith.constant 0 : i32
    %c0_i32_1 = arith.constant 0 : i32
    return %c0_i32, %c0_i32_0 : i32, i32
  }
  func.func @transform_4(%arg0: i32) -> (i32, i32, i32) {
    %c0_i32 = arith.constant 0 : i32
    %c0_i32_0 = arith.constant 0 : i32
    %c0_i32_1 = arith.constant 0 : i32
    %c0_i32_2 = arith.constant 0 : i32
    return %c0_i32, %c0_i32_0, %c0_i32_1 : i32, i32, i32
  }
  func.func @transform_5(%arg0: i32) -> (i32, i32, i32) {
    %c0_i32 = arith.constant 0 : i32
    %c0_i32_0 = arith.constant 0 : i32
    %c0_i32_1 = arith.constant 0 : i32
    %c0_i32_2 = arith.constant 0 : i32
    return %c0_i32, %c0_i32_0, %c0_i32_1 : i32, i32, i32
  }
  func.func @transform_6(%arg0: i32) -> (i32, i32, i32) {
    %c0_i32 = arith.constant 0 : i32
    %c0_i32_0 = arith.constant 0 : i32
    %c0_i32_1 = arith.constant 0 : i32
    %c0_i32_2 = arith.constant 0 : i32
    return %c0_i32, %c0_i32_0, %c0_i32_1 : i32, i32, i32
  }
  func.func @transform_7(%arg0: i32) -> (i32, i32, i32) {
    %c0_i32 = arith.constant 0 : i32
    %c0_i32_0 = arith.constant 0 : i32
    %c0_i32_1 = arith.constant 0 : i32
    %c0_i32_2 = arith.constant 0 : i32
    return %c0_i32, %c0_i32_0, %c0_i32_1 : i32, i32, i32
  }
  func.func @transform_8(%arg0: i32) -> (i32, i32) {
    %c0_i32 = arith.constant 0 : i32
    %c0_i32_0 = arith.constant 0 : i32
    %c0_i32_1 = arith.constant 0 : i32
    return %c0_i32, %c0_i32_0 : i32, i32
  }
  func.func @transform_9(%arg0: i32) -> (i32, i32) {
    %c0_i32 = arith.constant 0 : i32
    %c0_i32_0 = arith.constant 0 : i32
    %c0_i32_1 = arith.constant 0 : i32
    return %c0_i32, %c0_i32_0 : i32, i32
  }
  func.func @transform_10(%arg0: i32) -> (i32, i32) {
    %c0_i32 = arith.constant 0 : i32
    %c0_i32_0 = arith.constant 0 : i32
    %c0_i32_1 = arith.constant 0 : i32
    return %c0_i32, %c0_i32_0 : i32, i32
  }
  func.func @transform_11(%arg0: i32) -> (i32, i32) {
    %c0_i32 = arith.constant 0 : i32
    %c0_i32_0 = arith.constant 0 : i32
    %c0_i32_1 = arith.constant 0 : i32
    return %c0_i32, %c0_i32_0 : i32, i32
  }
  func.func @transform_12(%arg0: i32) -> (i32, i32) {
    %c0_i32 = arith.constant 0 : i32
    %c0_i32_0 = arith.constant 0 : i32
    %c0_i32_1 = arith.constant 0 : i32
    return %c0_i32, %c0_i32_0 : i32, i32
  }
  func.func @transform_13(%arg0: i32) -> (i32, i32) {
    %c0_i32 = arith.constant 0 : i32
    %c0_i32_0 = arith.constant 0 : i32
    %c0_i32_1 = arith.constant 0 : i32
    return %c0_i32, %c0_i32_0 : i32, i32
  }
  func.func @transform_14(%arg0: i32) -> (i32, i32) {
    %c0_i32 = arith.constant 0 : i32
    %c0_i32_0 = arith.constant 0 : i32
    %c0_i32_1 = arith.constant 0 : i32
    return %c0_i32, %c0_i32_0 : i32, i32
  }
  func.func @transform_15(%arg0: i32) -> (i32, i32) {
    %c0_i32 = arith.constant 0 : i32
    %c0_i32_0 = arith.constant 0 : i32
    %c0_i32_1 = arith.constant 0 : i32
    return %c0_i32, %c0_i32_0 : i32, i32
  }
  func.func @transform_16(%arg0: i32) -> (i32, i32, i32) {
    %c0_i32 = arith.constant 0 : i32
    %c0_i32_0 = arith.constant 0 : i32
    %c0_i32_1 = arith.constant 0 : i32
    return %arg0, %c0_i32, %c0_i32_0 : i32, i32, i32
  }
}

</mosaic_0001>

<bundles_post_ra>
// kernel: block_forward.1
= control target key start
LH: loop header
LB: loop body
LE: loop exit
PB: predicated region body
PF: predicated region fallthrough
CT: control target
= control target key end

     0   :  { %s6297_s21 = smov 0   ;;  %s8890_s0 = inlined_call_operand.vmem [shape: f32[2,65,32], index: 0, kind: input, shape index: {}]   ;;  %s8891_s1 = inlined_call_operand.vmem [shape: f32[2,64,1], index: 1, kind: input, shape index: {}]   ;;  %s8892_s2 = inlined_call_operand.vmem [shape: f32[1,32], index: 2, kind: input, shape index: {}]   ;;  %s8893_s3 = inlined_call_operand.vmem [shape: f32[1,32], index: 3, kind: input, shape index: {}]   ;;  %s8894_s4 = inlined_call_operand.vmem [shape: f32[3,9,32], index: 4, kind: input, shape index: {}]   ;;  %s8895_s5 = inlined_call_operand.vmem [shape: f32[3,1,32], index: 5, kind: input, shape index: {}]   ;;  %s8896_s6 = inlined_call_operand.vmem [shape: f32[3,1,32], index: 6, kind: input, shape index: {}]   ;;  %s8897_s7 = inlined_call_operand.vmem [shape: f32[3,32,32], index: 7, kind: input, shape index: {}]   ;;  %s8898_s8 = inlined_call_operand.vmem [shape: f32[32,32], index: 8, kind: input, shape index: {}]   ;;  %s8899_s9 = inlined_call_operand.vmem [shape: f32[1,32], index: 9, kind: input, shape index: {}]   ;;  %s8900_s10 = inlined_call_operand.vmem [shape: f32[1,32], index: 10, kind: input, shape index: {}]   ;;  %s8901_s11 = inlined_call_operand.vmem [shape: f32[1,32], index: 11, kind: input, shape index: {}]   ;;  %s8902_s12 = inlined_call_operand.vmem [shape: f32[32,128], index: 12, kind: input, shape index: {}]   ;;  %s8903_s13 = inlined_call_operand.vmem [shape: f32[1,128], index: 13, kind: input, shape index: {}]   ;;  %s8904_s14 = inlined_call_operand.vmem [shape: f32[128,32], index: 14, kind: input, shape index: {}]   ;;  %s8905_s15 = inlined_call_operand.vmem [shape: f32[1,32], index: 15, kind: input, shape index: {}]   ;;  %s8906_s16 = inlined_call_operand.vmem [shape: f32[2,65,32], index: 16, kind: output, shape index: {}]  }
   0x1   :  { %8986 = sst [smem:[#allocation61_spill]] %s8890_s0 }
   0x2 LB: > { %s4604_s22 = sadd.s32 4294967295, %s6200_s21   ;;  %p4608_p0 = scmp.ge.s32.totalorder %s6200_s21, 1  ;;  %s6200_s21 = sphi %s6297_s21, %s26_s21  }
   0x3   : > { %p462_p1 = scmp.lt.s32.totalorder %s6200_s21, 3 }
   0x5   : > { %p463_p2 = pnand %p4608_p0, %p462_p1 }
   0x7   : > { %466 = sbr.rel (%p463_p2) target bundleno = 2688 (0xa80), region = 84 }
   0xe   : > { %p512_p3 = scmp.lt.s32.totalorder %s4604_s22, 1  ;;  %v6202_v0 = vmov 0   ;;  %vm533_vm0 = vcmask 261120   ;;  %s8987_s26 = sld [smem:[#allocation61_spill]]  ;;  %vm558_vm1 = vcmask 253952   ;;  %v703_v19 = vld [vmem:[%s8891_s1] sm:$0xff] }
   0xf   : > { %5861 = vset.pattern.permute.xlu1 %v6202_v0  ;;  %5862 = vset.pattern.permute.xlu0 %v6202_v0  ;;  %v704_v20 = vld [vmem:[%s8891_s1 + $0x8] sm:$0xff]  ;;  %v4623_v22 = vld [vmem:[%s8891_s1 + $0x40] sm:$0xff]  ;;  %v705_v23 = vld [vmem:[%s8891_s1 + $0x10] sm:$0xff]  ;;  %v8909_v28 = vmov 0.0   ;;  %vm6205_vm2 = vmmov 0   ;;  %vm1973_vm3 = vcmask 64512  }
  0x10   : > { %s9154_s22 = smov (!%p512_p3, %s4604_s22), 1  ;;  %v4624_v21 = vld [vmem:[%s8891_s1 + $0x48] sm:$0xff]  ;;  %v4625_v25 = vld [vmem:[%s8891_s1 + $0x50] sm:$0xff]  ;;  %v706_v26 = vld [vmem:[%s8891_s1 + $0x18] sm:$0xff]  ;;  %683 = vst.msk [vmem:[#allocation2] sm:$0xff] %vm533_vm0, %v8909_v28  ;;  %5090 = vmatprep.mubr.msk.f32.mxu0 %vm6205_vm2, %v8909_v28  ;;  %5125 = vmatprep.mubr.msk.f32.mxu1 %vm6205_vm2, %v8909_v28  ;;  %s6206_s30 = smov 120  }
  0x11   : > { %s5842_s23 = smul.u32 72, %s9154_s22  ;;  %v708_v24 = vld [vmem:[%s8891_s1 + $0x28] sm:$0xff]  ;;  %v4626_v27 = vld [vmem:[%s8891_s1 + $0x58] sm:$0xff]  ;;  %684 = vst.msk [vmem:[#allocation2 + $0x8] sm:$0xff] %vm533_vm0, %v8909_v28  ;;  %685 = vst.msk [vmem:[#allocation2 + $0x50] sm:$0xff] %vm533_vm0, %v8909_v28  ;;  %s6207_s0 = smov 112  }
  0x12   : > { %686 = vst.msk [vmem:[#allocation2 + $0x58] sm:$0xff] %vm533_vm0, %v8909_v28  ;;  %v707_v29 = vld [vmem:[%s8891_s1 + $0x20] sm:$0xff]  ;;  %v6742_v28 = vld [vmem:[%s8894_s4 + $0x17] ss:$0 sm:$0xff]  ;;  %vm7665_vm4 = vmpackc.low %vm1973_vm3, %vm1973_vm3  ;;  %s6208_s17 = smov 104   ;;  %vm2248_vm5 = vcmask 1040384  }
  0x13   : > { %v4627_v30 = vld [vmem:[%s8891_s1 + $0x60] sm:$0xff]  ;;  %vm2138_vm6 = vcmask 531456   ;;  %vm2163_vm7 = vcmask 524288   ;;  %s6209_s18 = smov 8   ;;  %s6210_s19 = smov 16   ;;  %vm3843_vm8 = vcmask 130048  }
  0x14   : > { %s6313_s27 = scalar_lea.vmem %s8987_s26, %s5842_s23  ;;  %v6427_v59 = vld [vmem:[%s8894_s4 + $0x21] ss:$0 sm:$0xff]  ;;  %v6433_v61 = vld [vmem:[%s8894_s4 + $0x20] ss:$0 sm:$0xff]  ;;  %vm3853_vm9 = vcmask 195584   ;;  %s8858_s24 = scalar_lea.vmem %s8906_s16, %s5842_s23 }
  0x15   : > { %v522_v1 = vld [vmem:[%s6313_s27] sm:$0xff]  ;;  %v524_v2 = vld [vmem:[%s6313_s27 + $0x10] sm:$0xff]  ;;  %v6318_v3 = vld [vmem:[%s6313_s27 + $0x8] sm:$0xff]  ;;  %8988 = vst [vmem:[#allocation3_spill] sm:$0xff] %v6427_v59 }
  0x16   : > { %v534_v4 = vsel %vm533_vm0, %v522_v1, 0.0  ;;  %v540_v5 = vsel %vm533_vm0, %v524_v2, 0.0  ;;  %v6323_v6 = vld [vmem:[%s6313_s27 + $0x18] sm:$0xff]  ;;  %v537_v7 = vsel %vm533_vm0, %v6318_v3, 0.0  ;;  %v6330_v9 = vld [vmem:[%s6313_s27 + $0x20] sm:$0xff]  ;;  %v6333_v10 = vld [vmem:[%s6313_s27 + $0x28] sm:$0xff] }
  0x17   : > { %535 = vadd.xlane.f32.xlu0 %v534_v4  ;;  %541 = vadd.xlane.f32.xlu1 %v540_v5  ;;  %v543_v8 = vsel %vm533_vm0, %v6323_v6, 0.0  ;;  %v546_v11 = vsel %vm533_vm0, %v6330_v9, 0.0  ;;  %v549_v12 = vsel %vm533_vm0, %v6333_v10, 0.0  ;;  %v6340_v13 = vld [vmem:[%s6313_s27 + $0x38] sm:$0xff]  ;;  %v6343_v14 = vld [vmem:[%s6313_s27 + $0x30] sm:$0xff]  ;;  %8989 = vst [vmem:[#allocation4_spill] sm:$0xff] %v6433_v61 }
  0x18   : > { %v555_v15 = vsel %vm533_vm0, %v6340_v13, 0.0  ;;  %v552_v16 = vsel %vm533_vm0, %v6343_v14, 0.0  ;;  %v6350_v17 = vld [vmem:[%s6313_s27 + $0x40] sm:$0x1]  ;;  %v695_v57 = vld [vmem:[#allocation2 + $0x7] sm:$0xff]  ;;  %v709_v4 = vld [vmem:[%s8891_s1 + $0x30] sm:$0xff] }
  0x19   : > { %v559_v18 = vsel %vm558_vm1, %v6350_v17, 0.0  ;;  %v6422_v58 = vld [vmem:[#allocation2 + $0x8] sm:$0xff] }
  0x1a   : > { %v879_v63 = vmul.f32 %v6427_v59, %v6422_v58 }
  0x1b   : > { %538 = vadd.xlane.f32.xlu0 %v537_v7  ;;  %544 = vadd.xlane.f32.xlu1 %v543_v8  ;;  %v1555_v7 = vld [vmem:[%s8897_s7 + $0x8] sm:$0xff]  ;;  %v4685_v8 = vld [vmem:[%s8897_s7 + $0x20] sm:$0xff] }
  0x1f   : > { %547 = vadd.xlane.f32.xlu0 %v546_v11  ;;  %550 = vadd.xlane.f32.xlu1 %v549_v12  ;;  %v4686_v12 = vld [vmem:[%s8897_s7 + $0x28] sm:$0xff] }
  0x23   : > { %556 = vadd.xlane.f32.xlu1 %v555_v15  ;;  %553 = vadd.xlane.f32.xlu0 %v552_v16  ;;  %v1556_v15 = vld [vmem:[%s8897_s7 + $0x10] sm:$0xff]  ;;  %v1557_v16 = vld [vmem:[%s8897_s7 + $0x18] sm:$0xff] }
  0x27   : > { %560 = vadd.xlane.f32.xlu0 %v559_v18 }
  0x34   : > { %713 = vperm.xlu1 %5861, %v703_v19  }
  0x38   : > { %718 = vperm.xlu1 %5861, %v704_v20   ;;  %v5683_v20 = vpack.c.bf16 %v4686_v12, %v4685_v8 }
  0x3c   : > { %919 = vperm.xlu1 %5861, %v4624_v21   ;;  %v4687_v21 = vld [vmem:[%s8897_s7 + $0x30] sm:$0xff] }
  0x3d   : > { %914 = vperm.xlu0 %5862, %v4623_v22   ;;  %v4688_v22 = vld [vmem:[%s8897_s7 + $0x38] sm:$0xff] }
  0x40   : > { %723 = vperm.xlu1 %5861, %v705_v23   ;;  %v5680_v23 = vpack.c.bf16 %v1557_v16, %v1556_v15 }
  0x41   : > { %738 = vperm.xlu0 %5862, %v708_v24   ;;  %v5686_v24 = vpack.c.bf16 %v4688_v22, %v4687_v21 }
  0x44   : > { %924 = vperm.xlu1 %5861, %v4625_v25  }
  0x48   : > { %728 = vperm.xlu1 %5861, %v706_v26  }
  0x4c   : > { %929 = vperm.xlu1 %5861, %v4626_v27  }
  0x50   : > { %733 = vperm.xlu1 %5861, %v707_v29  }
  0x54   : > { %934 = vperm.xlu1 %5861, %v4627_v30  }
  0xa4   : > { %v536_v31 = vpop.xlane.xlu0 %535  ;;  %v542_v32 = vpop.xlane.xlu1 %541 }
  0xa5   : > { %v563_v33 = vmul.f32 0.03125, %v536_v31  ;;  %v565_v34 = vmul.f32 0.03125, %v542_v32 }
  0xa7   : > { %v6395_v35 = vsub.f32 %v522_v1, %v563_v33  ;;  %v6397_v36 = vsub.f32 %v524_v2, %v565_v34  ;;  %v4630_v34 = vld [vmem:[%s8891_s1 + $0x78] sm:$0xff] }
  0xa8   : > { %v539_v37 = vpop.xlane.xlu0 %538  ;;  %v545_v38 = vpop.xlane.xlu1 %544 }
  0xa9   : > { %v564_v39 = vmul.f32 0.03125, %v539_v37  ;;  %v566_v40 = vmul.f32 0.03125, %v545_v38  ;;  %v581_v41 = vmul.f32 %v6395_v35, %v6395_v35  ;;  %v583_v42 = vmul.f32 %v6397_v36, %v6397_v36  ;;  %v710_v37 = vld [vmem:[%s8891_s1 + $0x38] sm:$0xff] }
  0xab   : > { %v6404_v43 = vsub.f32 %v6318_v3, %v564_v39  ;;  %v6407_v44 = vsub.f32 %v6323_v6, %v566_v40  ;;  %v590_v45 = vsel %vm533_vm0, %v581_v41, 0.0  ;;  %v596_v49 = vsel %vm533_vm0, %v583_v42, 0.0  ;;  %v4628_v3 = vld [vmem:[%s8891_s1 + $0x68] sm:$0xff]  ;;  %v1554_v6 = vld [vmem:[%s8897_s7] sm:$0xff] }
  0xac   : > { %591 = vadd.xlane.f32.xlu1 %v590_v45  ;;  %v548_v46 = vpop.xlane.xlu0 %547  ;;  %v551_v47 = vpop.xlane.xlu1 %550  ;;  %v5677_v11 = vpack.c.bf16 %v1555_v7, %v1554_v6 }
  0xad   : > { %v567_v48 = vmul.f32 0.03125, %v548_v46  ;;  %v582_v50 = vmul.f32 %v6404_v43, %v6404_v43  ;;  %v584_v51 = vmul.f32 %v6407_v44, %v6407_v44  ;;  %v568_v18 = vmul.f32 0.03125, %v551_v47 }
  0xaf   : > { %v6416_v52 = vsub.f32 %v6330_v9, %v567_v48  ;;  %v593_v53 = vsel %vm533_vm0, %v582_v50, 0.0  ;;  %v599_v55 = vsel %vm533_vm0, %v584_v51, 0.0  ;;  %v8907_v9 = vmov 0.0|0.0  }
  0xb0   : > { %597 = vadd.xlane.f32.xlu1 %v596_v49  ;;  %594 = vadd.xlane.f32.xlu0 %v593_v53  ;;  %v557_v54 = vpop.xlane.xlu1 %556  ;;  %v554_v5 = vpop.xlane.xlu0 %553  ;;  %v6485_v25 = vsub.f32 %v6333_v10, %v568_v18  ;;  %v6542_v18 = vld [vmem:[%s8892_s2] ss:$0 sm:$0xff] }
  0xb1   : > { %v585_v56 = vmul.f32 %v6416_v52, %v6416_v52  ;;  %5676 = vmatprep.subr.bf16.mxu0 %v8907_v9  ;;  %5682 = vmatprep.subr.bf16.mxu1 %v8907_v9  ;;  %v569_v19 = vmul.f32 0.03125, %v554_v5  ;;  %v570_v26 = vmul.f32 0.03125, %v557_v54  ;;  %8998 = vst [vmem:[#allocation13_spill] sm:$0xff] %v6542_v18 }
  0xb2   : > { %5678 = vmatpush3.bf16.msra.mxu0 %v5677_v11  ;;  %5684 = vmatpush3.bf16.msra.mxu1 %v5683_v20  ;;  %8991 = vst [vmem:[#allocation6_spill] sm:$0xff] %v6485_v25  ;;  %v586_v30 = vmul.f32 %v6485_v25, %v6485_v25  ;;  %v6548_v20 = vld [vmem:[%s8893_s3] ss:$0 sm:$0xff] }
  0xb3   : > { %v602_v60 = vsel %vm533_vm0, %v585_v56, 0.0  ;;  %5679 = vmatprep.subr.bf16.mxu0 %v8907_v9  ;;  %5685 = vmatprep.subr.bf16.mxu1 %v8907_v9  ;;  %v6488_v27 = vsub.f32 %v6343_v14, %v569_v19  ;;  %v6493_v29 = vsub.f32 %v6340_v13, %v570_v26  ;;  %v4629_v13 = vld [vmem:[%s8891_s1 + $0x70] sm:$0xff]  ;;  %8999 = vst [vmem:[#allocation14_spill] sm:$0xff] %v6548_v20 }
  0xb4   : > { %600 = vadd.xlane.f32.xlu0 %v599_v55  ;;  %603 = vadd.xlane.f32.xlu1 %v602_v60  ;;  %v6435_v62 = vpop.permute.xlu1 %713  ;;  %v605_v31 = vsel %vm533_vm0, %v586_v30, 0.0  ;;  %v561_v40 = vpop.xlane.xlu0 %560 }
  0xb5   : > { %v6440_v0 = vmul.f32 %v6435_v62, %v695_v57  ;;  %8992 = vst [vmem:[#allocation7_spill] sm:$0xff] %v6493_v29  ;;  %v587_v10 = vmul.f32 %v6488_v27, %v6488_v27  ;;  %v588_v32 = vmul.f32 %v6493_v29, %v6493_v29  ;;  %v571_v41 = vmul.f32 0.03125, %v561_v40 }
  0xb6   : > { %5681 = vmatpush3.bf16.msra.mxu0 %v5680_v23  ;;  %5687 = vmatpush3.bf16.msra.mxu1 %v5686_v24 }
  0xb7   : > { %v808_v1 = vmul.f32 %v6433_v61, %v6440_v0  ;;  %5688 = vmatprep.subr.bf16.mxu0 %v8907_v9  ;;  %5694 = vmatprep.subr.bf16.mxu1 %v8907_v9  ;;  %v608_v14 = vsel %vm533_vm0, %v587_v10, 0.0  ;;  %v611_v33 = vsel %vm533_vm0, %v588_v32, 0.0  ;;  %v6520_v45 = vsub.f32 %v6350_v17, %v571_v41  ;;  %v6560_v32 = vld [vmem:[%s8894_s4 + $0x1] ss:$0 sm:$0xff] }
  0xb8   : > { %v6513_v38 = vpop.permute.xlu1 %718  ;;  %v837_v41 = vmul.f32 %v6560_v32, %v6422_v58 }
  0xb9   : > { %v6444_v2 = vadd.f32 %v879_v63, %v808_v1  ;;  %8993 = vst [vmem:[#allocation8_spill] sm:$0xff] %v6520_v45  ;;  %v589_v47 = vmul.f32 %v6520_v45, %v6520_v45 }
  0xbb   : > { %8990 = vst [vmem:[#allocation5_spill] sm:$0xff] %v6444_v2  ;;  %v614_v48 = vsel %vm558_vm1, %v589_v47, 0.0 }
  0xbc   : > { %v6515_v39 = vpop.permute.xlu1 %919  ;;  %v6533_v53 = vpop.permute.xlu0 %914 }
  0xc0   : > { %v6517_v42 = vpop.permute.xlu1 %723  ;;  %v6537_v17 = vpop.permute.xlu0 %738 }
  0xc1   : > { %8997 = vst [vmem:[#allocation12_spill] sm:$0xff] %v6537_v17 }
  0xc4   : > { %v6522_v46 = vpop.permute.xlu1 %924 }
  0xc5   : > { %939 = vperm.xlu1 %5861, %v4628_v3  }
  0xc8   : > { %v6527_v49 = vpop.permute.xlu1 %728 }
  0xca   : > { %743 = vperm.xlu0 %5862, %v709_v4  }
  0xcc   : > { %v6529_v50 = vpop.permute.xlu1 %929 }
  0xcd   : > { %8994 = vst [vmem:[#allocation9_spill] sm:$0xff] %v6529_v50 }
  0xd0   : > { %v6531_v51 = vpop.permute.xlu1 %733 }
  0xd1   : > { %8995 = vst [vmem:[#allocation10_spill] sm:$0xff] %v6531_v51 }
  0xd4   : > { %v6535_v54 = vpop.permute.xlu1 %934 }
  0xd5   : > { %8996 = vst [vmem:[#allocation11_spill] sm:$0xff] %v6535_v54 }
  0xe9   : > { %606 = vadd.xlane.f32.xlu0 %v605_v31  ;;  %609 = vadd.xlane.f32.xlu1 %v608_v14 }
  0xed   : > { %612 = vadd.xlane.f32.xlu0 %v611_v33 }
  0xfa   : > { %944 = vperm.xlu1 %5861, %v4629_v13  }
  0xfe   : > { %949 = vperm.xlu1 %5861, %v4630_v34   ;;  %v6577_v34 = vld [vmem:[%s8894_s4 + $0x11] ss:$0 sm:$0xff] }
 0x103   : > { %748 = vperm.xlu0 %5862, %v710_v37  }
 0x122   : > { %615 = vadd.xlane.f32.xlu0 %v614_v48  ;;  %v858_v48 = vmul.f32 %v6577_v34, %v6422_v58 }
 0x139   : > { %v592_v55 = vpop.xlane.xlu1 %591 }
 0x13a   : > { %v617_v56 = vmul.f32 0.03125, %v592_v55 }
 0x13c   : > { %v626_v57 = vadd.f32 1e-05, %v617_v56 }
 0x13d   : > { %v598_v60 = vpop.xlane.xlu1 %597  ;;  %v595_v63 = vpop.xlane.xlu0 %594 }
 0x13e   : > { %5983 = vrsqrt.f32 %v626_v57  ;;  %v619_v1 = vmul.f32 0.03125, %v598_v60  ;;  %v618_v3 = vmul.f32 0.03125, %v595_v63  ;;  %v6597_v57 = vld [vmem:[%s8894_s4 + $0x2] ss:$0 sm:$0xff]  ;;  %v6602_v60 = vld [vmem:[%s8894_s4 + $0x12] ss:$0 sm:$0xff] }
 0x140   : > { %v628_v4 = vadd.f32 1e-05, %v619_v1  ;;  %v627_v5 = vadd.f32 1e-05, %v618_v3 }
 0x141   : > { %v604_v6 = vpop.xlane.xlu1 %603  ;;  %v601_v7 = vpop.xlane.xlu0 %600 }
 0x142   : > { %5985 = vrsqrt.f32 %v628_v4  ;;  %v621_v8 = vmul.f32 0.03125, %v604_v6  ;;  %v620_v11 = vmul.f32 0.03125, %v601_v7  ;;  %v6625_v6 = vld [vmem:[%s8897_s7 + $0x50] sm:$0xff]  ;;  %v6630_v7 = vld [vmem:[%s8897_s7 + $0x58] sm:$0xff] }
 0x143   : > { %5987 = vrsqrt.f32 %v627_v5  ;;  %v6620_v5 = vld [vmem:[%s8897_s7 + $0x48] sm:$0xff] }
 0x144   : > { %v630_v12 = vadd.f32 1e-05, %v621_v8  ;;  %v629_v15 = vadd.f32 1e-05, %v620_v11  ;;  %v6636_v8 = vld [vmem:[%s8894_s4 + $0x3] ss:$0 sm:$0xff] }
 0x145   : > { %v6641_v11 = vld [vmem:[%s8894_s4 + $0x13] ss:$0 sm:$0xff] }
 0x146   : > { %5989 = vrsqrt.f32 %v630_v12 }
 0x147   : > { %5991 = vrsqrt.f32 %v629_v15 }
 0x148   : > { %v5984_v16 = vpop.eup %5983 }
 0x149   : > { %v644_v19 = vmul.f32 %v5984_v16, %v6395_v35 }
 0x14b   : > { %v659_v21 = vmul.f32 %v6542_v18, %v644_v19 }
 0x14c   : > { %v5986_v22 = vpop.eup %5985 }
 0x14d   : > { %v5988_v23 = vpop.eup %5987  ;;  %v674_v24 = vadd.f32 %v6548_v20, %v659_v21  ;;  %v646_v26 = vmul.f32 %v5986_v22, %v6397_v36  ;;  %v6567_v36 = vld [vmem:[%s8894_s4] ss:$0 sm:$0xff]  ;;  %v6650_v21 = vld [vmem:[%s8894_s4 + $0x4] ss:$0 sm:$0xff] }
 0x14e   : > { %v645_v30 = vmul.f32 %v5988_v23, %v6404_v43  ;;  %v6572_v43 = vld [vmem:[%s8894_s4 + $0x10] ss:$0 sm:$0xff]  ;;  %v764_v55 = vmul.f32 %v6567_v36, %v6440_v0  ;;  %v6657_v23 = vld [vmem:[%s8894_s4 + $0x14] ss:$0 sm:$0xff] }
 0x14f   : > { %687 = vst.msk [vmem:[#allocation2 + $0x10] sm:$0xff] %vm533_vm0, %v674_v24  ;;  %v661_v10 = vmul.f32 %v6542_v18, %v646_v26  ;;  %v6662_v24 = vld [vmem:[%s8894_s4 + $0x7] ss:$0 sm:$0xff] }
 0x150   : > { %v5990_v35 = vpop.eup %5989  ;;  %v660_v31 = vmul.f32 %v6542_v18, %v645_v30  ;;  %v845_v12 = vadd.f32 %v837_v41, %v764_v55  ;;  %9000 = vst [vmem:[#allocation15_spill] sm:$0xff] %v6662_v24 }
 0x151   : > { %v5992_v14 = vpop.eup %5991  ;;  %v676_v33 = vadd.f32 %v6548_v20, %v661_v10  ;;  %v648_v13 = vmul.f32 %v5990_v35, %v6416_v52  ;;  %v6735_v10 = vld [vmem:[%s8894_s4 + $0x8] ss:$0 sm:$0xff] }
 0x152   : > { %v675_v37 = vadd.f32 %v6548_v20, %v660_v31  ;;  %v647_v40 = vmul.f32 %v5992_v14, %v6407_v44  ;;  %v786_v44 = vmul.f32 %v6572_v43, %v6440_v0  ;;  %v6608_v0 = vld [vmem:[%s8897_s7 + $0x40] sm:$0xff] }
 0x153   : > { %689 = vst.msk [vmem:[#allocation2 + $0x20] sm:$0xff] %vm533_vm0, %v676_v33  ;;  %v663_v52 = vmul.f32 %v6542_v18, %v648_v13 }
 0x154   : > { %688 = vst.msk [vmem:[#allocation2 + $0x18] sm:$0xff] %vm533_vm0, %v675_v37  ;;  %v662_v47 = vmul.f32 %v6542_v18, %v647_v40  ;;  %v866_v15 = vadd.f32 %v858_v48, %v786_v44  ;;  %v6689_v48 = vld [vmem:[%s8894_s4 + $0x5] ss:$0 sm:$0xff]  ;;  %v6696_v44 = vld [vmem:[%s8894_s4 + $0x15] ss:$0 sm:$0xff] }
 0x155   : > { %v678_v56 = vadd.f32 %v6548_v20, %v663_v52 }
 0x156   : > { %v677_v58 = vadd.f32 %v6548_v20, %v662_v47  ;;  %v895_v63 = vld [vmem:[#allocation2 + $0x9] sm:$0xff] }
 0x157   : > { %v1023_v1 = vld [vmem:[#allocation2 + $0xf] sm:$0xff]  ;;  %691 = vst.msk [vmem:[#allocation2 + $0x30] sm:$0xff] %vm533_vm0, %v678_v56  ;;  %v6612_v3 = vmul.f32 %v6533_v53, %v895_v63 }
 0x158   : > { %v6615_v4 = vmul.f32 %v1023_v1, %v6435_v62  ;;  %690 = vst.msk [vmem:[#allocation2 + $0x28] sm:$0xff] %vm533_vm0, %v677_v58  ;;  %v6645_v19 = vld [vmem:[#allocation2 + $0x10] sm:$0xff]  ;;  %v6665_v26 = vmul.f32 %v1023_v1, %v6513_v38 }
 0x159   : > { %v965_v16 = vmul.f32 %v6597_v57, %v6612_v3  ;;  %v986_v22 = vmul.f32 %v6602_v60, %v6612_v3  ;;  %v1115_v52 = vmul.f32 %v6650_v21, %v6645_v19  ;;  %v1136_v55 = vmul.f32 %v6657_v23, %v6645_v19 }
 0x15a   : > { %9001 = vst [vmem:[#allocation16_spill] sm:$0xff] %v6665_v26  ;;  %v1044_v14 = vmul.f32 %v6636_v8, %v6615_v4  ;;  %v1065_v37 = vmul.f32 %v6641_v11, %v6615_v4  ;;  %v6677_v40 = vld [vmem:[#allocation2 + $0x20] sm:$0xff]  ;;  %v838_v56 = vmul.f32 %v6560_v32, %v6645_v19 }
 0x15b   : > { %v973_v35 = vadd.f32 %v965_v16, %v845_v12  ;;  %v6671_v31 = vld [vmem:[#allocation2 + $0x17] sm:$0xff]  ;;  %v994_v13 = vadd.f32 %v986_v22, %v866_v15  ;;  %9002 = vst [vmem:[#allocation17_spill] sm:$0xff] %v6677_v40  ;;  %v859_v15 = vmul.f32 %v6577_v34, %v6645_v19  ;;  %v6711_v16 = vld [vmem:[%s8894_s4 + $0x6] ss:$0 sm:$0xff] }
 0x15c   : > { %v1173_v33 = vld [vmem:[#allocation2 + $0x11] sm:$0xff]  ;;  %v6681_v41 = vld [vmem:[#allocation2 + $0x19] sm:$0xff]  ;;  %v6704_v1 = vmul.f32 %v6671_v31, %v6435_v62  ;;  %9006 = vst [vmem:[#allocation21_spill] sm:$0xff] %v6711_v16  ;;  %v765_v62 = vmul.f32 %v6567_v36, %v6665_v26 }
 0x15d   : > { %v6684_v47 = vmul.f32 %v1173_v33, %v6533_v53  ;;  %v1052_v58 = vadd.f32 %v1044_v14, %v973_v35  ;;  %v6700_v63 = vld [vmem:[#allocation2 + $0x18] sm:$0xff]  ;;  %v1073_v12 = vadd.f32 %v1065_v37, %v994_v13  ;;  %v6715_v22 = vmul.f32 %v6681_v41, %v6533_v53  ;;  %v6720_v35 = vld [vmem:[%s8894_s4 + $0x16] ss:$0 sm:$0xff] }
 0x15e   : > { %9004 = vst [vmem:[#allocation19_spill] sm:$0xff] %v6700_v63  ;;  %9005 = vst [vmem:[#allocation20_spill] sm:$0xff] %v6704_v1  ;;  %v6726_v14 = vmul.f32 %v6662_v24, %v6677_v40  ;;  %v787_v13 = vmul.f32 %v6572_v43, %v6665_v26  ;;  %v1330_v45 = vmul.f32 %v6662_v24, %v6700_v63 }
 0x15f   : > { %9003 = vst [vmem:[#allocation18_spill] sm:$0xff] %v6684_v47  ;;  %v1123_v37 = vadd.f32 %v1115_v52, %v1052_v58  ;;  %v1194_v53 = vmul.f32 %v6689_v48, %v6684_v47  ;;  %v1144_v9 = vadd.f32 %v1136_v55, %v1073_v12  ;;  %v1215_v30 = vmul.f32 %v6696_v44, %v6684_v47  ;;  %v6757_v55 = vld [vmem:[%s8894_s4 + $0x18] ss:$0 sm:$0xff]  ;;  %v6762_v47 = vld [vmem:[#allocation2 + $0x1f] sm:$0xff] }
 0x160   : > { %v6746_v52 = vmul.f32 %v6671_v31, %v6513_v38  ;;  %v6750_v58 = vmul.f32 %v6681_v41, %v6515_v39  ;;  %v6760_v12 = vmul.f32 %v1173_v33, %v6515_v39  ;;  %v1266_v61 = vmul.f32 %v6711_v16, %v6704_v1 }
 0x161   : > { %v1202_v59 = vadd.f32 %v1194_v53, %v1123_v37  ;;  %v1223_v26 = vadd.f32 %v1215_v30, %v1144_v9  ;;  %v1287_v17 = vmul.f32 %v6720_v35, %v6704_v1  ;;  %v1402_v2 = vmul.f32 %v6735_v10, %v6715_v22  ;;  %v6782_v1 = vld [vmem:[#allocation2 + $0x21] sm:$0xff] }
 0x162   : > { %9007 = vst [vmem:[#allocation22_spill] sm:$0xff] %v6746_v52  ;;  %9008 = vst [vmem:[#allocation23_spill] sm:$0xff] %v6750_v58  ;;  %v1351_v29 = vmul.f32 %v6742_v28, %v6700_v63  ;;  %v846_v20 = vadd.f32 %v838_v56, %v765_v62  ;;  %v966_v33 = vmul.f32 %v6597_v57, %v6760_v12 }
 0x163   : > { %9009 = vst [vmem:[#allocation24_spill] sm:$0xff] %v6760_v12  ;;  %v1274_v54 = vadd.f32 %v1266_v61, %v1202_v59  ;;  %v1295_v18 = vadd.f32 %v1287_v17, %v1223_v26  ;;  %v1423_v37 = vmul.f32 %v6757_v55, %v6715_v22  ;;  %v6778_v9 = vmul.f32 %v6762_v47, %v6513_v38  ;;  %v6795_v17 = vld [vmem:[%s8895_s5] ss:$0 sm:$0xff] }
 0x164   : > { %v974_v30 = vadd.f32 %v966_v33, %v846_v20  ;;  %v1045_v53 = vmul.f32 %v6636_v8, %v6746_v52  ;;  %v867_v25 = vadd.f32 %v859_v15, %v787_v13  ;;  %v987_v56 = vmul.f32 %v6602_v60, %v6760_v12  ;;  %9011 = vst [vmem:[#allocation26_spill] sm:$0xff] %v6795_v17  ;;  %v6800_v20 = vld [vmem:[%s8895_s5 + $0x1] ss:$0 sm:$0xff] }
 0x165   : > { %9010 = vst [vmem:[#allocation25_spill] sm:$0xff] %v6778_v9  ;;  %v1338_v62 = vadd.f32 %v1330_v45, %v1274_v54  ;;  %v1359_v59 = vadd.f32 %v1351_v29, %v1295_v18  ;;  %v6788_v61 = vmul.f32 %v6762_v47, %v6517_v42  ;;  %v1116_v38 = vmul.f32 %v6650_v21, %v6700_v63 }
 0x166   : > { %9012 = vst [vmem:[#allocation27_spill] sm:$0xff] %v6800_v20  ;;  %v1053_v26 = vadd.f32 %v1045_v53, %v974_v30  ;;  %v1195_v29 = vmul.f32 %v6689_v48, %v6750_v58  ;;  %v995_v45 = vadd.f32 %v987_v56, %v867_v25  ;;  %v1066_v54 = vmul.f32 %v6641_v11, %v6746_v52  ;;  %v6815_v30 = vld [vmem:[%s8896_s6] ss:$0 sm:$0xff]  ;;  %v6820_v25 = vld [vmem:[%s8896_s6 + $0x1] ss:$0 sm:$0xff] }
 0x167   : > { %v1410_v18 = vadd.f32 %v1402_v2, %v1338_v62  ;;  %v1431_v15 = vadd.f32 %v1423_v37, %v1359_v59  ;;  %v1267_v13 = vmul.f32 %v6711_v16, %v6778_v9  ;;  %v6810_v33 = vmul.f32 %v6782_v1, %v6515_v39  ;;  %9014 = vst [vmem:[#allocation29_spill] sm:$0xff] %v6815_v30 }
 0x168   : > { %9015 = vst [vmem:[#allocation30_spill] sm:$0xff] %v6820_v25  ;;  %v1124_v53 = vadd.f32 %v1116_v38, %v1053_v26  ;;  %v1074_v2 = vadd.f32 %v1066_v54, %v995_v45  ;;  %v1137_v37 = vmul.f32 %v6657_v23, %v6700_v63  ;;  %v6826_v56 = vmul.f32 %v6671_v31, %v6517_v42 }
 0x169   : > { %9013 = vst [vmem:[#allocation28_spill] sm:$0xff] %v6810_v33  ;;  %v1467_v39 = vmul.f32 %v6795_v17, %v1410_v18  ;;  %v1498_v62 = vmul.f32 %v6800_v20, %v1431_v15  ;;  %v1216_v59 = vmul.f32 %v6696_v44, %v6750_v58  ;;  %v6834_v52 = vmul.f32 %v6681_v41, %v6522_v46 }
 0x16a   : > { %9016 = vst [vmem:[#allocation31_spill] sm:$0xff] %v6826_v56  ;;  %v1203_v38 = vadd.f32 %v1195_v29, %v1124_v53  ;;  %v1145_v26 = vadd.f32 %v1137_v37, %v1074_v2  ;;  %v766_v45 = vmul.f32 %v6567_v36, %v6826_v56  ;;  %v839_v31 = vmul.f32 %v6560_v32, %v6700_v63  ;;  %v6848_v2 = vld [vmem:[#allocation2 + $0x27] sm:$0xff] }
 0x16b   : > { %v1482_v54 = vadd.f32 %v6815_v30, %v1467_v39  ;;  %v1514_v18 = vadd.f32 %v6820_v25, %v1498_v62  ;;  %v1288_v15 = vmul.f32 %v6720_v35, %v6778_v9  ;;  %v1352_v58 = vmul.f32 %v6742_v28, %v6677_v40 }
 0x16c   : > { %v1275_v41 = vadd.f32 %v1267_v13, %v1203_v38  ;;  %v1224_v12 = vadd.f32 %v1216_v59, %v1145_v26  ;;  %v847_v29 = vadd.f32 %v839_v31, %v766_v45  ;;  %v967_v53 = vmul.f32 %v6597_v57, %v6834_v52 }
 0x16d   : > { %5091 = vmatmul.mubr.msk.f32.vlgmr.msra.gmra.mrb[0].mxu0 %vm533_vm0, %v1482_v54  ;;  %5126 = vmatmul.mubr.msk.f32.vlgmr.msra.gmra.mrb[0].mxu1 %vm533_vm0, %v1514_v18  ;;  %v6854_v37 = vmul.f32 %v6782_v1, %v6522_v46  ;;  %v1403_v39 = vmul.f32 %v6735_v10, %v6810_v33  ;;  %v1046_v13 = vmul.f32 %v6636_v8, %v6788_v61  ;;  %v9017_v62 = vmov 0.0  }
 0x16e   : > { %5093 = vmatprep.mubr.msk.f32.mxu0 %vm6205_vm2, %v9017_v62  ;;  %5128 = vmatprep.mubr.msk.f32.mxu1 %vm6205_vm2, %v9017_v62  ;;  %v1339_v59 = vadd.f32 %v6726_v14, %v1275_v41  ;;  %v1296_v38 = vadd.f32 %v1288_v15, %v1224_v12  ;;  %v975_v26 = vadd.f32 %v967_v53, %v847_v29  ;;  %v6880_v29 = vld [vmem:[#allocation2 + $0x29] sm:$0xff] }
 0x16f   : > { %v1424_v45 = vmul.f32 %v6757_v55, %v6810_v33  ;;  %v6869_v31 = vmul.f32 %v6848_v2, %v6517_v42  ;;  %v788_v54 = vmul.f32 %v6572_v43, %v6826_v56  ;;  %v860_v18 = vmul.f32 %v6577_v34, %v6700_v63  ;;  %v6885_v56 = vpop.permute.xlu1 %939  ;;  %v6887_v63 = vpop.permute.xlu0 %743 }
 0x170   : > { %v9018_v9 = vpack.c.bf16 %v6620_v5, %v6608_v0  ;;  %v1411_v14 = vadd.f32 %v1403_v39, %v1339_v59  ;;  %v1360_v12 = vadd.f32 %v1352_v58, %v1296_v38  ;;  %v1054_v15 = vadd.f32 %v1046_v13, %v975_v26  ;;  %9020 = vst [vmem:[#allocation32_spill] sm:$0xff] %v6885_v56  ;;  %v6892_v39 = vld [vmem:[#allocation2 + $0x28] sm:$0xff]  ;;  %v9040_v56 = vld [vmem:[#allocation11_spill] sm:$0xff] }
 0x171   : > { %v1117_v41 = vmul.f32 %v6650_v21, %v6677_v40  ;;  %v9019_v42 = vmov 0.0|0.0   ;;  %v868_v53 = vadd.f32 %v860_v18, %v788_v54  ;;  %v988_v33 = vmul.f32 %v6602_v60, %v6834_v52  ;;  %9021 = vst [vmem:[#allocation33_spill] sm:$0xff] %v6892_v39 }
 0x172   : > { %5690 = vmatpush3.bf16.msra.mxu0 %v9018_v9  ;;  %v1468_v0 = vmul.f32 %v6795_v17, %v1411_v14  ;;  %v1432_v5 = vadd.f32 %v1424_v45, %v1360_v12  ;;  %v1196_v9 = vmul.f32 %v6689_v48, %v6854_v37  ;;  %v1268_v13 = vmul.f32 %v6711_v16, %v6869_v31 }
 0x173   : > { %5691 = vmatprep.subr.bf16.mxu0 %v9019_v42  ;;  %v1125_v58 = vadd.f32 %v1117_v41, %v1054_v15  ;;  %v6898_v59 = vmul.f32 %v6880_v29, %v6522_v46  ;;  %v996_v38 = vadd.f32 %v988_v33, %v868_v53  ;;  %v1067_v26 = vmul.f32 %v6641_v11, %v6788_v61 }
 0x174   : > { %v9023_v45 = vpack.c.bf16 %v6630_v7, %v6625_v6  ;;  %v1483_v54 = vadd.f32 %v6815_v30, %v1468_v0  ;;  %v1499_v18 = vmul.f32 %v6800_v20, %v1432_v5  ;;  %v6909_v12 = vmul.f32 %v6762_v47, %v6527_v49 }
 0x175   : > { %9022 = vst [vmem:[#allocation34_spill] sm:$0xff] %v6898_v59  ;;  %v1204_v14 = vadd.f32 %v1196_v9, %v1125_v58  ;;  %v1075_v46 = vadd.f32 %v1067_v26, %v996_v38  ;;  %v1138_v33 = vmul.f32 %v6657_v23, %v6677_v40  ;;  %v1332_v15 = vmul.f32 %v6662_v24, %v6892_v39 }
 0x176   : > { %5693 = vmatpush3.bf16.msra.mxu0 %v9023_v45  ;;  %9024 = vst [vmem:[#allocation35_spill] sm:$0xff] %v6909_v12  ;;  %v1515_v6 = vadd.f32 %v6820_v25, %v1499_v18  ;;  %v610_v41 = vpop.xlane.xlu1 %609  ;;  %v607_v53 = vpop.xlane.xlu0 %606  ;;  %v6920_v47 = vmul.f32 %v6782_v1, %v6529_v50  ;;  %v1217_v5 = vmul.f32 %v6696_v44, %v6854_v37 }
 0x177   : > { %5710 = vmatprep.subr.bf16.mxu0 %v9019_v42  ;;  %5094 = vmatmul.mubr.msk.f32.gmra.mrb[2].mxu0 %vm533_vm0, %v1483_v54  ;;  %v1276_v7 = vadd.f32 %v1268_v13, %v1204_v14  ;;  %v1146_v0 = vadd.f32 %v1138_v33, %v1075_v46  ;;  %v623_v58 = vmul.f32 0.03125, %v610_v41  ;;  %v622_v9 = vmul.f32 0.03125, %v607_v53 }
 0x178   : > { %9025 = vst [vmem:[#allocation36_spill] sm:$0xff] %v6920_v47  ;;  %5096 = vmatprep.mubr.msk.f32.mxu0 %vm6205_vm2, %v9017_v62  ;;  %5129 = vmatmul.mubr.msk.f32.gmra.mrb[2].mxu1 %vm533_vm0, %v1515_v6  ;;  %v6929_v13 = vmul.f32 %v6848_v2, %v6527_v49  ;;  %v1404_v1 = vmul.f32 %v6735_v10, %v6898_v59 }
 0x179   : > { %v1340_v38 = vadd.f32 %v1332_v15, %v1276_v7  ;;  %v767_v26 = vmul.f32 %v6567_v36, %v6909_v12  ;;  %5131 = vmatprep.mubr.msk.f32.mxu1 %vm6205_vm2, %v9017_v62  ;;  %v1225_v45 = vadd.f32 %v1217_v5, %v1146_v0  ;;  %v1289_v54 = vmul.f32 %v6720_v35, %v6869_v31 }
 0x17a   : > { %9026 = vst [vmem:[#allocation37_spill] sm:$0xff] %v6929_v13  ;;  %v632_v18 = vadd.f32 1e-05, %v623_v58  ;;  %v631_v14 = vadd.f32 1e-05, %v622_v9  ;;  %v1353_v33 = vmul.f32 %v6742_v28, %v6892_v39  ;;  %v613_v6 = vpop.xlane.xlu0 %612  ;;  %v840_v7 = vmul.f32 %v6560_v32, %v6677_v40 }
 0x17b   : > { %v1412_v46 = vadd.f32 %v1404_v1, %v1340_v38  ;;  %v968_v15 = vmul.f32 %v6597_v57, %v6920_v47  ;;  %v1297_v41 = vadd.f32 %v1289_v54, %v1225_v45  ;;  %v624_v53 = vmul.f32 0.03125, %v613_v6 }
 0x17c   : > { %5993 = vrsqrt.f32 %v632_v18  ;;  %v789_v0 = vmul.f32 %v6572_v43, %v6909_v12  ;;  %v1425_v58 = vmul.f32 %v6757_v55, %v6898_v59  ;;  %v848_v9 = vadd.f32 %v840_v7, %v767_v26  ;;  %v6959_v26 = vld [vmem:[%s8894_s4 + $0x24] ss:$0 sm:$0xff] }
 0x17d   : > { %v1469_v5 = vmul.f32 %v6795_v17, %v1412_v46  ;;  %5995 = vrsqrt.f32 %v631_v14  ;;  %v1361_v38 = vadd.f32 %v1353_v33, %v1297_v41  ;;  %v633_v1 = vadd.f32 1e-05, %v624_v53  ;;  %9027 = vst [vmem:[#allocation38_spill] sm:$0xff] %v6959_v26  ;;  %v6965_v46 = vld [vmem:[%s8894_s4 + $0x22] ss:$0 sm:$0xff]  ;;  %v6967_v33 = vpop.permute.xlu1 %944 }
 0x17e   : > { %v861_v42 = vmul.f32 %v6577_v34, %v6677_v40  ;;  %v989_v45 = vmul.f32 %v6602_v60, %v6920_v47  ;;  %v976_v6 = vadd.f32 %v968_v15, %v848_v9  ;;  %v6973_v15 = vld [vmem:[#allocation2 + $0x50] sm:$0xff]  ;;  %v6977_v41 = vmul.f32 %v6880_v29, %v6529_v50  ;;  %v6982_v53 = vld [vmem:[%s8894_s4 + $0x23] ss:$0 sm:$0xff] }
 0x17f   : > { %v1484_v54 = vadd.f32 %v6815_v30, %v1469_v5  ;;  %v1433_v18 = vadd.f32 %v1425_v58, %v1361_v38  ;;  %5997 = vrsqrt.f32 %v633_v1  ;;  %9028 = vst [vmem:[#allocation39_spill] sm:$0xff] %v6973_v15  ;;  %v6987_v5 = vld [vmem:[%s8894_s4 + $0x28] ss:$0 sm:$0xff]  ;;  %v1068_v9 = vmul.f32 %v6641_v11, %v6929_v13 }
 0x180   : > { %v869_v12 = vadd.f32 %v861_v42, %v789_v0  ;;  %v1047_v42 = vmul.f32 %v6636_v8, %v6929_v13  ;;  %9029 = vst [vmem:[#allocation40_spill] sm:$0xff] %v6977_v41  ;;  %v1027_v0 = vld [vmem:[#allocation2 + $0x2f] sm:$0xff]  ;;  %9030 = vst [vmem:[#allocation41_spill] sm:$0xff] %v6987_v5  ;;  %v6994_v38 = vmul.f32 %v6848_v2, %v6531_v51 }
 0x181   : > { %5097 = vmatmul.mubr.msk.f32.gmra.mrb[4].mxu0 %vm533_vm0, %v1484_v54  ;;  %v1500_v14 = vmul.f32 %v6800_v20, %v1433_v18  ;;  %v1157_v1 = vmul.f32 %v6959_v26, %v6645_v19  ;;  %v7004_v54 = vmul.f32 %v6742_v28, %v6973_v15  ;;  %v1007_v18 = vmul.f32 %v6965_v46, %v6612_v3  ;;  %v9042_v20 = vld [vmem:[#allocation14_spill] sm:$0xff] }
 0x182   : > { %5099 = vmatprep.mubr.msk.f32.mxu0 %vm6205_vm2, %v9017_v62  ;;  %v997_v7 = vadd.f32 %v989_v45, %v869_v12  ;;  %v1055_v12 = vadd.f32 %v1047_v42, %v976_v6  ;;  %9031 = vst [vmem:[#allocation42_spill] sm:$0xff] %v6994_v38  ;;  %v7000_v45 = vmul.f32 %v6662_v24, %v6973_v15 }
 0x183   : > { %v1516_v58 = vadd.f32 %v6820_v25, %v1500_v14  ;;  %9033 = vst [vmem:[#allocation44_spill] sm:$0xff] %v7004_v54  ;;  %v7009_v14 = vld [vmem:[#allocation2 + $0x30] sm:$0xff]  ;;  %v1118_v2 = vmul.f32 %v6650_v21, %v6892_v39  ;;  %v7014_v42 = vmul.f32 %v1027_v0, %v6527_v49  ;;  %v1086_v13 = vmul.f32 %v6982_v53, %v6615_v4  ;;  %v7031_v4 = vpop.permute.xlu1 %949 }
 0x184   : > { %9032 = vst [vmem:[#allocation43_spill] sm:$0xff] %v7000_v45  ;;  %9034 = vst [vmem:[#allocation45_spill] sm:$0xff] %v7009_v14  ;;  %v1076_v59 = vadd.f32 %v1068_v9, %v997_v7  ;;  %v7020_v47 = vmul.f32 %v6987_v5, %v6715_v22  ;;  %v1197_v49 = vmul.f32 %v6689_v48, %v6977_v41  ;;  %v9038_v7 = vld [vmem:[#allocation6_spill] sm:$0xff] }
 0x185   : > { %5132 = vmatmul.mubr.msk.f32.gmra.mrb[4].mxu1 %vm533_vm0, %v1516_v58  ;;  %9035 = vst [vmem:[#allocation46_spill] sm:$0xff] %v7014_v42  ;;  %v7026_v58 = vmul.f32 %v1027_v0, %v6531_v51  ;;  %v1388_v54 = vld [vmem:[#allocation2 + $0x51] sm:$0xff]  ;;  %v1126_v45 = vadd.f32 %v1118_v2, %v1055_v12  ;;  %v1139_v22 = vmul.f32 %v6657_v23, %v6892_v39 }
 0x186   : > { %v5994_v6 = vpop.eup %5993  ;;  %9036 = vst [vmem:[#allocation47_spill] sm:$0xff] %v7020_v47  ;;  %5134 = vmatprep.mubr.msk.f32.mxu1 %vm6205_vm2, %v9017_v62  ;;  %v1333_v62 = vmul.f32 %v6662_v24, %v7009_v14  ;;  %v7042_v25 = vmul.f32 %v6880_v29, %v9040_v56  ;;  %v1269_v2 = vmul.f32 %v6711_v16, %v7014_v42  ;;  %v9043_v24 = vld [vmem:[#allocation7_spill] sm:$0xff] }
 0x187   : > { %v5996_v15 = vpop.eup %5995  ;;  %v650_v3 = vmul.f32 %v5994_v6, %v6488_v27  ;;  %9037 = vst [vmem:[#allocation48_spill] sm:$0xff] %v7026_v58  ;;  %v768_v27 = vmul.f32 %v6567_v36, %v6994_v38  ;;  %v9039_v6 = vld [vmem:[#allocation13_spill] sm:$0xff]  ;;  %v1147_v30 = vadd.f32 %v1139_v22, %v1076_v59  ;;  %v7054_v29 = vmul.f32 %v1388_v54, %v7031_v4 }
 0x188   : > { %v649_v9 = vmul.f32 %v5996_v15, %v9038_v7  ;;  %9041 = vst [vmem:[#allocation6_spill] sm:$0xff] %v7042_v25  ;;  %v790_v15 = vmul.f32 %v6572_v43, %v6994_v38  ;;  %v862_v38 = vmul.f32 %v6577_v34, %v6892_v39  ;;  %v1218_v16 = vmul.f32 %v6696_v44, %v6977_v41  ;;  %v9045_v54 = vld [vmem:[#allocation5_spill] sm:$0xff] }
 0x189   : > { %v665_v47 = vmul.f32 %v9039_v6, %v650_v3  ;;  %v5998_v7 = vpop.eup %5997  ;;  %v841_v3 = vmul.f32 %v6560_v32, %v6892_v39  ;;  %9044 = vst [vmem:[#allocation13_spill] sm:$0xff] %v7054_v29 }
 0x18a   : > { %v664_v12 = vmul.f32 %v9039_v6, %v649_v9  ;;  %v651_v51 = vmul.f32 %v5998_v7, %v9043_v24  ;;  %v1205_v9 = vadd.f32 %v1197_v49, %v1126_v45  ;;  %v969_v24 = vmul.f32 %v6597_v57, %v7042_v25  ;;  %v7070_v45 = vld [vmem:[%s8894_s4 + $0x25] ss:$0 sm:$0xff] }
 0x18b   : > { %v680_v17 = vadd.f32 %v9042_v20, %v665_v47  ;;  %v849_v59 = vadd.f32 %v841_v3, %v768_v27  ;;  %v870_v47 = vadd.f32 %v862_v38, %v790_v15  ;;  %v1015_v7 = vadd.f32 %v1007_v18, %v9045_v54  ;;  %9046 = vst [vmem:[#allocation14_spill] sm:$0xff] %v7070_v45  ;;  %v9052_v54 = vld [vmem:[#allocation24_spill] sm:$0xff] }
 0x18c   : > { %v679_v50 = vadd.f32 %v9042_v20, %v664_v12  ;;  %v666_v22 = vmul.f32 %v9039_v6, %v651_v51  ;;  %v1226_v49 = vadd.f32 %v1218_v16, %v1147_v30  ;;  %v990_v27 = vmul.f32 %v6602_v60, %v7042_v25  ;;  %v9049_v51 = vld [vmem:[#allocation16_spill] sm:$0xff] }
 0x18d   : > { %693 = vst.msk [vmem:[#allocation2 + $0x40] sm:$0xff] %vm533_vm0, %v680_v17  ;;  %v9047_v17 = vld [vmem:[#allocation12_spill] sm:$0xff]  ;;  %v1094_v18 = vadd.f32 %v1086_v13, %v1015_v7  ;;  %v1008_v41 = vmul.f32 %v6965_v46, %v9052_v54  ;;  %v1277_v56 = vadd.f32 %v1269_v2, %v1205_v9  ;;  %v1290_v16 = vmul.f32 %v6720_v35, %v7014_v42  ;;  %v9054_v2 = vld [vmem:[#allocation31_spill] sm:$0xff] }
 0x18e   : > { %692 = vst.msk [vmem:[#allocation2 + $0x38] sm:$0xff] %vm533_vm0, %v679_v50  ;;  %v7075_v12 = vmul.f32 %v1027_v0, %v9047_v17  ;;  %v9050_v6 = vld [vmem:[#allocation4_spill] sm:$0xff]  ;;  %v681_v38 = vadd.f32 %v9042_v20, %v666_v22  ;;  %v9051_v50 = vld [vmem:[#allocation3_spill] sm:$0xff]  ;;  %v977_v30 = vadd.f32 %v969_v24, %v849_v59  ;;  %v1048_v0 = vmul.f32 %v6636_v8, %v7026_v58  ;;  %v9053_v20 = vld [vmem:[#allocation18_spill] sm:$0xff] }
 0x18f   : > { %v809_v3 = vmul.f32 %v9050_v6, %v9049_v51  ;;  %v880_v15 = vmul.f32 %v9051_v50, %v6645_v19  ;;  %v998_v51 = vadd.f32 %v990_v27, %v870_v47  ;;  %v1165_v25 = vadd.f32 %v1157_v1, %v1094_v18  ;;  %v9055_v54 = vld [vmem:[#allocation19_spill] sm:$0xff] }
 0x190   : > { %9048 = vst [vmem:[#allocation7_spill] sm:$0xff] %v7075_v12  ;;  %694 = vst.msk [vmem:[#allocation2 + $0x48] sm:$0xff] %vm533_vm0, %v681_v38  ;;  %v1236_v13 = vmul.f32 %v7070_v45, %v9053_v20  ;;  %v1298_v19 = vadd.f32 %v1290_v16, %v1226_v49  ;;  %v1069_v7 = vmul.f32 %v6641_v11, %v7026_v58 }
 0x191   : > { %v888_v22 = vadd.f32 %v880_v15, %v809_v3  ;;  %v810_v9 = vmul.f32 %v9050_v6, %v9054_v2  ;;  %v881_v59 = vmul.f32 %v9051_v50, %v9055_v54  ;;  %v769_v24 = vmul.f32 %v6567_v36, %v7075_v12 }
 0x192   : > { %v791_v1 = vmul.f32 %v6572_v43, %v7075_v12  ;;  %v7101_v47 = vadd.f32 %v1236_v13, %v1165_v25  ;;  %v7107_v49 = vmul.f32 %v6735_v10, %v7054_v29  ;;  %v7111_v3 = vmul.f32 %v6757_v55, %v7054_v29 }
 0x193   : > { %v7103_v27 = vadd.f32 %v1008_v41, %v888_v22  ;;  %v1354_v38 = vmul.f32 %v6742_v28, %v7009_v14  ;;  %v7115_v18 = vadd.f32 %v881_v59, %v810_v9  ;;  %v1056_v41 = vadd.f32 %v1048_v0, %v977_v30  ;;  %v7132_v9 = vld [vmem:[%s8894_s4 + $0x26] ss:$0 sm:$0xff] }
 0x194   : > { %9056 = vst [vmem:[#allocation5_spill] sm:$0xff] %v7101_v47  ;;  %9058 = vst [vmem:[#allocation16_spill] sm:$0xff] %v7107_v49  ;;  %v1077_v20 = vadd.f32 %v1069_v7, %v998_v51  ;;  %v842_v13 = vmul.f32 %v6560_v32, %v7009_v14  ;;  %v863_v22 = vmul.f32 %v6577_v34, %v7009_v14  ;;  %v7143_v51 = vld [vmem:[%s8894_s4 + $0x27] ss:$0 sm:$0xff] }
 0x195   : > { %9057 = vst [vmem:[#allocation12_spill] sm:$0xff] %v7103_v27  ;;  %9059 = vst [vmem:[#allocation4_spill] sm:$0xff] %v7111_v3  ;;  %v7117_v15 = vld [vmem:[#allocation2 + $0x37] sm:$0xff]  ;;  %v7134_v59 = vadd.f32 %v1333_v62, %v1277_v56  ;;  %v1119_v30 = vmul.f32 %v6650_v21, %v7009_v14  ;;  %v1140_v0 = vmul.f32 %v6657_v23, %v7009_v14 }
 0x196   : > { %9060 = vst [vmem:[#allocation3_spill] sm:$0xff] %v7115_v18  ;;  %v7119_v16 = vld [vmem:[#allocation2 + $0x38] sm:$0xff]  ;;  %v757_v2 = vmul.f32 %v6887_v63, %v7117_v15  ;;  %9061 = vst [vmem:[#allocation24_spill] sm:$0xff] %v7132_v9  ;;  %v7147_v29 = vadd.f32 %v1354_v38, %v1298_v19  ;;  %v7149_v42 = vadd.f32 %v842_v13, %v769_v24  ;;  %v9063_v24 = vld [vmem:[#allocation20_spill] sm:$0xff] }
 0x197   : > { %v7121_v25 = vld [vmem:[#allocation2 + $0x39] sm:$0xff]  ;;  %9062 = vst [vmem:[#allocation18_spill] sm:$0xff] %v7143_v51  ;;  %v7151_v56 = vadd.f32 %v863_v22, %v791_v1  ;;  %v843_v14 = vmul.f32 %v6560_v32, %v7119_v16  ;;  %v864_v58 = vmul.f32 %v6577_v34, %v7119_v16  ;;  %v7161_v3 = vadd.f32 %v1119_v30, %v1056_v41  ;;  %v7173_v49 = vld [vmem:[#allocation2 + $0x41] sm:$0xff] }
 0x198   : > { %v958_v7 = vmul.f32 %v6967_v33, %v7121_v25  ;;  %v770_v62 = vmul.f32 %v6567_v36, %v757_v2  ;;  %v792_v12 = vmul.f32 %v6572_v43, %v757_v2  ;;  %v7159_v18 = vld [vmem:[#allocation2 + $0x3f] sm:$0xff]  ;;  %v7163_v19 = vadd.f32 %v1140_v0, %v1077_v20 }
 0x199   : > { %v7167_v1 = vmul.f32 %v7132_v9, %v9063_v24  ;;  %v7171_v38 = vmul.f32 %v7143_v51, %v9055_v54  ;;  %v9065_v27 = vld [vmem:[#allocation22_spill] sm:$0xff]  ;;  %v7181_v41 = vmul.f32 %v6959_v26, %v9055_v54  ;;  %v1037_v30 = vmul.f32 %v7159_v18, %v6887_v63  ;;  %v9068_v0 = vld [vmem:[#allocation23_spill] sm:$0xff] }
 0x19a   : > { %v851_v13 = vadd.f32 %v843_v14, %v770_v62  ;;  %v872_v22 = vadd.f32 %v864_v58, %v792_v12  ;;  %v7177_v47 = vmul.f32 %v6982_v53, %v9065_v27  ;;  %v971_v20 = vmul.f32 %v6597_v57, %v958_v7  ;;  %v9070_v14 = vld [vmem:[#allocation25_spill] sm:$0xff]  ;;  %v7195_v27 = vpop.permute.xlu0 %748  ;;  %v9073_v62 = vld [vmem:[#allocation28_spill] sm:$0xff] }
 0x19b   : > { %9064 = vst [vmem:[#allocation31_spill] sm:$0xff] %v7171_v38  ;;  %9067 = vst [vmem:[#allocation20_spill] sm:$0xff] %v7181_v41  ;;  %v7188_v24 = vmul.f32 %v7070_v45, %v9068_v0  ;;  %v7192_v58 = vmul.f32 %v7132_v9, %v9070_v14  ;;  %v992_v12 = vmul.f32 %v6602_v60, %v958_v7 }
 0x19c   : > { %9066 = vst [vmem:[#allocation19_spill] sm:$0xff] %v7177_v47  ;;  %v7199_v54 = vmul.f32 %v7143_v51, %v6677_v40  ;;  %v7203_v41 = vmul.f32 %v6987_v5, %v9073_v62  ;;  %v7207_v0 = vmul.f32 %v6965_v46, %v6834_v52  ;;  %v814_v14 = vmul.f32 %v9050_v6, %v757_v2 }
 0x19d   : > { %9069 = vst [vmem:[#allocation22_spill] sm:$0xff] %v7188_v24  ;;  %9071 = vst [vmem:[#allocation23_spill] sm:$0xff] %v7192_v58  ;;  %v7209_v24 = vld [vmem:[#allocation2 + $0x40] sm:$0xff]  ;;  %v979_v58 = vadd.f32 %v971_v20, %v851_v13  ;;  %v959_v38 = vmul.f32 %v7031_v4, %v7173_v49  ;;  %v7216_v47 = vmul.f32 %v7159_v18, %v7195_v27 }
 0x19e   : > { %9072 = vst [vmem:[#allocation25_spill] sm:$0xff] %v7199_v54  ;;  %9074 = vst [vmem:[#allocation28_spill] sm:$0xff] %v7203_v41  ;;  %v1000_v54 = vadd.f32 %v992_v12, %v872_v22  ;;  %v7220_v62 = vmul.f32 %v6982_v53, %v6788_v61  ;;  %v7224_v52 = vmul.f32 %v6959_v26, %v6677_v40  ;;  %v1030_v20 = vld [vmem:[#allocation2 + $0x47] sm:$0xff] }
 0x19f   : > { %9075 = vst [vmem:[#allocation49_spill] sm:$0xff] %v7207_v0  ;;  %v7228_v6 = vmul.f32 %v7070_v45, %v6854_v37  ;;  %v885_v2 = vmul.f32 %v9051_v50, %v7119_v16  ;;  %v1050_v13 = vmul.f32 %v6636_v8, %v1037_v30  ;;  %v7235_v22 = vmul.f32 %v7132_v9, %v6869_v31  ;;  %v1180_v45 = vld [vmem:[#allocation2 + $0x49] sm:$0xff] }
 0x1a0   : > { %9076 = vst [vmem:[#allocation50_spill] sm:$0xff] %v7220_v62  ;;  %9077 = vst [vmem:[#allocation51_spill] sm:$0xff] %v7224_v52  ;;  %v7239_v61 = vmul.f32 %v7143_v51, %v6892_v39  ;;  %v1121_v12 = vmul.f32 %v6650_v21, %v7209_v24  ;;  %v1071_v37 = vmul.f32 %v6641_v11, %v1037_v30 }
 0x1a1   : > { %9078 = vst [vmem:[#allocation52_spill] sm:$0xff] %v7228_v6  ;;  %9079 = vst [vmem:[#allocation53_spill] sm:$0xff] %v7235_v22  ;;  %v844_v5 = vmul.f32 %v6560_v32, %v7209_v24  ;;  %v865_v26 = vmul.f32 %v6577_v34, %v7209_v24  ;;  %v893_v6 = vadd.f32 %v885_v2, %v814_v14  ;;  %v7252_v22 = vld [vmem:[#allocation2 + $0x48] sm:$0xff] }
 0x1a2   : > { %9080 = vst [vmem:[#allocation54_spill] sm:$0xff] %v7239_v61  ;;  %v1058_v41 = vadd.f32 %v1050_v13, %v979_v58  ;;  %v972_v31 = vmul.f32 %v6597_v57, %v959_v38  ;;  %v771_v51 = vmul.f32 %v6567_v36, %v7216_v47  ;;  %v1079_v9 = vadd.f32 %v1071_v37, %v1000_v54 }
 0x1a3   : > { %v993_v61 = vmul.f32 %v6602_v60, %v959_v38  ;;  %v793_v39 = vmul.f32 %v6572_v43, %v7216_v47  ;;  %v7257_v32 = vmul.f32 %v1030_v20, %v7195_v27  ;;  %v1142_v34 = vmul.f32 %v6657_v23, %v7209_v24 }
 0x1a4   : > { %v1013_v58 = vmul.f32 %v6965_v46, %v958_v7  ;;  %v7263_v14 = vmul.f32 %v1180_v45, %v7031_v4  ;;  %v7267_v36 = vmul.f32 %v6967_v33, %v7173_v49  ;;  %v7270_v54 = vmul.f32 %v6982_v53, %v1037_v30 }
 0x1a5   : > { %9081 = vst [vmem:[#allocation55_spill] sm:$0xff] %v7257_v32  ;;  %v7274_v43 = vmul.f32 %v9051_v50, %v7209_v24  ;;  %v852_v2 = vadd.f32 %v844_v5, %v771_v51  ;;  %v873_v13 = vadd.f32 %v865_v26, %v793_v39  ;;  %v1129_v52 = vadd.f32 %v1121_v12, %v1058_v41 }
 0x1a6   : > { %9082 = vst [vmem:[#allocation56_spill] sm:$0xff] %v7263_v14  ;;  %9083 = vst [vmem:[#allocation57_spill] sm:$0xff] %v7267_v36  ;;  %v7276_v37 = vadd.f32 %v1013_v58, %v893_v6  ;;  %v7279_v7 = vmul.f32 %v1180_v45, %v6967_v33  ;;  %v1122_v4 = vmul.f32 %v6650_v21, %v7252_v22  ;;  %v1252_v33 = vld [vmem:[#allocation2 + $0x4f] sm:$0xff] }
 0x1a7   : > { %9084 = vst [vmem:[#allocation58_spill] sm:$0xff] %v7270_v54  ;;  %v1150_v62 = vadd.f32 %v1142_v34, %v1079_v9  ;;  %v980_v40 = vadd.f32 %v972_v31, %v852_v2  ;;  %v1001_v0 = vadd.f32 %v993_v61, %v873_v13  ;;  %v1051_v30 = vmul.f32 %v6636_v8, %v7257_v32  ;;  %v1177_v54 = vld [vmem:[#allocation2 + $0x31] sm:$0xff]  ;;  %v9087_v61 = vld [vmem:[#allocation11_spill] sm:$0xff] }
 0x1a8   : > { %9085 = vst [vmem:[#allocation59_spill] sm:$0xff] %v7279_v7  ;;  %v7286_v50 = vmul.f32 %v6965_v46, %v959_v38  ;;  %v1201_v39 = vmul.f32 %v6689_v48, %v7263_v14  ;;  %v1200_v26 = vmul.f32 %v6689_v48, %v7267_v36  ;;  %v7293_v5 = vmul.f32 %v1030_v20, %v6887_v63  ;;  %v9088_v63 = vld [vmem:[#allocation9_spill] sm:$0xff] }
 0x1a9   : > { %v1222_v45 = vmul.f32 %v6696_v44, %v7263_v14  ;;  %v1221_v9 = vmul.f32 %v6696_v44, %v7267_v36  ;;  %v1059_v51 = vadd.f32 %v1051_v30, %v980_v40  ;;  %v1072_v38 = vmul.f32 %v6641_v11, %v7257_v32  ;;  %v9091_v2 = vld [vmem:[#allocation21_spill] sm:$0xff] }
 0x1aa   : > { %9086 = vst [vmem:[#allocation60_spill] sm:$0xff] %v7293_v5  ;;  %v7303_v41 = vmul.f32 %v6735_v10, %v7279_v7  ;;  %v1208_v6 = vadd.f32 %v1200_v26, %v1129_v52  ;;  %v7306_v12 = vmul.f32 %v1177_v54, %v9087_v61  ;;  %v7309_v20 = vmul.f32 %v1177_v54, %v9088_v63 }
 0x1ab   : > { %v7313_v31 = vmul.f32 %v6757_v55, %v7279_v7  ;;  %v1229_v34 = vadd.f32 %v1221_v9, %v1150_v62  ;;  %v1080_v40 = vadd.f32 %v1072_v38, %v1001_v0  ;;  %v7316_v58 = vmul.f32 %v1252_v33, %v7195_v27  ;;  %v9092_v62 = vld [vmem:[#allocation10_spill] sm:$0xff] }
 0x1ac   : > { %9089 = vst [vmem:[#allocation11_spill] sm:$0xff] %v7309_v20  ;;  %v1272_v13 = vmul.f32 %v9091_v2, %v7293_v5  ;;  %v1405_v52 = vmul.f32 %v6735_v10, %v7309_v20  ;;  %v1426_v30 = vmul.f32 %v6757_v55, %v7309_v20  ;;  %v1198_v26 = vmul.f32 %v6689_v48, %v7306_v12 }
 0x1ad   : > { %9090 = vst [vmem:[#allocation9_spill] sm:$0xff] %v7316_v58  ;;  %v1143_v63 = vmul.f32 %v6657_v23, %v7252_v22  ;;  %v1293_v0 = vmul.f32 %v6720_v35, %v7293_v5  ;;  %v1130_v27 = vadd.f32 %v1122_v4, %v1059_v51  ;;  %v7332_v33 = vmul.f32 %v9092_v62, %v7117_v15  ;;  %v9093_v51 = vld [vmem:[#allocation26_spill] sm:$0xff]  ;;  %v9094_v5 = vld [vmem:[#allocation27_spill] sm:$0xff] }
 0x1ae   : > { %v7334_v9 = vadd.f32 %v1272_v13, %v1208_v6  ;;  %v1413_v38 = vadd.f32 %v1405_v52, %v7134_v59  ;;  %v1434_v7 = vadd.f32 %v1426_v30, %v7147_v29  ;;  %v1206_v14 = vadd.f32 %v1198_v26, %v7161_v3  ;;  %v9095_v13 = vld [vmem:[#allocation15_spill] sm:$0xff]  ;;  %v9096_v30 = vld [vmem:[#allocation29_spill] sm:$0xff] }
 0x1af   : > { %v7339_v36 = vadd.f32 %v1293_v0, %v1229_v34  ;;  %v1151_v20 = vadd.f32 %v1143_v63, %v1080_v40  ;;  %v1273_v32 = vmul.f32 %v9091_v2, %v7316_v58  ;;  %v1270_v4 = vmul.f32 %v9091_v2, %v7332_v33  ;;  %v9097_v63 = vld [vmem:[#allocation30_spill] sm:$0xff] }
 0x1b0   : > { %v1470_v62 = vmul.f32 %v9093_v51, %v1413_v38  ;;  %v1501_v6 = vmul.f32 %v9094_v5, %v1434_v7  ;;  %v7349_v59 = vmul.f32 %v9087_v61, %v7121_v25  ;;  %v1219_v29 = vmul.f32 %v6696_v44, %v7306_v12 }
 0x1b1   : > { %v1209_v3 = vadd.f32 %v1201_v39, %v1130_v27  ;;  %v1294_v34 = vmul.f32 %v6720_v35, %v7316_v58  ;;  %v1278_v40 = vadd.f32 %v1270_v4, %v1206_v14  ;;  %v1334_v52 = vmul.f32 %v9095_v13, %v7119_v16  ;;  %v9098_v27 = vld [vmem:[#allocation32_spill] sm:$0xff] }
 0x1b2   : > { %v1485_v26 = vadd.f32 %v9096_v30, %v1470_v62  ;;  %v1517_v0 = vadd.f32 %v9097_v63, %v1501_v6  ;;  %v1227_v7 = vadd.f32 %v1219_v29, %v7163_v19  ;;  %v1291_v61 = vmul.f32 %v6720_v35, %v7332_v33  ;;  %v616_v6 = vpop.xlane.xlu0 %615 }
 0x1b3   : > { %v7364_v38 = vmul.f32 %v9047_v17, %v7117_v15  ;;  %v1342_v39 = vadd.f32 %v1334_v52, %v1278_v40  ;;  %v1406_v14 = vmul.f32 %v6735_v10, %v7349_v59  ;;  %v7369_v4 = vmul.f32 %v1177_v54, %v9098_v27 }
 0x1b4   : > { %v1230_v58 = vadd.f32 %v1222_v45, %v1151_v20  ;;  %5100 = vmatmul.mubr.msk.f32.gmra.mrb[6].mxu0 %vm533_vm0, %v1485_v26  ;;  %5135 = vmatmul.mubr.msk.f32.gmra.mrb[6].mxu1 %vm533_vm0, %v1517_v0  ;;  %v1299_v19 = vadd.f32 %v1291_v61, %v1227_v7  ;;  %v1355_v62 = vmul.f32 %v6742_v28, %v7119_v16  ;;  %v9099_v29 = vmov 0.0  }
 0x1b5   : > { %5102 = vmatprep.mubr.msk.f32.mxu0 %vm6205_vm2, %v9099_v29  ;;  %5137 = vmatprep.mubr.msk.f32.mxu1 %vm6205_vm2, %v9099_v29  ;;  %v7381_v15 = vmul.f32 %v9098_v27, %v7121_v25  ;;  %v1414_v54 = vadd.f32 %v1406_v14, %v1342_v39  ;;  %v970_v45 = vmul.f32 %v6597_v57, %v7369_v4  ;;  %v625_v61 = vmul.f32 0.03125, %v616_v6 }
 0x1b6   : > { %v1281_v20 = vadd.f32 %v1273_v32, %v1209_v3  ;;  %v1363_v40 = vadd.f32 %v1355_v62, %v1299_v19  ;;  %v1427_v52 = vmul.f32 %v6757_v55, %v7349_v59  ;;  %v991_v26 = vmul.f32 %v6602_v60, %v7369_v4 }
 0x1b7   : > { %v1471_v0 = vmul.f32 %v9093_v51, %v1414_v54  ;;  %v978_v7 = vadd.f32 %v970_v45, %v7149_v42  ;;  %v1049_v25 = vmul.f32 %v6636_v8, %v7364_v38  ;;  %v1302_v39 = vadd.f32 %v1294_v34, %v1230_v58 }
 0x1b8   : > { %v1435_v14 = vadd.f32 %v1427_v52, %v1363_v40  ;;  %v999_v57 = vadd.f32 %v991_v26, %v7151_v56  ;;  %v1070_v32 = vmul.f32 %v6641_v11, %v7364_v38  ;;  %v1120_v60 = vmul.f32 %v6650_v21, %v7119_v16 }
 0x1b9   : > { %v1486_v3 = vadd.f32 %v9096_v30, %v1471_v0  ;;  %v1057_v19 = vadd.f32 %v1049_v25, %v978_v7  ;;  %v7401_v42 = vmul.f32 %v7159_v18, %v9047_v17  ;;  %v1199_v58 = vmul.f32 %v6689_v48, %v7381_v15  ;;  %v9102_v7 = vld [vmem:[#allocation44_spill] sm:$0xff] }
 0x1ba   : > { %v1502_v8 = vmul.f32 %v9094_v5, %v1435_v14  ;;  %v1078_v34 = vadd.f32 %v1070_v32, %v999_v57  ;;  %v1141_v56 = vmul.f32 %v6657_v23, %v7119_v16  ;;  %v1335_v62 = vmul.f32 %v9095_v13, %v7209_v24  ;;  %v9103_v25 = vld [vmem:[#allocation12_spill] sm:$0xff] }
 0x1bb   : > { %5103 = vmatmul.mubr.msk.f32.gmra.mrb[8].mxu0 %vm533_vm0, %v1486_v3  ;;  %v1128_v11 = vadd.f32 %v1120_v60, %v1057_v19  ;;  %v7413_v21 = vmul.f32 %v9098_v27, %v7173_v49  ;;  %v634_v17 = vadd.f32 1e-05, %v625_v61  ;;  %v1220_v23 = vmul.f32 %v6696_v44, %v7381_v15  ;;  %v9100_v44 = vld [vmem:[#allocation5_spill] sm:$0xff]  ;;  %v9104_v61 = vld [vmem:[#allocation19_spill] sm:$0xff] }
 0x1bc   : > { %v1518_v18 = vadd.f32 %v9097_v63, %v1502_v8  ;;  %5105 = vmatprep.mubr.msk.f32.mxu0 %vm6205_vm2, %v9099_v29  ;;  %v1149_v48 = vadd.f32 %v1141_v56, %v1078_v34  ;;  %v1336_v6 = vmul.f32 %v9095_v13, %v7252_v22  ;;  %v1271_v45 = vmul.f32 %v9091_v2, %v7401_v42  ;;  %v9101_v2 = vld [vmem:[#allocation43_spill] sm:$0xff]  ;;  %v9106_v8 = vld [vmem:[#allocation20_spill] sm:$0xff] }
 0x1bd   : > { %v1207_v54 = vadd.f32 %v1199_v58, %v1128_v11  ;;  %v1292_v49 = vmul.f32 %v6720_v35, %v7401_v42  ;;  %5999 = vrsqrt.f32 %v634_v17  ;;  %v1357_v52 = vmul.f32 %v6742_v28, %v7252_v22  ;;  %v9105_v3 = vld [vmem:[#allocation31_spill] sm:$0xff] }
 0x1be   : > { %5138 = vmatmul.mubr.msk.f32.gmra.mrb[8].mxu1 %vm533_vm0, %v1518_v18  ;;  %v1228_v27 = vadd.f32 %v1220_v23, %v1149_v48  ;;  %v1344_v40 = vadd.f32 %v1336_v6, %v7334_v9  ;;  %v1316_v26 = vadd.f32 %v7167_v1, %v9100_v44  ;;  %v1345_v0 = vadd.f32 %v9101_v2, %v1281_v20  ;;  %v7445_v1 = vld [vmem:[%s8894_s4 + $0x20] ss:$0 sm:$0xff]  ;;  %v9108_v18 = vld [vmem:[#allocation16_spill] sm:$0xff] }
 0x1bf   : > { %5140 = vmatprep.mubr.msk.f32.mxu1 %vm6205_vm2, %v9099_v29  ;;  %v1279_v13 = vadd.f32 %v1271_v45, %v1207_v54  ;;  %v1366_v35 = vadd.f32 %v9102_v7, %v1302_v39  ;;  %v1095_v14 = vadd.f32 %v9104_v61, %v9103_v25  ;;  %v1356_v9 = vmul.f32 %v6742_v28, %v7209_v24  ;;  %v9107_v56 = vld [vmem:[#allocation47_spill] sm:$0xff]  ;;  %v9109_v23 = vld [vmem:[#allocation4_spill] sm:$0xff]  ;;  %v9117_v61 = vld [vmem:[#allocation50_spill] sm:$0xff] }
 0x1c0   : > { %v1300_v57 = vadd.f32 %v1292_v49, %v1228_v27  ;;  %v1365_v32 = vadd.f32 %v1357_v52, %v7339_v36  ;;  %v1380_v19 = vadd.f32 %v9105_v3, %v1316_v26  ;;  %v815_v20 = vmul.f32 %v7445_v1, %v7216_v47  ;;  %v9111_v45 = vld [vmem:[#allocation3_spill] sm:$0xff]  ;;  %v9112_v49 = vld [vmem:[#allocation49_spill] sm:$0xff] }
 0x1c1   : > { %v1343_v39 = vadd.f32 %v1335_v62, %v1279_v13  ;;  %v1407_v60 = vmul.f32 %v6735_v10, %v7413_v21  ;;  %v1166_v58 = vadd.f32 %v9106_v8, %v1095_v14  ;;  %v1428_v28 = vmul.f32 %v6757_v55, %v7413_v21  ;;  %v9110_v62 = vld [vmem:[#allocation22_spill] sm:$0xff]  ;;  %v9113_v52 = vld [vmem:[#allocation35_spill] sm:$0xff]  ;;  %v9115_v13 = vld [vmem:[#allocation17_spill] sm:$0xff] }
 0x1c2   : > { %v1364_v34 = vadd.f32 %v1356_v9, %v1300_v57  ;;  %v1416_v36 = vadd.f32 %v7303_v41, %v1344_v40  ;;  %v7456_v11 = vadd.f32 %v9107_v56, %v1380_v19  ;;  %v1417_v48 = vadd.f32 %v9108_v18, %v1345_v0  ;;  %v9114_v40 = vld [vmem:[#allocation23_spill] sm:$0xff]  ;;  %v9116_v0 = vld [vmem:[#allocation36_spill] sm:$0xff]  ;;  %v9118_v3 = vld [vmem:[#allocation25_spill] sm:$0xff] }
 0x1c3   : > { %v1415_v17 = vadd.f32 %v1407_v60, %v1343_v39  ;;  %v1438_v47 = vadd.f32 %v9109_v23, %v1366_v35  ;;  %v1245_v6 = vadd.f32 %v9110_v62, %v1166_v58  ;;  %v1437_v10 = vadd.f32 %v7313_v31, %v1365_v32  ;;  %v6182_v26 = vld [vmem:[%s8894_s4 + $0x21] ss:$0 sm:$0xff]  ;;  %v9119_v58 = vld [vmem:[#allocation8_spill] sm:$0xff] }
 0x1c4   : > { %v1436_v54 = vadd.f32 %v1428_v28, %v1364_v34  ;;  %v1017_v27 = vadd.f32 %v9112_v49, %v9111_v45  ;;  %v811_v55 = vmul.f32 %v7445_v1, %v9113_v52  ;;  %v882_v2 = vmul.f32 %v6182_v26, %v9115_v13  ;;  %v9123_v23 = vld [vmem:[#allocation52_spill] sm:$0xff]  ;;  %v9126_v49 = vld [vmem:[#allocation42_spill] sm:$0xff] }
 0x1c5   : > { %v1472_v41 = vmul.f32 %v9093_v51, %v1415_v17  ;;  %v1317_v44 = vadd.f32 %v9114_v40, %v1245_v6  ;;  %v1010_v7 = vmul.f32 %v6965_v46, %v9116_v0  ;;  %v894_v31 = vadd.f32 %v7274_v43, %v815_v20  ;;  %v9120_v20 = vld [vmem:[#allocation51_spill] sm:$0xff]  ;;  %v9124_v6 = vld [vmem:[#allocation33_spill] sm:$0xff] }
 0x1c6   : > { %v1503_v35 = vmul.f32 %v9094_v5, %v1436_v54  ;;  %v1473_v25 = vmul.f32 %v9093_v51, %v1416_v36  ;;  %v1096_v14 = vadd.f32 %v9117_v61, %v1017_v27  ;;  %v1474_v32 = vmul.f32 %v9093_v51, %v1417_v48  ;;  %v9121_v36 = vld [vmem:[#allocation28_spill] sm:$0xff]  ;;  %v9122_v51 = vld [vmem:[#allocation37_spill] sm:$0xff]  ;;  %v9125_v54 = vld [vmem:[#allocation38_spill] sm:$0xff] }
 0x1c7   : > { %v6000_v57 = vpop.eup %5999  ;;  %v1487_v9 = vadd.f32 %v9096_v30, %v1472_v41  ;;  %v1381_v19 = vadd.f32 %v9118_v3, %v1317_v44  ;;  %v890_v39 = vadd.f32 %v882_v2, %v811_v55  ;;  %v1504_v8 = vmul.f32 %v9094_v5, %v1437_v10  ;;  %v9127_v55 = vld [vmem:[#allocation58_spill] sm:$0xff]  ;;  %v9128_v44 = vld [vmem:[#allocation53_spill] sm:$0xff] }
 0x1c8   : > { %v1519_v60 = vadd.f32 %v9097_v63, %v1503_v35  ;;  %v652_v43 = vmul.f32 %v6000_v57, %v9119_v58  ;;  %v1167_v34 = vadd.f32 %v9120_v20, %v1096_v14  ;;  %v1505_v28 = vmul.f32 %v9094_v5, %v1438_v47  ;;  %v6183_v5 = vld [vmem:[%s8892_s2] ss:$0 sm:$0xff]  ;;  %v9129_v2 = vld [vmem:[#allocation34_spill] sm:$0xff]  ;;  %v9130_v0 = vld [vmem:[#allocation41_spill] sm:$0xff] }
 0x1c9   : > { %5106 = vmatmul.mubr.msk.f32.gmra.mrb[10].mxu0 %vm533_vm0, %v1487_v9  ;;  %v7488_v56 = vadd.f32 %v9121_v36, %v1381_v19  ;;  %v1018_v17 = vadd.f32 %v1010_v7, %v890_v39  ;;  %v1089_v18 = vmul.f32 %v6982_v53, %v9122_v51  ;;  %v1488_v48 = vadd.f32 %v9096_v30, %v1473_v25  ;;  %v9131_v14 = vld [vmem:[#allocation6_spill] sm:$0xff]  ;;  %v7533_v39 = vld [vmem:[%s8895_s5 + $0x2] ss:$0 sm:$0xff] }
 0x1ca   : > { %5141 = vmatmul.mubr.msk.f32.gmra.mrb[10].mxu1 %vm533_vm0, %v1519_v60  ;;  %5108 = vmatprep.mubr.msk.f32.mxu0 %vm6205_vm2, %v9099_v29  ;;  %v1246_v62 = vadd.f32 %v9123_v23, %v1167_v34  ;;  %v1160_v10 = vmul.f32 %v9125_v54, %v9124_v6  ;;  %v667_v47 = vmul.f32 %v6183_v5, %v652_v43  ;;  %v9132_v3 = vld [vmem:[#allocation54_spill] sm:$0xff]  ;;  %v9133_v60 = vld [vmem:[#allocation40_spill] sm:$0xff]  ;;  %v9136_v20 = vld [vmem:[#allocation7_spill] sm:$0xff] }
 0x1cb   : > { %5143 = vmatprep.mubr.msk.f32.mxu1 %vm6205_vm2, %v9099_v29  ;;  %v1097_v45 = vadd.f32 %v1089_v18, %v1018_v17  ;;  %v812_v27 = vmul.f32 %v7445_v1, %v9126_v49  ;;  %v883_v52 = vmul.f32 %v6182_v26, %v9124_v6  ;;  %v1100_v41 = vadd.f32 %v9127_v55, %v7276_v37  ;;  %v9139_v6 = vld [vmem:[#allocation46_spill] sm:$0xff] }
 0x1cc   : > { %v1520_v40 = vadd.f32 %v9097_v63, %v1504_v8  ;;  %v1318_v13 = vadd.f32 %v9128_v44, %v1246_v62  ;;  %v1446_v7 = vmul.f32 %v9130_v0, %v9129_v2  ;;  %v1022_v35 = vadd.f32 %v7286_v50, %v894_v31  ;;  %v6184_v50 = vld [vmem:[%s8893_s3] ss:$0 sm:$0xff]  ;;  %v9135_v8 = vld [vmem:[#allocation48_spill] sm:$0xff] }
 0x1cd   : > { %5109 = vmatmul.mubr.msk.f32.gmra.mrb[12].mxu0 %vm533_vm0, %v1488_v48  ;;  %v1168_v25 = vadd.f32 %v1160_v10, %v1097_v45  ;;  %v891_v61 = vadd.f32 %v883_v52, %v812_v27  ;;  %v1011_v57 = vmul.f32 %v6965_v46, %v9131_v14  ;;  %v1489_v37 = vadd.f32 %v9096_v30, %v1474_v32  ;;  %v9134_v30 = vld [vmem:[#allocation14_spill] sm:$0xff]  ;;  %v9140_v10 = vld [vmem:[#allocation24_spill] sm:$0xff] }
 0x1ce   : > { %5144 = vmatmul.mubr.msk.f32.gmra.mrb[12].mxu1 %vm533_vm0, %v1520_v40  ;;  %5111 = vmatprep.mubr.msk.f32.mxu0 %vm6205_vm2, %v9099_v29  ;;  %v1521_v9 = vadd.f32 %v9097_v63, %v1505_v28  ;;  %v1382_v19 = vadd.f32 %v9132_v3, %v1318_v13  ;;  %v7528_v31 = vadd.f32 %v6184_v50, %v667_v47  ;;  %v9137_v28 = vld [vmem:[#allocation45_spill] sm:$0xff]  ;;  %v9141_v13 = vld [vmem:[#allocation18_spill] sm:$0xff] }
 0x1cf   : > { %5146 = vmatprep.mubr.msk.f32.mxu1 %vm6205_vm2, %v9099_v29  ;;  %v1239_v32 = vmul.f32 %v9134_v30, %v9133_v60  ;;  %v1019_v63 = vadd.f32 %v1011_v57, %v891_v61  ;;  %v1090_v58 = vmul.f32 %v6982_v53, %v9135_v8  ;;  %v813_v34 = vmul.f32 %v7445_v1, %v9136_v20  ;;  %v9138_v1 = vld [vmem:[#allocation55_spill] sm:$0xff]  ;;  %v9143_v61 = vld [vmem:[#allocation57_spill] sm:$0xff]  ;;  %v9144_v8 = vld [vmem:[#allocation56_spill] sm:$0xff] }
 0x1d0   : > { %v1454_v43 = vadd.f32 %v1446_v7, %v1382_v19  ;;  %v884_v36 = vmul.f32 %v6182_v26, %v9137_v28  ;;  %v1012_v17 = vmul.f32 %v6965_v46, %v7369_v4  ;;  %v1161_v48 = vmul.f32 %v9125_v54, %v9137_v28  ;;  %v9142_v7 = vld [vmem:[#allocation11_spill] sm:$0xff]  ;;  %v9145_v20 = vld [vmem:[#allocation60_spill] sm:$0xff] }
 0x1d1   : > { %5112 = vmatmul.mubr.msk.f32.gmra.mrb[14].mxu0 %vm533_vm0, %v1489_v37  ;;  %v1247_v51 = vadd.f32 %v1239_v32, %v1168_v25  ;;  %v1098_v18 = vadd.f32 %v1090_v58, %v1019_v63  ;;  %v1240_v23 = vmul.f32 %v9134_v30, %v7306_v12  ;;  %v1163_v62 = vmul.f32 %v9125_v54, %v7209_v24  ;;  %v7563_v12 = vld [vmem:[%s8896_s6 + $0x2] ss:$0 sm:$0xff] }
 0x1d2   : > { %5147 = vmatmul.mubr.msk.f32.gmra.mrb[14].mxu1 %vm533_vm0, %v1521_v9  ;;  %5114 = vmatprep.mubr.msk.f32.mxu0 %vm6205_vm2, %v9099_v29  ;;  %v1530_v46 = vmul.f32 %v7533_v39, %v7456_v11  ;;  %v892_v4 = vadd.f32 %v884_v36, %v813_v34  ;;  %v1093_v26 = vmul.f32 %v6982_v53, %v9138_v1 }
 0x1d3   : > { %5149 = vmatprep.mubr.msk.f32.mxu1 %vm6205_vm2, %v9099_v29  ;;  %v1311_v5 = vmul.f32 %v9140_v10, %v9139_v6  ;;  %v1169_v47 = vadd.f32 %v1161_v48, %v1098_v18  ;;  %v1171_v45 = vadd.f32 %v1163_v62, %v1100_v41  ;;  %v1091_v11 = vmul.f32 %v6982_v53, %v7364_v38  ;;  %v9146_v48 = vld [vmem:[#allocation9_spill] sm:$0xff] }
 0x1d4   : > { %v1020_v49 = vadd.f32 %v1012_v17, %v892_v4  ;;  %v1101_v27 = vadd.f32 %v1093_v26, %v1022_v35  ;;  %v1312_v40 = vmul.f32 %v9140_v10, %v7332_v33  ;;  %v1546_v41 = vadd.f32 %v7563_v12, %v1530_v46  ;;  %v9147_v46 = vld [vmem:[#allocation39_spill] sm:$0xff] }
 0x1d5   : > { %5115 = vmatmul.mubr.msk.f32.gmra.mrb[16].mxu0 %vm533_vm0, %v7528_v31  ;;  %v1319_v52 = vadd.f32 %v1311_v5, %v1247_v51  ;;  %v1248_v55 = vadd.f32 %v1240_v23, %v1169_v47  ;;  %v1162_v53 = vmul.f32 %v9125_v54, %v7119_v16  ;;  %v1531_v38 = vmul.f32 %v7533_v39, %v7488_v56  ;;  %v9148_v5 = vld [vmem:[#allocation59_spill] sm:$0xff] }
 0x1d6   : > { %5150 = vmatmul.mubr.msk.f32.gmra.mrb[16].mxu1 %vm533_vm0, %v7528_v31  ;;  %5160 = vmatprep.mubr.msk.f32.mxu0 %vm6205_vm2, %v9099_v29  ;;  %v1099_v44 = vadd.f32 %v1091_v11, %v1020_v49  ;;  %v1375_v2 = vmul.f32 %v9141_v13, %v9137_v28  ;;  %v1447_v33 = vmul.f32 %v9130_v0, %v9142_v7  ;;  %v9149_v11 = vld [vmem:[#allocation13_spill] sm:$0xff] }
 0x1d7   : > { %v1320_v35 = vadd.f32 %v1312_v40, %v1248_v55  ;;  %5205 = vmatprep.mubr.msk.f32.mxu1 %vm6205_vm2, %v9099_v29  ;;  %v1164_v25 = vmul.f32 %v9125_v54, %v7252_v22  ;;  %v1242_v14 = vmul.f32 %v9134_v30, %v9143_v61  ;;  %v1241_v56 = vmul.f32 %v9134_v30, %v7381_v15 }
 0x1d8   : > { %v1170_v57 = vadd.f32 %v1162_v53, %v1099_v44  ;;  %v1383_v37 = vadd.f32 %v1375_v2, %v1319_v52  ;;  %v1376_v9 = vmul.f32 %v9141_v13, %v7119_v16  ;;  %v1313_v54 = vmul.f32 %v9140_v10, %v7401_v42 }
 0x1d9   : > { %5161 = vmatmul.mubr.msk.f32.vlgmr.msra.gmra.mrb[18].mxu0 %vm533_vm0, %v1546_v41  ;;  %v1250_v3 = vadd.f32 %v1242_v14, %v1171_v45  ;;  %v1172_v19 = vadd.f32 %v1164_v25, %v1101_v27  ;;  %v1547_v60 = vadd.f32 %v7563_v12, %v1531_v38  ;;  %v1532_v32 = vmul.f32 %v7533_v39, %v1454_v43 }
 0x1da   : > { %5163 = vmatprep.mubr.msk.f32.mxu0 %vm6205_vm2, %v9099_v29  ;;  %v1249_v50 = vadd.f32 %v1241_v56, %v1170_v57  ;;  %v1455_v15 = vadd.f32 %v1447_v33, %v1383_v37  ;;  %v1384_v63 = vadd.f32 %v1376_v9, %v1320_v35  ;;  %v1243_v58 = vmul.f32 %v9134_v30, %v9144_v8 }
 0x1db   : > { %v1314_v16 = vmul.f32 %v9140_v10, %v9145_v20  ;;  %v1448_v28 = vmul.f32 %v9130_v0, %v7349_v59  ;;  %v1377_v42 = vmul.f32 %v9141_v13, %v7209_v24  ;;  %v1548_v43 = vadd.f32 %v7563_v12, %v1532_v32 }
 0x1dc   : > { %v1321_v34 = vadd.f32 %v1313_v54, %v1249_v50  ;;  %v1251_v17 = vadd.f32 %v1243_v58, %v1172_v19  ;;  %v1533_v30 = vmul.f32 %v7533_v39, %v1455_v15  ;;  %v1315_v23 = vmul.f32 %v9140_v10, %v9146_v48 }
 0x1dd   : > { %5164 = vmatmul.mubr.msk.f32.gmra.mrb[20].mxu0 %vm533_vm0, %v1547_v60  ;;  %v1322_v36 = vadd.f32 %v1314_v16, %v1250_v3  ;;  %v1456_v51 = vadd.f32 %v1448_v28, %v1384_v63  ;;  %v1449_v59 = vmul.f32 %v9130_v0, %v7413_v21  ;;  %v1378_v24 = vmul.f32 %v9141_v13, %v7252_v22 }
 0x1de   : > { %5166 = vmatprep.mubr.msk.f32.mxu0 %vm6205_vm2, %v9099_v29  ;;  %v1385_v18 = vadd.f32 %v1377_v42, %v1321_v34  ;;  %v1323_v62 = vadd.f32 %v1315_v23, %v1251_v17  ;;  %v1379_v4 = vmul.f32 %v9141_v13, %v9147_v46  ;;  %v1549_v1 = vadd.f32 %v7563_v12, %v1533_v30 }
 0x1df   : > { %v1534_v26 = vmul.f32 %v7533_v39, %v1456_v51  ;;  %v1386_v10 = vadd.f32 %v1378_v24, %v1322_v36  ;;  %v1450_v47 = vmul.f32 %v9130_v0, %v9148_v5  ;;  %v1451_v27 = vmul.f32 %v9130_v0, %v9149_v11 }
 0x1e0   : > { %v1457_v6 = vadd.f32 %v1449_v59, %v1385_v18  ;;  %v1387_v49 = vadd.f32 %v1379_v4, %v1323_v62  ;;  %v9152_v61 = vmov 0.0|0.0  }
 0x1e1   : > { %5167 = vmatmul.mubr.msk.f32.gmra.mrb[22].mxu0 %vm533_vm0, %v1548_v43  ;;  %v1550_v22 = vadd.f32 %v7563_v12, %v1534_v26  ;;  %v1458_v45 = vadd.f32 %v1450_v47, %v1386_v10 }
 0x1e2   : > { %5169 = vmatprep.mubr.msk.f32.mxu0 %vm6205_vm2, %v9099_v29  ;;  %v1535_v21 = vmul.f32 %v7533_v39, %v1457_v6  ;;  %v1459_v40 = vadd.f32 %v1451_v27, %v1387_v49 }
 0x1e3   : > { %v1536_v55 = vmul.f32 %v7533_v39, %v1458_v45 }
 0x1e4   : > { %v1551_v52 = vadd.f32 %v7563_v12, %v1535_v21  ;;  %v1537_v44 = vmul.f32 %v7533_v39, %v1459_v40 }
 0x1e5   : > { %5170 = vmatmul.mubr.msk.f32.gmra.mrb[24].mxu0 %vm533_vm0, %v1549_v1  ;;  %v1552_v41 = vadd.f32 %v7563_v12, %v1536_v55 }
 0x1e6   : > { %5172 = vmatprep.mubr.msk.f32.mxu0 %vm6205_vm2, %v9099_v29  ;;  %v1553_v0 = vadd.f32 %v7563_v12, %v1537_v44 }
 0x1e9   : > { %5173 = vmatmul.mubr.msk.f32.gmra.mrb[26].mxu0 %vm533_vm0, %v1550_v22 }
 0x1ea   : > { %5175 = vmatprep.mubr.msk.f32.mxu0 %vm6205_vm2, %v9099_v29 }
 0x1ed   : > { %5176 = vmatmul.mubr.msk.f32.gmra.mrb[28].mxu0 %vm533_vm0, %v1551_v52 }
 0x1ee   : > { %5178 = vmatprep.mubr.msk.f32.mxu0 %vm6205_vm2, %v9099_v29 }
 0x1f1   : > { %5179 = vmatmul.mubr.msk.f32.gmra.mrb[30].mxu0 %vm533_vm0, %v1552_v41 }
 0x1f2   : > { %5181 = vmatprep.mubr.msk.f32.mxu0 %vm6205_vm2, %v9099_v29 }
 0x1f5   : > { %5182 = vmatmul.mubr.msk.f32.gmra.mrb[32].mxu0 %vm533_vm0, %v1553_v0 }
 0x1f6   : > { %5184 = vmatprep.mubr.msk.f32.mxu0 %vm6205_vm2, %v9099_v29 }
 0x1f9   : > { %5185 = vmatmul.mubr.msk.f32.gmra.mrb[34].mxu0 %vm533_vm0, %v7528_v31 }
 0x1fa   : > { %5250 = vmatprep.mubr.msk.f32.mxu0 %vm6205_vm2, %v9099_v29 }
 0x240   : > { %v7659_v53 = vpop.f32.mrb[0].mxu0  ;;  %v1790_v39 = vpop.f32.mrb[0].mxu1 }
 0x241   : > { %v5092_v38 = vpop.f32.mrb[1].mxu0  ;;  %v5127_v13 = vpop.f32.mrb[1].mxu1 }
 0x24a   : > { %v7661_v2 = vpop.f32.mrb[2].mxu0 }
 0x24b   : > { %v5095_v12 = vpop.f32.mrb[3].mxu0  ;;  %v1795_v7 = vpop.f32.mrb[2].mxu1 }
 0x24c   : > { %v5695_v31 = vpack.c.bf16 %v1795_v7, %v1790_v39  ;;  %v5130_v35 = vpop.f32.mrb[3].mxu1  ;;  %v7669_v25 = vpack.i.bf16 %v1795_v7, %v1790_v39 }
 0x24e   : > { %5864 = vrot.lane.b32.xlu1 %v7669_v25, %s6206_s30  ;;  %5697 = vmatpush3.bf16.xpose.msk.msra.mxu1 %vm7665_vm4, %v5695_v31 }
 0x24f   : > { %5698 = vmatprep.subr.bf16.mxu1 %v9152_v61 }
 0x254   : > { %v7676_v14 = vpop.f32.mrb[4].mxu0 }
 0x255   : > { %v5098_v57 = vpop.f32.mrb[5].mxu0 }
 0x258   : > { %v1800_v56 = vpop.f32.mrb[4].mxu1 }
 0x259   : > { %v5133_v37 = vpop.f32.mrb[5].mxu1 }
 0x287   : > { %v7678_v9 = vpop.f32.mrb[6].mxu0  ;;  %v1805_v3 = vpop.f32.mrb[6].mxu1 }
 0x288   : > { %v5699_v19 = vpack.c.bf16 %v1805_v3, %v1800_v56  ;;  %v5101_v50 = vpop.f32.mrb[7].mxu0  ;;  %v5136_v54 = vpop.f32.mrb[7].mxu1  ;;  %v5888_v60 = vpack.i.bf16 %v1805_v3, %v1800_v56 }
 0x28a   : > { %5889 = vrot.lane.b32.xlu0 %v5888_v60, %s6207_s0  ;;  %5869 = vrot.lane.b32.xlu1 %v5888_v60, %s6206_s30 }
 0x28b   : > { %5701 = vmatpush3.bf16.xpose.msk.msra.mxu1 %vm7665_vm4, %v5699_v19 }
 0x28c   : > { %5702 = vmatprep.subr.bf16.mxu1 %v9152_v61 }
 0x28e   : > { %v7685_v32 = vpop.f32.mrb[8].mxu0 }
 0x28f   : > { %v5104_v15 = vpop.f32.mrb[9].mxu0 }
 0x291   : > { %v1810_v63 = vpop.f32.mrb[8].mxu1 }
 0x292   : > { %v5139_v8 = vpop.f32.mrb[9].mxu1 }
 0x29c   : > { %v7687_v58 = vpop.f32.mrb[10].mxu0 }
 0x29d   : > { %v1815_v20 = vpop.f32.mrb[10].mxu1  ;;  %v5107_v16 = vpop.f32.mrb[11].mxu0 }
 0x29e   : > { %v5703_v34 = vpack.c.bf16 %v1815_v20, %v1810_v63  ;;  %v5142_v28 = vpop.f32.mrb[11].mxu1  ;;  %v7689_v42 = vpack.i.bf16 %v1815_v20, %v1810_v63 }
 0x2a0   : > { %5874 = vrot.lane.b32.xlu1 %v7689_v42, %s6206_s30  ;;  %5705 = vmatpush3.bf16.xpose.msk.msra.mxu1 %vm7665_vm4, %v5703_v34  ;;  %v7695_v36 = vpop.f32.mrb[12].mxu0 }
 0x2a1   : > { %v1820_v17 = vpop.f32.mrb[12].mxu1  ;;  %v5110_v43 = vpop.f32.mrb[13].mxu0  ;;  %5706 = vmatprep.subr.bf16.mxu1 %v9152_v61 }
 0x2a2   : > { %v5145_v30 = vpop.f32.mrb[13].mxu1 }
 0x2a4   : > { %v7698_v51 = vpop.f32.mrb[14].mxu0 }
 0x2a5   : > { %v1825_v18 = vpop.f32.mrb[14].mxu1  ;;  %v5113_v48 = vpop.f32.mrb[15].mxu0 }
 0x2a6   : > { %v5707_v23 = vpack.c.bf16 %v1825_v18, %v1820_v17  ;;  %v5148_v59 = vpop.f32.mrb[15].mxu1  ;;  %v5898_v24 = vpack.i.bf16 %v1825_v18, %v1820_v17 }
 0x2a8   : > { %5899 = vrot.lane.b32.xlu0 %v5898_v24, %s6207_s0  ;;  %5879 = vrot.lane.b32.xlu1 %v5898_v24, %s6206_s30  ;;  %v7702_v62 = vpop.f32.mrb[16].mxu0 }
 0x2a9   : > { %5709 = vmatpush3.bf16.xpose.msk.msra.mxu1 %vm7665_vm4, %v5707_v23  ;;  %v7706_v46 = vpop.f32.mrb[16].mxu1  ;;  %v5116_v4 = vpop.f32.mrb[17].mxu0 }
 0x2aa   : > { %5203 = vmatprep.subr.mxu1 %v9099_v29  ;;  %v5151_v1 = vpop.f32.mrb[17].mxu1 }
 0x2ac   : > { %5884 = vrot.lane.b32.xlu1 %v7669_v25, %s6207_s0  ;;  %2394 = vrot.lane.b32.xlu0 %v7698_v51, %s6206_s30  ;;  %v1929_v26 = vpop.f32.mrb[18].mxu0 }
 0x2ad   : > { %v5162_v6 = vpop.f32.mrb[19].mxu0 }
 0x2b0   : > { %2380 = vrot.lane.b32.xlu1 %v7659_v53, %s6206_s30  ;;  %2868 = vrot.lane.b32.xlu0 %v7706_v46, %s6207_s0  ;;  %v1934_v10 = vpop.f32.mrb[20].mxu0 }
 0x2b1   : > { %5204 = vmatpush3.xpose.msk.msra.mxu1 %vm1973_vm3, %v7706_v46  ;;  %v5711_v5 = vpack.c.bf16 %v1934_v10, %v1929_v26  ;;  %v5165_v47 = vpop.f32.mrb[21].mxu0  ;;  %v7719_v22 = vpack.i.bf16 %v1934_v10, %v1929_v26 }
 0x2b2   : > { %5722 = vmatprep.subr.bf16.mxu1 %v9152_v61 }
 0x2b3   : > { %5712 = vmatpush3.bf16.msra.mxu0 %v5711_v5 }
 0x2b4   : > { %2414 = vrot.lane.b32.xlu1 %v7706_v46, %s6206_s30  ;;  %5206 = vmatmul.mubr.msk.f32.vlgmr.msra.gmra.mrb[18].mxu1 %vm1973_vm3, %v7659_v53  ;;  %v1939_v21 = vpop.f32.mrb[22].mxu0 }
 0x2b5   : > { %2834 = vrot.lane.b32.xlu0 %v7659_v53, %s6207_s0  ;;  %5208 = vmatprep.mubr.msk.f32.mxu1 %vm6205_vm2, %v9099_v29  ;;  %v5168_v45 = vpop.f32.mrb[23].mxu0 }
 0x2b6   : > { %5713 = vmatprep.subr.bf16.mxu0 %v9152_v61 }
 0x2b8   : > { %2382 = vrot.lane.b32.xlu1 %v7661_v2, %s6206_s30  ;;  %5209 = vmatmul.mubr.msk.f32.gmra.mrb[20].mxu1 %vm1973_vm3, %v7661_v2  ;;  %v1944_v49 = vpop.f32.mrb[24].mxu0 }
 0x2b9   : > { %5909 = vrot.lane.b32.xlu0 %v5888_v60, %s6208_s17  ;;  %5211 = vmatprep.mubr.msk.f32.mxu1 %vm6205_vm2, %v9099_v29  ;;  %v7738_v11 = vpack.i.bf16 %v1944_v49, %v1939_v21  ;;  %v5714_v27 = vpack.c.bf16 %v1944_v49, %v1939_v21  ;;  %v5171_v52 = vpop.f32.mrb[25].mxu0 }
 0x2bb   : > { %5715 = vmatpush3.bf16.msra.mxu0 %v5714_v27 }
 0x2bc   : > { %2384 = vrot.lane.b32.xlu1 %v7676_v14, %s6206_s30  ;;  %5212 = vmatmul.mubr.msk.f32.gmra.mrb[22].mxu1 %vm1973_vm3, %v7676_v14  ;;  %v1949_v55 = vpop.f32.mrb[26].mxu0 }
 0x2bd   : > { %2840 = vrot.lane.b32.xlu0 %v7678_v9, %s6207_s0  ;;  %5214 = vmatprep.mubr.msk.f32.mxu1 %vm6205_vm2, %v9099_v29  ;;  %v5174_v40 = vpop.f32.mrb[27].mxu0 }
 0x2be   : > { %5716 = vmatprep.subr.bf16.mxu0 %v9152_v61 }
 0x2c0   : > { %2386 = vrot.lane.b32.xlu1 %v7678_v9, %s6206_s30  ;;  %5215 = vmatmul.mubr.msk.f32.gmra.mrb[24].mxu1 %vm1973_vm3, %v7678_v9  ;;  %v1954_v41 = vpop.f32.mrb[28].mxu0  ;;  %v5865_v38 = vpop.permute.xlu1 %5864 }
 0x2c1   : > { %2842 = vrot.lane.b32.xlu0 %v7685_v32, %s6207_s0  ;;  %5217 = vmatprep.mubr.msk.f32.mxu1 %vm6205_vm2, %v9099_v29  ;;  %v7757_v44 = vpack.i.bf16 %v1954_v41, %v1949_v55  ;;  %v5717_v0 = vpack.c.bf16 %v1954_v41, %v1949_v55  ;;  %v5177_v39 = vpop.f32.mrb[29].mxu0  ;;  %v5867_v13 = vunpack.i.h.bf16 %v5865_v38  ;;  %v5866_v12 = vunpack.i.l.bf16 %v5865_v38 }
 0x2c3   : > { %5718 = vmatpush3.bf16.msra.mxu0 %v5717_v0  ;;  %v5723_v35 = vpack.c.bf16 %v5867_v13, %v5866_v12 }
 0x2c4   : > { %5894 = vrot.lane.b32.xlu1 %v7689_v42, %s6207_s0  ;;  %5218 = vmatmul.mubr.msk.f32.gmra.mrb[26].mxu1 %vm1973_vm3, %v7685_v32  ;;  %v1959_v7 = vpop.f32.mrb[30].mxu0 }
 0x2c5   : > { %5919 = vrot.lane.b32.xlu0 %v5898_v24, %s6208_s17  ;;  %5220 = vmatprep.mubr.msk.f32.mxu1 %vm6205_vm2, %v9099_v29  ;;  %v5180_v31 = vpop.f32.mrb[31].mxu0 }
 0x2c6   : > { %5719 = vmatprep.subr.bf16.mxu0 %v9152_v61  ;;  %5725 = vmatpush3.bf16.xpose.msk.msra.mxu1 %vm7665_vm4, %v5723_v35 }
 0x2c7   : > { %5726 = vmatprep.subr.bf16.mxu1 %v9152_v61 }
 0x2c8   : > { %2388 = vrot.lane.b32.xlu1 %v7685_v32, %s6206_s30  ;;  %5221 = vmatmul.mubr.msk.f32.gmra.mrb[28].mxu1 %vm1973_vm3, %v7687_v58  ;;  %v1964_v57 = vpop.f32.mrb[32].mxu0 }
 0x2c9   : > { %2848 = vrot.lane.b32.xlu0 %v7698_v51, %s6207_s0  ;;  %5223 = vmatprep.mubr.msk.f32.mxu1 %vm6205_vm2, %v9099_v29  ;;  %v7777_v56 = vpack.i.bf16 %v1964_v57, %v1959_v7  ;;  %v5183_v37 = vpop.f32.mrb[33].mxu0  ;;  %v5720_v3 = vpack.c.bf16 %v1964_v57, %v1959_v7 }
 0x2cb   : > { %5721 = vmatpush3.bf16.msra.mxu0 %v5720_v3 }
 0x2cc   : > { %2390 = vrot.lane.b32.xlu1 %v7687_v58, %s6206_s30  ;;  %5224 = vmatmul.mubr.msk.f32.gmra.mrb[30].mxu1 %vm1973_vm3, %v7695_v36  ;;  %v7784_v19 = vpop.f32.mrb[34].mxu0 }
 0x2cd   : > { %3314 = vrot.lane.b32.xlu0 %v7706_v46, %s6208_s17  ;;  %5226 = vmatprep.mubr.msk.f32.mxu1 %vm6205_vm2, %v9099_v29  ;;  %v5186_v50 = vpop.f32.mrb[35].mxu0 }
 0x2ce   : > { %5248 = vmatprep.subr.mxu0 %v9099_v29 }
 0x2cf   : > { %5249 = vmatpush3.msk.msra.mxu0 %vm2248_vm5, %v7784_v19 }
 0x2d0   : > { %2392 = vrot.lane.b32.xlu1 %v7695_v36, %s6206_s30  ;;  %5227 = vmatmul.mubr.msk.f32.gmra.mrb[32].mxu1 %vm1973_vm3, %v7698_v51 }
 0x2d1   : > { %3282 = vrot.lane.b32.xlu0 %v7661_v2, %s6208_s17  ;;  %5229 = vmatprep.mubr.msk.f32.mxu1 %vm6205_vm2, %v9099_v29 }
 0x2d2   : > { %5738 = vmatprep.subr.bf16.mxu0 %v9152_v61 }
 0x2d4   : > { %2396 = vrot.lane.b32.xlu1 %v7702_v62, %s6206_s30  ;;  %5230 = vmatmul.mubr.msk.f32.gmra.mrb[34].mxu1 %vm1973_vm3, %v7702_v62 }
 0x2d5   : > { %3286 = vrot.lane.b32.xlu0 %v7678_v9, %s6208_s17  ;;  %5295 = vmatprep.mubr.msk.f32.mxu1 %vm6205_vm2, %v9099_v29 }
 0x2d8   : > { %5904 = vrot.lane.b32.xlu1 %v7669_v25, %s6208_s17 }
 0x2d9   : > { %3290 = vrot.lane.b32.xlu0 %v7687_v58, %s6208_s17 }
 0x2dc   : > { %2836 = vrot.lane.b32.xlu1 %v7661_v2, %s6207_s0 }
 0x2dd   : > { %3294 = vrot.lane.b32.xlu0 %v7698_v51, %s6208_s17 }
 0x2e0   : > { %2838 = vrot.lane.b32.xlu1 %v7676_v14, %s6207_s0 }
 0x2e1   : > { %5929 = vrot.lane.b32.xlu0 %v7719_v22, %s6207_s0 }
 0x2e4   : > { %5914 = vrot.lane.b32.xlu1 %v7689_v42, %s6208_s17 }
 0x2e5   : > { %5939 = vrot.lane.b32.xlu0 %v7738_v11, %s6206_s30 }
 0x2e8   : > { %2844 = vrot.lane.b32.xlu1 %v7687_v58, %s6207_s0 }
 0x2e9   : > { %5949 = vrot.lane.b32.xlu0 %v7757_v44, %s6206_s30 }
 0x2ec   : > { %2846 = vrot.lane.b32.xlu1 %v7695_v36, %s6207_s0 }
 0x2ed   : > { %5954 = vrot.lane.b32.xlu0 %v7757_v44, %s6207_s0 }
 0x2f0   : > { %2850 = vrot.lane.b32.xlu1 %v7702_v62, %s6207_s0 }
 0x2f1   : > { %3113 = vrot.lane.b32.xlu0 %v7784_v19, %s6207_s0 }
 0x2f4   : > { %3280 = vrot.lane.b32.xlu1 %v7659_v53, %s6208_s17 }
 0x2f8   : > { %3284 = vrot.lane.b32.xlu1 %v7676_v14, %s6208_s17 }
 0x2fc   : > { %3288 = vrot.lane.b32.xlu1 %v7685_v32, %s6208_s17  ;;  %v5870_v2 = vpop.permute.xlu1 %5869  ;;  %v5890_v17 = vpop.permute.xlu0 %5889 }
 0x2fd   : > { %v5872_v25 = vunpack.i.h.bf16 %v5870_v2  ;;  %v5871_v9 = vunpack.i.l.bf16 %v5870_v2  ;;  %v5892_v30 = vunpack.i.h.bf16 %v5890_v17  ;;  %v5891_v51 = vunpack.i.l.bf16 %v5890_v17 }
 0x2ff   : > { %v5727_v54 = vpack.c.bf16 %v5872_v25, %v5871_v9  ;;  %v5755_v48 = vpack.c.bf16 %v5892_v30, %v5891_v51 }
 0x300   : > { %3292 = vrot.lane.b32.xlu1 %v7695_v36, %s6208_s17 }
 0x301   : > { %5729 = vmatpush3.bf16.xpose.msk.msra.mxu1 %vm7665_vm4, %v5727_v54 }
 0x302   : > { %5730 = vmatprep.subr.bf16.mxu1 %v9152_v61 }
 0x304   : > { %3296 = vrot.lane.b32.xlu1 %v7702_v62, %s6208_s17 }
 0x308   : > { %5924 = vrot.lane.b32.xlu1 %v7719_v22, %s6206_s30 }
 0x30c   : > { %5934 = vrot.lane.b32.xlu1 %v7719_v22, %s6208_s17 }
 0x310   : > { %5944 = vrot.lane.b32.xlu1 %v7738_v11, %s6207_s0 }
 0x312   : > { %v5875_v53 = vpop.permute.xlu1 %5874 }
 0x313   : > { %v5877_v14 = vunpack.i.h.bf16 %v5875_v53  ;;  %v5876_v60 = vunpack.i.l.bf16 %v5875_v53 }
 0x314   : > { %5959 = vrot.lane.b32.xlu1 %v7777_v56, %s6206_s30 }
 0x315   : > { %v5731_v32 = vpack.c.bf16 %v5877_v14, %v5876_v60 }
 0x317   : > { %5733 = vmatpush3.bf16.xpose.msk.msra.mxu1 %vm7665_vm4, %v5731_v32 }
 0x318   : > { %5964 = vrot.lane.b32.xlu1 %v7777_v56, %s6207_s0  ;;  %5734 = vmatprep.subr.bf16.mxu1 %v9152_v61 }
 0x31a   : > { %v5880_v15 = vpop.permute.xlu1 %5879  ;;  %v5900_v24 = vpop.permute.xlu0 %5899 }
 0x31b   : > { %v5882_v63 = vunpack.i.h.bf16 %v5880_v15  ;;  %v5881_v8 = vunpack.i.l.bf16 %v5880_v15  ;;  %v5902_v6 = vunpack.i.h.bf16 %v5900_v24  ;;  %v5901_v10 = vunpack.i.l.bf16 %v5900_v24 }
 0x31c   : > { %2667 = vrot.lane.b32.xlu1 %v7784_v19, %s6206_s30 }
 0x31d   : > { %v5735_v58 = vpack.c.bf16 %v5882_v63, %v5881_v8  ;;  %v5763_v22 = vpack.c.bf16 %v5902_v6, %v5901_v10 }
 0x31e   : > { %v5885_v20 = vpop.permute.xlu1 %5884  ;;  %v2395_v26 = vpop.permute.xlu0 %2394 }
 0x31f   : > { %5737 = vmatpush3.bf16.xpose.msk.msra.mxu1 %vm7665_vm4, %v5735_v58  ;;  %v5887_v34 = vunpack.i.h.bf16 %v5885_v20  ;;  %v5886_v28 = vunpack.i.l.bf16 %v5885_v20 }
 0x320   : > { %5293 = vmatprep.subr.mxu1 %v9099_v29 }
 0x321   : > { %v5751_v36 = vpack.c.bf16 %v5887_v34, %v5886_v28 }
 0x322   : > { %v2381_v16 = vpop.permute.xlu1 %2380  ;;  %v2869_v47 = vpop.permute.xlu0 %2868 }
 0x326   : > { %v2415_v42 = vpop.permute.xlu1 %2414 }
 0x327   : > { %5294 = vmatpush3.xpose.msk.msra.mxu1 %vm1973_vm3, %v2415_v42  ;;  %v2835_v49 = vpop.permute.xlu0 %2834 }
 0x328   : > { %5750 = vmatprep.subr.bf16.mxu1 %v9152_v61 }
 0x32a   : > { %v2383_v43 = vpop.permute.xlu1 %2382  ;;  %5296 = vmatmul.mubr.msk.f32.vlgmr.msra.gmra.mrb[36].mxu1 %vm1973_vm3, %v2381_v16 }
 0x32b   : > { %5753 = vmatpush3.bf16.xpose.msk.msra.mxu1 %vm7665_vm4, %v5751_v36  ;;  %5298 = vmatprep.mubr.msk.f32.mxu1 %vm6205_vm2, %v9099_v29  ;;  %v5910_v40 = vpop.permute.xlu0 %5909 }
 0x32c   : > { %5754 = vmatprep.subr.bf16.mxu1 %v9152_v61  ;;  %v5912_v39 = vunpack.i.h.bf16 %v5910_v40  ;;  %v5911_v38 = vunpack.i.l.bf16 %v5910_v40 }
 0x32e   : > { %v2385_v18 = vpop.permute.xlu1 %2384  ;;  %5299 = vmatmul.mubr.msk.f32.gmra.mrb[38].mxu1 %vm1973_vm3, %v2383_v43  ;;  %v5783_v7 = vpack.c.bf16 %v5912_v39, %v5911_v38 }
 0x32f   : > { %5301 = vmatprep.mubr.msk.f32.mxu1 %vm6205_vm2, %v9099_v29  ;;  %v2841_v12 = vpop.permute.xlu0 %2840 }
 0x332   : > { %v2387_v23 = vpop.permute.xlu1 %2386  ;;  %5302 = vmatmul.mubr.msk.f32.gmra.mrb[40].mxu1 %vm1973_vm3, %v2385_v18 }
 0x333   : > { %5757 = vmatpush3.bf16.xpose.msk.msra.mxu1 %vm7665_vm4, %v5755_v48  ;;  %5304 = vmatprep.mubr.msk.f32.mxu1 %vm6205_vm2, %v9099_v29  ;;  %v2843_v35 = vpop.permute.xlu0 %2842 }
 0x334   : > { %5758 = vmatprep.subr.bf16.mxu1 %v9152_v61 }
 0x336   : > { %v5895_v59 = vpop.permute.xlu1 %5894  ;;  %5305 = vmatmul.mubr.msk.f32.gmra.mrb[42].mxu1 %vm1973_vm3, %v2387_v23 }
 0x337   : > { %v5897_v62 = vunpack.i.h.bf16 %v5895_v59  ;;  %v5896_v46 = vunpack.i.l.bf16 %v5895_v59  ;;  %5307 = vmatprep.mubr.msk.f32.mxu1 %vm6205_vm2, %v9099_v29  ;;  %v5920_v50 = vpop.permute.xlu0 %5919 }
 0x338   : > { %v5922_v25 = vunpack.i.h.bf16 %v5920_v50  ;;  %v5921_v9 = vunpack.i.l.bf16 %v5920_v50 }
 0x339   : > { %v5759_v4 = vpack.c.bf16 %v5897_v62, %v5896_v46 }
 0x33a   : > { %v2389_v1 = vpop.permute.xlu1 %2388  ;;  %v5791_v54 = vpack.c.bf16 %v5922_v25, %v5921_v9 }
 0x33b   : > { %5308 = vmatmul.mubr.msk.f32.gmra.mrb[44].mxu1 %vm1973_vm3, %v2389_v1  ;;  %v2849_v14 = vpop.permute.xlu0 %2848 }
 0x33c   : > { %5761 = vmatpush3.bf16.xpose.msk.msra.mxu1 %vm7665_vm4, %v5759_v4  ;;  %5310 = vmatprep.mubr.msk.f32.mxu1 %vm6205_vm2, %v9099_v29 }
 0x33d   : > { %5762 = vmatprep.subr.bf16.mxu1 %v9152_v61 }
 0x33e   : > { %v2391_v5 = vpop.permute.xlu1 %2390 }
 0x33f   : > { %5311 = vmatmul.mubr.msk.f32.gmra.mrb[46].mxu1 %vm1973_vm3, %v2391_v5  ;;  %v3315_v32 = vpop.permute.xlu0 %3314 }
 0x340   : > { %5313 = vmatprep.mubr.msk.f32.mxu1 %vm6205_vm2, %v9099_v29 }
 0x342   : > { %v2393_v21 = vpop.permute.xlu1 %2392 }
 0x343   : > { %5314 = vmatmul.mubr.msk.f32.gmra.mrb[48].mxu1 %vm1973_vm3, %v2393_v21  ;;  %v3283_v15 = vpop.permute.xlu0 %3282 }
 0x344   : > { %5765 = vmatpush3.bf16.xpose.msk.msra.mxu1 %vm7665_vm4, %v5763_v22  ;;  %5316 = vmatprep.mubr.msk.f32.mxu1 %vm6205_vm2, %v9099_v29 }
 0x345   : > { %5383 = vmatprep.subr.mxu1 %v9099_v29 }
 0x346   : > { %v2397_v45 = vpop.permute.xlu1 %2396 }
 0x347   : > { %5317 = vmatmul.mubr.msk.f32.gmra.mrb[50].mxu1 %vm1973_vm3, %v2395_v26  ;;  %v3287_v8 = vpop.permute.xlu0 %3286 }
 0x348   : > { %5319 = vmatprep.mubr.msk.f32.mxu1 %vm6205_vm2, %v9099_v29 }
 0x34a   : > { %v5905_v27 = vpop.permute.xlu1 %5904 }
 0x34b   : > { %v5907_v52 = vunpack.i.h.bf16 %v5905_v27  ;;  %v5906_v55 = vunpack.i.l.bf16 %v5905_v27  ;;  %5320 = vmatmul.mubr.msk.f32.gmra.mrb[52].mxu1 %vm1973_vm3, %v2397_v45  ;;  %v3291_v20 = vpop.permute.xlu0 %3290 }
 0x34c   : > { %5384 = vmatpush3.xpose.msk.msra.mxu1 %vm1973_vm3, %v2869_v47  ;;  %5385 = vmatprep.mubr.msk.f32.mxu1 %vm6205_vm2, %v9099_v29 }
 0x34d   : > { %v5779_v41 = vpack.c.bf16 %v5907_v52, %v5906_v55  ;;  %5778 = vmatprep.subr.bf16.mxu1 %v9152_v61 }
 0x34e   : > { %v2837_v0 = vpop.permute.xlu1 %2836 }
 0x34f   : > { %5386 = vmatmul.mubr.msk.f32.vlgmr.msra.gmra.mrb[54].mxu1 %vm1973_vm3, %v2835_v49  ;;  %v3295_v30 = vpop.permute.xlu0 %3294 }
 0x350   : > { %5781 = vmatpush3.bf16.xpose.msk.msra.mxu1 %vm7665_vm4, %v5779_v41  ;;  %5388 = vmatprep.mubr.msk.f32.mxu1 %vm6205_vm2, %v9099_v29 }
 0x351   : > { %5782 = vmatprep.subr.bf16.mxu1 %v9152_v61 }
 0x352   : > { %v2839_v13 = vpop.permute.xlu1 %2838 }
 0x353   : > { %5389 = vmatmul.mubr.msk.f32.gmra.mrb[56].mxu1 %vm1973_vm3, %v2837_v0  ;;  %v8020_v41 = vpop.permute.xlu0 %5929 }
 0x354   : > { %5391 = vmatprep.mubr.msk.f32.mxu1 %vm6205_vm2, %v9099_v29 }
 0x356   : > { %v5915_v31 = vpop.permute.xlu1 %5914 }
 0x357   : > { %5392 = vmatmul.mubr.msk.f32.gmra.mrb[58].mxu1 %vm1973_vm3, %v2839_v13  ;;  %v5917_v57 = vunpack.i.h.bf16 %v5915_v31  ;;  %v5916_v37 = vunpack.i.l.bf16 %v5915_v31  ;;  %v8028_v13 = vpop.permute.xlu0 %5939 }
 0x358   : > { %5785 = vmatpush3.bf16.xpose.msk.msra.mxu1 %vm7665_vm4, %v5783_v7  ;;  %5394 = vmatprep.mubr.msk.f32.mxu1 %vm6205_vm2, %v9099_v29 }
 0x359   : > { %5786 = vmatprep.subr.bf16.mxu1 %v9152_v61  ;;  %v5787_v3 = vpack.c.bf16 %v5917_v57, %v5916_v37 }
 0x35a   : > { %v2845_v2 = vpop.permute.xlu1 %2844 }
 0x35b   : > { %5395 = vmatmul.mubr.msk.f32.gmra.mrb[60].mxu1 %vm1973_vm3, %v2841_v12  ;;  %v8038_v37 = vpop.permute.xlu0 %5949 }
 0x35c   : > { %5397 = vmatprep.mubr.msk.f32.mxu1 %vm6205_vm2, %v9099_v29 }
 0x35e   : > { %v2847_v53 = vpop.permute.xlu1 %2846 }
 0x35f   : > { %5398 = vmatmul.mubr.msk.f32.gmra.mrb[62].mxu1 %vm1973_vm3, %v2843_v35 }
 0x360   : > { %5789 = vmatpush3.bf16.xpose.msk.msra.mxu1 %vm7665_vm4, %v5787_v3  ;;  %5400 = vmatprep.mubr.msk.f32.mxu1 %vm6205_vm2, %v9099_v29 }
 0x361   : > { %5790 = vmatprep.subr.bf16.mxu1 %v9152_v61 }
 0x362   : > { %v2851_v60 = vpop.permute.xlu1 %2850 }
 0x363   : > { %5401 = vmatmul.mubr.msk.f32.gmra.mrb[64].mxu1 %vm1973_vm3, %v2845_v2 }
 0x364   : > { %5403 = vmatprep.mubr.msk.f32.mxu1 %vm6205_vm2, %v9099_v29 }
 0x366   : > { %v3281_v33 = vpop.permute.xlu1 %3280 }
 0x367   : > { %5404 = vmatmul.mubr.msk.f32.gmra.mrb[66].mxu1 %vm1973_vm3, %v2847_v53  ;;  %v8048_v53 = vpop.permute.xlu0 %5954 }
 0x368   : > { %5793 = vmatpush3.bf16.xpose.msk.msra.mxu1 %vm7665_vm4, %v5791_v54  ;;  %5406 = vmatprep.mubr.msk.f32.mxu1 %vm6205_vm2, %v9099_v29 }
 0x369   : > { %5473 = vmatprep.subr.mxu1 %v9099_v29 }
 0x36a   : > { %v3285_v63 = vpop.permute.xlu1 %3284 }
 0x36b   : > { %5407 = vmatmul.mubr.msk.f32.gmra.mrb[68].mxu1 %vm1973_vm3, %v2849_v14 }
 0x36c   : > { %5409 = vmatprep.mubr.msk.f32.mxu1 %vm6205_vm2, %v9099_v29 }
 0x36e   : > { %v3289_v58 = vpop.permute.xlu1 %3288 }
 0x36f   : > { %5410 = vmatmul.mubr.msk.f32.gmra.mrb[70].mxu1 %vm1973_vm3, %v2851_v60 }
 0x370   : > { %5474 = vmatpush3.xpose.msk.msra.mxu1 %vm1973_vm3, %v3315_v32  ;;  %5475 = vmatprep.mubr.msk.f32.mxu1 %vm6205_vm2, %v9099_v29 }
 0x371   : > { %5806 = vmatprep.subr.bf16.mxu1 %v9152_v61 }
 0x372   : > { %v3293_v42 = vpop.permute.xlu1 %3292 }
 0x373   : > { %5476 = vmatmul.mubr.msk.f32.vlgmr.msra.gmra.mrb[72].mxu1 %vm1973_vm3, %v3281_v33 }
 0x374   : > { %5478 = vmatprep.mubr.msk.f32.mxu1 %vm6205_vm2, %v9099_v29 }
 0x376   : > { %v3297_v23 = vpop.permute.xlu1 %3296 }
 0x377   : > { %5479 = vmatmul.mubr.msk.f32.gmra.mrb[74].mxu1 %vm1973_vm3, %v3283_v15  ;;  %v8056_v15 = vpop.permute.xlu0 %3113 }
 0x378   : > { %5481 = vmatprep.mubr.msk.f32.mxu1 %vm6205_vm2, %v9099_v29 }
 0x37a   : > { %v8018_v40 = vpop.permute.xlu1 %5924 }
 0x37b   : > { %5482 = vmatmul.mubr.msk.f32.gmra.mrb[76].mxu1 %vm1973_vm3, %v3285_v63 }
 0x37c   : > { %5484 = vmatprep.mubr.msk.f32.mxu1 %vm6205_vm2, %v9099_v29 }
 0x37e   : > { %v8022_v0 = vpop.permute.xlu1 %5934 }
 0x37f   : > { %5485 = vmatmul.mubr.msk.f32.gmra.mrb[78].mxu1 %vm1973_vm3, %v3287_v8 }
 0x380   : > { %5487 = vmatprep.mubr.msk.f32.mxu1 %vm6205_vm2, %v9099_v29 }
 0x382   : > { %v8034_v35 = vpop.permute.xlu1 %5944 }
 0x383   : > { %5488 = vmatmul.mubr.msk.f32.gmra.mrb[80].mxu1 %vm1973_vm3, %v3289_v58 }
 0x384   : > { %5490 = vmatprep.mubr.msk.f32.mxu1 %vm6205_vm2, %v9099_v29 }
 0x386   : > { %v8042_v2 = vpop.permute.xlu1 %5959 }
 0x387   : > { %5491 = vmatmul.mubr.msk.f32.gmra.mrb[82].mxu1 %vm1973_vm3, %v3291_v20  ;;  %v7969_v16 = vpop.f32.mrb[18].mxu1 }
 0x388   : > { %5493 = vmatprep.mubr.msk.f32.mxu1 %vm6205_vm2, %v9099_v29  ;;  %v5207_v34 = vpop.f32.mrb[19].mxu1  ;;  %v2139_v28 = vsel %vm2138_vm6, %v7969_v16, -inf }
 0x389   : > { %2140 = vmax.xlane.f32.xlu0 %v2139_v28 }
 0x38a   : > { %v8052_v60 = vpop.permute.xlu1 %5964 }
 0x38b   : > { %5494 = vmatmul.mubr.msk.f32.gmra.mrb[84].mxu1 %vm1973_vm3, %v3293_v42  ;;  %v7976_v36 = vpop.f32.mrb[20].mxu1 }
 0x38c   : > { %5496 = vmatprep.mubr.msk.f32.mxu1 %vm6205_vm2, %v9099_v29  ;;  %v5210_v17 = vpop.f32.mrb[21].mxu1  ;;  %v2142_v43 = vsel %vm2138_vm6, %v7976_v36, -inf }
 0x38d   : > { %2143 = vmax.xlane.f32.xlu1 %v2142_v43 }
 0x38e   : > { %v8062_v20 = vpop.permute.xlu1 %2667 }
 0x38f   : > { %5497 = vmatmul.mubr.msk.f32.gmra.mrb[86].mxu1 %vm1973_vm3, %v3295_v30  ;;  %v7983_v51 = vpop.f32.mrb[22].mxu1 }
 0x390   : > { %5499 = vmatprep.mubr.msk.f32.mxu1 %vm6205_vm2, %v9099_v29  ;;  %v5213_v18 = vpop.f32.mrb[23].mxu1  ;;  %v2145_v48 = vsel %vm2138_vm6, %v7983_v51, -inf }
 0x391   : > { %2146 = vmax.xlane.f32.xlu0 %v2145_v48 }
 0x393   : > { %5500 = vmatmul.mubr.msk.f32.gmra.mrb[88].mxu1 %vm1973_vm3, %v3297_v23  ;;  %v7990_v59 = vpop.f32.mrb[24].mxu1 }
 0x394   : > { %v5216_v24 = vpop.f32.mrb[25].mxu1  ;;  %v2148_v62 = vsel %vm2138_vm6, %v7990_v59, -inf  ;;  %5555 = vmatprep.mubr.msk.f32.mxu1 %vm6205_vm2, %v9099_v29 }
 0x395   : > { %2149 = vmax.xlane.f32.xlu0 %v2148_v62 }
 0x397   : > { %v7996_v46 = vpop.f32.mrb[26].mxu1 }
 0x398   : > { %v5219_v4 = vpop.f32.mrb[27].mxu1  ;;  %v2151_v1 = vsel %vm2138_vm6, %v7996_v46, -inf }
 0x399   : > { %2152 = vmax.xlane.f32.xlu1 %v2151_v1 }
 0x39b   : > { %v8000_v26 = vpop.f32.mrb[28].mxu1 }
 0x39c   : > { %v5222_v6 = vpop.f32.mrb[29].mxu1  ;;  %v2154_v52 = vsel %vm2138_vm6, %v8000_v26, -inf }
 0x39f   : > { %v8002_v10 = vpop.f32.mrb[30].mxu1 }
 0x3a0   : > { %v5225_v5 = vpop.f32.mrb[31].mxu1  ;;  %v2157_v47 = vsel %vm2138_vm6, %v8002_v10, -inf }
 0x3a1   : > { %2158 = vmax.xlane.f32.xlu1 %v2157_v47 }
 0x3a3   : > { %v8006_v22 = vpop.f32.mrb[32].mxu1 }
 0x3a4   : > { %v5228_v21 = vpop.f32.mrb[33].mxu1  ;;  %v2160_v55 = vsel %vm2138_vm6, %v8006_v22, -inf }
 0x3a5   : > { %v5927_v21 = vunpack.i.h.bf16 %v8018_v40 }
 0x3a7   : > { %v8008_v45 = vpop.f32.mrb[34].mxu1 }
 0x3a8   : > { %v5231_v49 = vpop.f32.mrb[35].mxu1  ;;  %v2164_v27 = vsel %vm2163_vm7, %v8008_v45, -inf }
 0x3a9   : > { %2165 = vmax.xlane.f32.xlu1 %v2164_v27  ;;  %v5926_v49 = vunpack.i.l.bf16 %v8018_v40 }
 0x3ab   : > { %5969 = vrot.lane.b32.xlu0 %v7738_v11, %s6208_s17 }
 0x3ca   : > { %2155 = vmax.xlane.f32.xlu0 %v2154_v52 }
 0x3ce   : > { %2161 = vmax.xlane.f32.xlu0 %v2160_v55 }
 0x3fd   : > { %v8024_v39 = vpop.f32.mrb[36].mxu1 }
 0x3fe   : > { %v5297_v38 = vpop.f32.mrb[37].mxu1  ;;  %v2562_v11 = vsel %vm2138_vm6, %v8024_v39, -inf }
 0x3ff   : > { %2563 = vmax.xlane.f32.xlu0 %v2562_v11 }
 0x401   : > { %v8030_v12 = vpop.f32.mrb[38].mxu1 }
 0x402   : > { %v5300_v7 = vpop.f32.mrb[39].mxu1  ;;  %v2565_v31 = vsel %vm2138_vm6, %v8030_v12, -inf }
 0x403   : > { %2566 = vmax.xlane.f32.xlu1 %v2565_v31  ;;  %v5941_v7 = vunpack.i.l.bf16 %v8028_v13  ;;  %v5739_v31 = vpack.c.bf16 %v5927_v21, %v5926_v49 }
 0x405   : > { %v8036_v57 = vpop.f32.mrb[40].mxu1 }
 0x406   : > { %v5303_v3 = vpop.f32.mrb[41].mxu1  ;;  %v2568_v50 = vsel %vm2138_vm6, %v8036_v57, -inf }
 0x407   : > { %2569 = vmax.xlane.f32.xlu0 %v2568_v50 }
 0x409   : > { %v8044_v25 = vpop.f32.mrb[42].mxu1 }
 0x40a   : > { %v5306_v9 = vpop.f32.mrb[43].mxu1  ;;  %v2571_v54 = vsel %vm2138_vm6, %v8044_v25, -inf }
 0x40b   : > { %2572 = vmax.xlane.f32.xlu0 %v2571_v54 }
 0x40e   : > { %v8050_v14 = vpop.f32.mrb[44].mxu1 }
 0x40f   : > { %v5309_v32 = vpop.f32.mrb[45].mxu1  ;;  %v2574_v33 = vsel %vm2138_vm6, %v8050_v14, -inf }
 0x410   : > { %2575 = vmax.xlane.f32.xlu1 %v2574_v33  ;;  %v5952_v32 = vunpack.i.h.bf16 %v8038_v37  ;;  %v5951_v33 = vunpack.i.l.bf16 %v8038_v37 }
 0x412   : > { %v8058_v63 = vpop.f32.mrb[46].mxu1  ;;  %v5745_v37 = vpack.c.bf16 %v5952_v32, %v5951_v33 }
 0x413   : > { %v5312_v8 = vpop.f32.mrb[47].mxu1  ;;  %v2577_v58 = vsel %vm2138_vm6, %v8058_v63, -inf }
 0x414   : > { %2578 = vmax.xlane.f32.xlu0 %v2577_v58 }
 0x416   : > { %v8064_v34 = vpop.f32.mrb[48].mxu1  ;;  %v2141_v28 = vpop.xlane.xlu0 %2140 }
 0x417   : > { %v5315_v42 = vpop.f32.mrb[49].mxu1  ;;  %v2580_v17 = vsel %vm2138_vm6, %v8064_v34, -inf  ;;  %v2167_v43 = vsub.f32 %v7969_v16, %v2141_v28 }
 0x418   : > { %2581 = vmax.xlane.f32.xlu0 %v2580_v17  ;;  %v5962_v17 = vunpack.i.h.bf16 %v8042_v2 }
 0x419   : > { %v2176_v30 = vmul.f32 1.442695, %v2167_v43  ;;  %v5961_v43 = vunpack.i.l.bf16 %v8042_v2 }
 0x41a   : > { %v8069_v18 = vpop.f32.mrb[50].mxu1  ;;  %v2144_v48 = vpop.xlane.xlu1 %2143 }
 0x41b   : > { %6001 = vpow2.f32 %v2176_v30  ;;  %v5318_v23 = vpop.f32.mrb[51].mxu1  ;;  %v2583_v24 = vsel %vm2138_vm6, %v8069_v18, -inf  ;;  %v2168_v62 = vsub.f32 %v7976_v36, %v2144_v48 }
 0x41c   : > { %2584 = vmax.xlane.f32.xlu0 %v2583_v24 }
 0x41d   : > { %v2178_v4 = vmul.f32 1.442695, %v2168_v62  ;;  %v5748_v62 = vpack.c.bf16 %v5962_v17, %v5961_v43 }
 0x41e   : > { %v8074_v1 = vpop.f32.mrb[52].mxu1  ;;  %v2147_v6 = vpop.xlane.xlu0 %2146 }
 0x41f   : > { %6003 = vpow2.f32 %v2178_v4  ;;  %v5321_v5 = vpop.f32.mrb[53].mxu1  ;;  %v2586_v16 = vsel %vm2163_vm7, %v8074_v1, -inf  ;;  %v2169_v47 = vsub.f32 %v7983_v51, %v2147_v6  ;;  %v5942_v51 = vunpack.i.h.bf16 %v8028_v13 }
 0x420   : > { %2587 = vmax.xlane.f32.xlu0 %v2586_v16 }
 0x421   : > { %5974 = vrot.lane.b32.xlu1 %v7757_v44, %s6208_s17  ;;  %v2180_v36 = vmul.f32 1.442695, %v2169_v47  ;;  %v5742_v54 = vpack.c.bf16 %v5942_v51, %v5941_v7 }
 0x422   : > { %v8083_v27 = vpop.f32.mrb[54].mxu1  ;;  %v2150_v52 = vpop.xlane.xlu0 %2149 }
 0x423   : > { %6005 = vpow2.f32 %v2180_v36  ;;  %v5387_v55 = vpop.f32.mrb[55].mxu1  ;;  %v2170_v38 = vsub.f32 %v7990_v59, %v2150_v52  ;;  %v3016_v7 = vsel %vm2138_vm6, %v8083_v27, -inf }
 0x425   : > { %v8086_v11 = vpop.eup %6001  ;;  %v2182_v3 = vmul.f32 1.442695, %v2170_v38 }
 0x426   : > { %v8090_v40 = vpop.f32.mrb[56].mxu1  ;;  %v2153_v50 = vpop.xlane.xlu1 %2152  ;;  %5251 = vmatmul.mubr.msk.f32.vlgmr.msra.gmra.mrb[36].mxu0 %vm2138_vm6, %v8086_v11 }
 0x427   : > { %6007 = vpow2.f32 %v2182_v3  ;;  %v5390_v44 = vpop.f32.mrb[57].mxu1  ;;  %v3019_v9 = vsel %vm2138_vm6, %v8090_v40, -inf  ;;  %v2171_v59 = vsub.f32 %v7996_v46, %v2153_v50  ;;  %5740 = vmatpush3.bf16.msra.mxu0 %v5739_v31  ;;  %5253 = vmatprep.mubr.msk.f32.mxu0 %vm6205_vm2, %v9099_v29 }
 0x428   : > { %3020 = vmax.xlane.f32.xlu0 %v3019_v9  ;;  %5741 = vmatprep.subr.bf16.mxu0 %v9152_v61 }
 0x429   : > { %v8100_v13 = vpop.eup %6003  ;;  %v2184_v8 = vmul.f32 1.442695, %v2171_v59 }
 0x42a   : > { %v8104_v58 = vpop.f32.mrb[58].mxu1  ;;  %5254 = vmatmul.mubr.msk.f32.gmra.mrb[38].mxu0 %vm2138_vm6, %v8100_v13 }
 0x42b   : > { %6009 = vpow2.f32 %v2184_v8  ;;  %v5393_v46 = vpop.f32.mrb[59].mxu1  ;;  %v3022_v28 = vsel %vm2138_vm6, %v8104_v58, -inf  ;;  %5743 = vmatpush3.bf16.msra.mxu0 %v5742_v54  ;;  %5256 = vmatprep.mubr.msk.f32.mxu0 %vm6205_vm2, %v9099_v29 }
 0x42c   : > { %3023 = vmax.xlane.f32.xlu0 %v3022_v28  ;;  %5744 = vmatprep.subr.bf16.mxu0 %v9152_v61  ;;  %v8174_v46 = vpop.permute.xlu0 %5969 }
 0x42d   : > { %v8113_v42 = vpop.eup %6005 }
 0x42e   : > { %v8117_v30 = vpop.f32.mrb[60].mxu1  ;;  %5257 = vmatmul.mubr.msk.f32.gmra.mrb[40].mxu0 %vm2138_vm6, %v8113_v42  ;;  %v2159_v17 = vpop.xlane.xlu1 %2158 }
 0x42f   : > { %v5396_v48 = vpop.f32.mrb[61].mxu1  ;;  %v3025_v23 = vsel %vm2138_vm6, %v8117_v30, -inf  ;;  %5746 = vmatpush3.bf16.msra.mxu0 %v5745_v37  ;;  %5259 = vmatprep.mubr.msk.f32.mxu0 %vm6205_vm2, %v9099_v29 }
 0x430   : > { %3026 = vmax.xlane.f32.xlu0 %v3025_v23  ;;  %5747 = vmatprep.subr.bf16.mxu0 %v9152_v61 }
 0x431   : > { %v8126_v24 = vpop.eup %6007 }
 0x432   : > { %v8128_v2 = vpop.f32.mrb[62].mxu1  ;;  %5260 = vmatmul.mubr.msk.f32.gmra.mrb[42].mxu0 %vm2138_vm6, %v8126_v24 }
 0x433   : > { %v5399_v4 = vpop.f32.mrb[63].mxu1  ;;  %5749 = vmatpush3.bf16.msra.mxu0 %v5748_v62  ;;  %5262 = vmatprep.mubr.msk.f32.mxu0 %vm6205_vm2, %v9099_v29  ;;  %v3028_v50 = vsel %vm2138_vm6, %v8128_v2, -inf }
 0x434   : > { %5338 = vmatprep.subr.mxu0 %v9099_v29  ;;  %v2173_v4 = vsub.f32 %v8002_v10, %v2159_v17 }
 0x435   : > { %v8135_v6 = vpop.eup %6009 }
 0x436   : > { %v8137_v5 = vpop.f32.mrb[64].mxu1  ;;  %5263 = vmatmul.mubr.msk.f32.gmra.mrb[44].mxu0 %vm2138_vm6, %v8135_v6  ;;  %v2166_v10 = vpop.xlane.xlu1 %2165 }
 0x437   : > { %v5402_v16 = vpop.f32.mrb[65].mxu1  ;;  %v3031_v47 = vsel %vm2138_vm6, %v8137_v5, -inf  ;;  %5339 = vmatpush3.msk.msra.mxu0 %vm2248_vm5, %v8062_v20  ;;  %5265 = vmatprep.mubr.msk.f32.mxu0 %vm6205_vm2, %v9099_v29 }
 0x438   : > { %3032 = vmax.xlane.f32.xlu0 %v3031_v47  ;;  %5766 = vmatprep.subr.bf16.mxu0 %v9152_v61 }
 0x43a   : > { %v8148_v21 = vpop.f32.mrb[66].mxu1 }
 0x43b   : > { %v5405_v49 = vpop.f32.mrb[67].mxu1  ;;  %v3034_v59 = vsel %vm2138_vm6, %v8148_v21, -inf }
 0x43e   : > { %v8150_v36 = vpop.f32.mrb[68].mxu1 }
 0x43f   : > { %v5408_v52 = vpop.f32.mrb[69].mxu1  ;;  %v3037_v55 = vsel %vm2138_vm6, %v8150_v36, -inf }
 0x440   : > { %3038 = vmax.xlane.f32.xlu0 %v3037_v55 }
 0x442   : > { %v8154_v38 = vpop.f32.mrb[70].mxu1 }
 0x443   : > { %v5411_v51 = vpop.f32.mrb[71].mxu1  ;;  %v3040_v20 = vsel %vm2163_vm7, %v8154_v38, -inf }
 0x444   : > { %3041 = vmax.xlane.f32.xlu0 %v3040_v20  ;;  %v2188_v20 = vmul.f32 1.442695, %v2173_v4 }
 0x445   : > { %3017 = vmax.xlane.f32.xlu1 %v3016_v7 }
 0x446   : > { %v8160_v31 = vpop.f32.mrb[72].mxu1 }
 0x447   : > { %v5477_v3 = vpop.f32.mrb[73].mxu1  ;;  %v3462_v33 = vsel %vm2138_vm6, %v8160_v31, -inf }
 0x449   : > { %3029 = vmax.xlane.f32.xlu1 %v3028_v50 }
 0x44a   : > { %v8164_v44 = vpop.f32.mrb[74].mxu1 }
 0x44b   : > { %v5480_v9 = vpop.f32.mrb[75].mxu1  ;;  %v3465_v37 = vsel %vm2138_vm6, %v8164_v44, -inf }
 0x44d   : > { %3035 = vmax.xlane.f32.xlu1 %v3034_v59 }
 0x44e   : > { %v8168_v54 = vpop.f32.mrb[76].mxu1 }
 0x44f   : > { %v5483_v32 = vpop.f32.mrb[77].mxu1  ;;  %v3468_v16 = vsel %vm2138_vm6, %v8168_v54, -inf }
 0x451   : > { %3463 = vmax.xlane.f32.xlu1 %v3462_v33 }
 0x452   : > { %v8172_v8 = vpop.f32.mrb[78].mxu1 }
 0x453   : > { %v5486_v28 = vpop.f32.mrb[79].mxu1  ;;  %v3471_v7 = vsel %vm2138_vm6, %v8172_v8, -inf }
 0x455   : > { %3466 = vmax.xlane.f32.xlu1 %v3465_v37 }
 0x456   : > { %v8178_v43 = vpop.f32.mrb[80].mxu1 }
 0x457   : > { %v5489_v48 = vpop.f32.mrb[81].mxu1  ;;  %v3474_v23 = vsel %vm2138_vm6, %v8178_v43, -inf  ;;  %v2156_v62 = vpop.xlane.xlu0 %2155 }
 0x458   : > { %3475 = vmax.xlane.f32.xlu0 %v3474_v23  ;;  %v2172_v47 = vsub.f32 %v8000_v26, %v2156_v62  ;;  %v2175_v26 = vsub.f32 %v8008_v45, %v2166_v10 }
 0x459   : > { %3469 = vmax.xlane.f32.xlu1 %v3468_v16 }
 0x45a   : > { %v2186_v49 = vmul.f32 1.442695, %v2172_v47  ;;  %v8186_v52 = vpop.f32.mrb[82].mxu1 }
 0x45b   : > { %v5492_v55 = vpop.f32.mrb[83].mxu1  ;;  %v2162_v51 = vpop.xlane.xlu0 %2161  ;;  %v3477_v32 = vsel %vm2138_vm6, %v8186_v52, -inf }
 0x45c   : > { %6011 = vpow2.f32 %v2186_v49  ;;  %v2174_v3 = vsub.f32 %v8006_v22, %v2162_v51  ;;  %v2192_v22 = vmul.f32 1.442695, %v2175_v26 }
 0x45d   : > { %3472 = vmax.xlane.f32.xlu1 %v3471_v7  ;;  %6013 = vpow2.f32 %v2188_v20 }
 0x45e   : > { %v8191_v50 = vpop.f32.mrb[84].mxu1  ;;  %v2190_v59 = vmul.f32 1.442695, %v2174_v3 }
 0x45f   : > { %v5495_v9 = vpop.f32.mrb[85].mxu1 }
 0x460   : > { %6015 = vpow2.f32 %v2190_v59  ;;  %v5931_v9 = vunpack.i.l.bf16 %v8020_v41 }
 0x461   : > { %3478 = vmax.xlane.f32.xlu1 %v3477_v32  ;;  %6017 = vpow2.f32 %v2192_v22  ;;  %v2200_v32 = vsel %vm2138_vm6, %v8113_v42, 0.0  ;;  %v5946_v22 = vunpack.i.l.bf16 %v8034_v35  ;;  %v2206_v42 = vsel %vm2138_vm6, %v8135_v6, 0.0 }
 0x462   : > { %v8196_v33 = vpop.f32.mrb[86].mxu1 }
 0x463   : > { %v5498_v28 = vpop.f32.mrb[87].mxu1  ;;  %v3483_v37 = vsel %vm2138_vm6, %v8196_v33, -inf }
 0x465   : > { %3484 = vmax.xlane.f32.xlu1 %v3483_v37  ;;  %v5947_v37 = vunpack.i.h.bf16 %v8034_v35 }
 0x466   : > { %v8200_v17 = vpop.eup %6011  ;;  %v8202_v48 = vpop.f32.mrb[88].mxu1 }
 0x467   : > { %v5501_v23 = vpop.f32.mrb[89].mxu1  ;;  %5266 = vmatmul.mubr.msk.f32.gmra.mrb[46].mxu0 %vm2138_vm6, %v8200_v17  ;;  %v6014_v45 = vpop.eup %6013  ;;  %v3486_v51 = vsel %vm2163_vm7, %v8202_v48, -inf }
 0x468   : > { %5268 = vmatprep.mubr.msk.f32.mxu0 %vm6205_vm2, %v9099_v29 }
 0x46a   : > { %v8211_v62 = vpop.eup %6015 }
 0x46b   : > { %5269 = vmatmul.mubr.msk.f32.gmra.mrb[48].mxu0 %vm2138_vm6, %v6014_v45  ;;  %v8219_v4 = vpop.eup %6017 }
 0x46c   : > { %5271 = vmatprep.mubr.msk.f32.mxu0 %vm6205_vm2, %v9099_v29 }
 0x46e   : > { %5979 = vrot.lane.b32.xlu0 %v7777_v56, %s6208_s17  ;;  %v3480_v56 = vsel %vm2138_vm6, %v8191_v50, -inf }
 0x46f   : > { %5272 = vmatmul.mubr.msk.f32.gmra.mrb[50].mxu0 %vm2138_vm6, %v8211_v62 }
 0x470   : > { %5274 = vmatprep.mubr.msk.f32.mxu0 %vm6205_vm2, %v9099_v29 }
 0x473   : > { %5275 = vmatmul.mubr.msk.f32.gmra.mrb[52].mxu0 %vm2138_vm6, %v8219_v4 }
 0x474   : > { %5340 = vmatprep.mubr.msk.f32.mxu0 %vm6205_vm2, %v9099_v29 }
 0x476   : > { %3559 = vrot.lane.b32.xlu1 %v7784_v19, %s6208_s17  ;;  %v2194_v19 = vsel %vm2138_vm6, %v8086_v11, 0.0  ;;  %v2197_v11 = vsel %vm2138_vm6, %v8100_v13, 0.0  ;;  %v2203_v13 = vsel %vm2138_vm6, %v8126_v24, 0.0  ;;  %s6211_s17 = smov 24  }
 0x48c   : > { %v2564_v16 = vpop.xlane.xlu0 %2563 }
 0x48d   : > { %v2589_v47 = vsub.f32 %v8024_v39, %v2564_v16  ;;  %3481 = vmax.xlane.f32.xlu0 %v3480_v56  ;;  %v5932_v39 = vunpack.i.h.bf16 %v8020_v41  ;;  %v5957_v16 = vunpack.i.h.bf16 %v8048_v53  ;;  %v5956_v56 = vunpack.i.l.bf16 %v8048_v53 }
 0x48f   : > { %v2598_v49 = vmul.f32 1.442695, %v2589_v47  ;;  %v5770_v47 = vpack.c.bf16 %v5947_v37, %v5946_v22 }
 0x490   : > { %v2567_v55 = vpop.xlane.xlu1 %2566 }
 0x491   : > { %6019 = vpow2.f32 %v2598_v49  ;;  %v2590_v20 = vsub.f32 %v8030_v12, %v2567_v55  ;;  %3487 = vmax.xlane.f32.xlu0 %v3486_v51  ;;  %v2212_v49 = vsel %vm2138_vm6, %v6014_v45, 0.0  ;;  %v5773_v51 = vpack.c.bf16 %v5957_v16, %v5956_v56 }
 0x493   : > { %v2600_v7 = vmul.f32 1.442695, %v2590_v20  ;;  %v5967_v20 = vunpack.i.h.bf16 %v8052_v60 }
 0x494   : > { %v2570_v3 = vpop.xlane.xlu0 %2569 }
 0x495   : > { %6021 = vpow2.f32 %v2600_v7  ;;  %v2591_v10 = vsub.f32 %v8036_v57, %v2570_v3  ;;  %2195 = vadd.xlane.f32.xlu0 %v2194_v19  ;;  %v5767_v57 = vpack.c.bf16 %v5932_v39, %v5931_v9  ;;  %v5966_v7 = vunpack.i.l.bf16 %v8052_v60 }
 0x497   : > { %v2602_v26 = vmul.f32 1.442695, %v2591_v10  ;;  %v5776_v10 = vpack.c.bf16 %v5967_v20, %v5966_v7 }
 0x498   : > { %v2573_v59 = vpop.xlane.xlu0 %2572 }
 0x499   : > { %6023 = vpow2.f32 %v2602_v26  ;;  %v2592_v12 = vsub.f32 %v8044_v25, %v2573_v59  ;;  %2201 = vadd.xlane.f32.xlu0 %v2200_v32 }
 0x49a   : > { %2198 = vadd.xlane.f32.xlu1 %v2197_v11 }
 0x49b   : > { %v6020_v28 = vpop.eup %6019  ;;  %v2604_v41 = vmul.f32 1.442695, %v2592_v12 }
 0x49c   : > { %5341 = vmatmul.mubr.msk.f32.vlgmr.msra.gmra.mrb[54].mxu0 %vm2138_vm6, %v6020_v28  ;;  %v2616_v3 = vsel %vm2138_vm6, %v6020_v28, 0.0 }
 0x49d   : > { %6025 = vpow2.f32 %v2604_v41  ;;  %5768 = vmatpush3.bf16.msra.mxu0 %v5767_v57  ;;  %v2576_v25 = vpop.xlane.xlu1 %2575  ;;  %2207 = vadd.xlane.f32.xlu0 %v2206_v42 }
 0x49e   : > { %v2593_v23 = vsub.f32 %v8050_v14, %v2576_v25  ;;  %2204 = vadd.xlane.f32.xlu1 %v2203_v13  ;;  %5343 = vmatprep.mubr.msk.f32.mxu0 %vm6205_vm2, %v9099_v29  ;;  %v2209_v14 = vsel %vm2138_vm6, %v8200_v17, 0.0  ;;  %v2215_v17 = vsel %vm2138_vm6, %v8211_v62, 0.0 }
 0x49f   : > { %v6022_v35 = vpop.eup %6021  ;;  %5769 = vmatprep.subr.bf16.mxu0 %v9152_v61 }
 0x4a0   : > { %v2606_v6 = vmul.f32 1.442695, %v2593_v23  ;;  %5344 = vmatmul.mubr.msk.f32.gmra.mrb[56].mxu0 %vm2138_vm6, %v6022_v35  ;;  %v2619_v62 = vsel %vm2138_vm6, %v6022_v35, 0.0 }
 0x4a1   : > { %5771 = vmatpush3.bf16.msra.mxu0 %v5770_v47  ;;  %v2579_v24 = vpop.xlane.xlu0 %2578  ;;  %2213 = vadd.xlane.f32.xlu0 %v2212_v49 }
 0x4a2   : > { %6027 = vpow2.f32 %v2606_v6  ;;  %v2594_v55 = vsub.f32 %v8058_v63, %v2579_v24  ;;  %2210 = vadd.xlane.f32.xlu1 %v2209_v14  ;;  %5346 = vmatprep.mubr.msk.f32.mxu0 %vm6205_vm2, %v9099_v29 }
 0x4a3   : > { %v6024_v53 = vpop.eup %6023  ;;  %5772 = vmatprep.subr.bf16.mxu0 %v9152_v61 }
 0x4a4   : > { %v2608_v45 = vmul.f32 1.442695, %v2594_v55  ;;  %5347 = vmatmul.mubr.msk.f32.gmra.mrb[58].mxu0 %vm2138_vm6, %v6024_v53  ;;  %v2622_v32 = vsel %vm2138_vm6, %v6024_v53, 0.0 }
 0x4a5   : > { %5774 = vmatpush3.bf16.msra.mxu0 %v5773_v51  ;;  %v2582_v63 = vpop.xlane.xlu0 %2581  ;;  %2216 = vadd.xlane.f32.xlu0 %v2215_v17  ;;  %v8312_v51 = vpop.permute.xlu1 %5974 }
 0x4a6   : > { %6029 = vpow2.f32 %v2608_v45  ;;  %v2595_v19 = vsub.f32 %v8064_v34, %v2582_v63  ;;  %2617 = vadd.xlane.f32.xlu1 %v2616_v3  ;;  %5349 = vmatprep.mubr.msk.f32.mxu0 %vm6205_vm2, %v9099_v29 }
 0x4a7   : > { %v6026_v60 = vpop.eup %6025  ;;  %5775 = vmatprep.subr.bf16.mxu0 %v9152_v61 }
 0x4a8   : > { %v2610_v39 = vmul.f32 1.442695, %v2595_v19  ;;  %5350 = vmatmul.mubr.msk.f32.gmra.mrb[60].mxu0 %vm2138_vm6, %v6026_v60  ;;  %v2625_v37 = vsel %vm2138_vm6, %v6026_v60, 0.0 }
 0x4a9   : > { %5777 = vmatpush3.bf16.msra.mxu0 %v5776_v10  ;;  %v2585_v9 = vpop.xlane.xlu0 %2584  ;;  %2620 = vadd.xlane.f32.xlu0 %v2619_v62 }
 0x4aa   : > { %6031 = vpow2.f32 %v2610_v39  ;;  %v2596_v26 = vsub.f32 %v8069_v18, %v2585_v9  ;;  %5428 = vmatprep.subr.mxu0 %v9099_v29  ;;  %5352 = vmatprep.mubr.msk.f32.mxu0 %vm6205_vm2, %v9099_v29  ;;  %v5936_v9 = vunpack.i.l.bf16 %v8022_v0 }
 0x4ac   : > { %v6028_v34 = vpop.eup %6027  ;;  %v2612_v59 = vmul.f32 1.442695, %v2596_v26 }
 0x4ad   : > { %5429 = vmatpush3.msk.msra.mxu0 %vm2248_vm5, %v8056_v15  ;;  %v2588_v12 = vpop.xlane.xlu0 %2587  ;;  %2623 = vadd.xlane.f32.xlu0 %v2622_v32  ;;  %v2628_v11 = vsel %vm2138_vm6, %v6028_v34, 0.0 }
 0x4ae   : > { %6033 = vpow2.f32 %v2612_v59  ;;  %v2597_v28 = vsub.f32 %v8074_v1, %v2588_v12  ;;  %5353 = vmatmul.mubr.msk.f32.gmra.mrb[62].mxu0 %vm2138_vm6, %v6028_v34  ;;  %2629 = vadd.xlane.f32.xlu1 %v2628_v11  ;;  %v5972_v12 = vunpack.i.h.bf16 %v8174_v46 }
 0x4af   : > { %5355 = vmatprep.mubr.msk.f32.mxu0 %vm6205_vm2, %v9099_v29  ;;  %5794 = vmatprep.subr.bf16.mxu0 %v9152_v61 }
 0x4b0   : > { %v6030_v18 = vpop.eup %6029  ;;  %v2614_v57 = vmul.f32 1.442695, %v2597_v28 }
 0x4b1   : > { %2626 = vadd.xlane.f32.xlu0 %v2625_v37  ;;  %v2631_v1 = vsel %vm2138_vm6, %v6030_v18, 0.0 }
 0x4b2   : > { %6035 = vpow2.f32 %v2614_v57  ;;  %5356 = vmatmul.mubr.msk.f32.gmra.mrb[64].mxu0 %vm2138_vm6, %v6030_v18 }
 0x4b3   : > { %5358 = vmatprep.mubr.msk.f32.mxu0 %vm6205_vm2, %v9099_v29 }
 0x4b4   : > { %v6032_v15 = vpop.eup %6031 }
 0x4b5   : > { %v3021_v22 = vpop.xlane.xlu0 %3020  ;;  %2632 = vadd.xlane.f32.xlu0 %v2631_v1  ;;  %v2634_v41 = vsel %vm2138_vm6, %v6032_v15, 0.0  ;;  %v5977_v1 = vunpack.i.h.bf16 %v8312_v51 }
 0x4b6   : > { %5359 = vmatmul.mubr.msk.f32.gmra.mrb[66].mxu0 %vm2138_vm6, %v6032_v15  ;;  %2635 = vadd.xlane.f32.xlu1 %v2634_v41  ;;  %v3044_v7 = vsub.f32 %v8090_v40, %v3021_v22 }
 0x4b7   : > { %5361 = vmatprep.mubr.msk.f32.mxu0 %vm6205_vm2, %v9099_v29 }
 0x4b8   : > { %v6034_v42 = vpop.eup %6033  ;;  %v3054_v63 = vmul.f32 1.442695, %v3044_v7 }
 0x4b9   : > { %v3024_v25 = vpop.xlane.xlu0 %3023  ;;  %v2637_v13 = vsel %vm2138_vm6, %v6034_v42, 0.0 }
 0x4ba   : > { %5362 = vmatmul.mubr.msk.f32.gmra.mrb[68].mxu0 %vm2138_vm6, %v6034_v42  ;;  %2638 = vadd.xlane.f32.xlu0 %v2637_v13  ;;  %v3045_v3 = vsub.f32 %v8104_v58, %v3024_v25 }
 0x4bb   : > { %5364 = vmatprep.mubr.msk.f32.mxu0 %vm6205_vm2, %v9099_v29 }
 0x4bc   : > { %v6036_v23 = vpop.eup %6035 }
 0x4bd   : > { %v3027_v35 = vpop.xlane.xlu0 %3026  ;;  %v2640_v16 = vsel %vm2163_vm7, %v6036_v23, 0.0 }
 0x4be   : > { %5365 = vmatmul.mubr.msk.f32.gmra.mrb[70].mxu0 %vm2138_vm6, %v6036_v23  ;;  %v3046_v56 = vsub.f32 %v8117_v30, %v3027_v35  ;;  %2641 = vadd.xlane.f32.xlu1 %v2640_v16 }
 0x4bf   : > { %5430 = vmatprep.mubr.msk.f32.mxu0 %vm6205_vm2, %v9099_v29 }
 0x4c0   : > { %v3058_v47 = vmul.f32 1.442695, %v3046_v56 }
 0x4c2   : > { %6037 = vpow2.f32 %v3058_v47 }
 0x4c5   : > { %v3033_v6 = vpop.xlane.xlu0 %3032 }
 0x4c6   : > { %v3048_v49 = vsub.f32 %v8137_v5, %v3033_v6 }
 0x4c8   : > { %v3062_v24 = vmul.f32 1.442695, %v3048_v49 }
 0x4ca   : > { %6039 = vpow2.f32 %v3062_v24 }
 0x4cc   : > { %v8308_v14 = vpop.eup %6037 }
 0x4cd   : > { %v3039_v55 = vpop.xlane.xlu0 %3038  ;;  %v3079_v53 = vsel %vm2138_vm6, %v8308_v14, 0.0 }
 0x4ce   : > { %v3050_v30 = vsub.f32 %v8150_v36, %v3039_v55  ;;  %3080 = vadd.xlane.f32.xlu1 %v3079_v53  ;;  %v3056_v36 = vmul.f32 1.442695, %v3045_v3 }
 0x4d0   : > { %v3066_v20 = vmul.f32 1.442695, %v3050_v30 }
 0x4d1   : > { %v3042_v59 = vpop.xlane.xlu0 %3041 }
 0x4d2   : > { %6041 = vpow2.f32 %v3066_v20  ;;  %v3018_v45 = vpop.xlane.xlu1 %3017  ;;  %v3051_v18 = vsub.f32 %v8154_v38, %v3042_v59  ;;  %v5976_v38 = vunpack.i.l.bf16 %v8312_v51 }
 0x4d3   : > { %v3043_v5 = vsub.f32 %v8083_v27, %v3018_v45  ;;  %v5937_v27 = vunpack.i.h.bf16 %v8022_v0 }
 0x4d4   : > { %v8317_v17 = vpop.eup %6039  ;;  %v5801_v16 = vpack.c.bf16 %v5977_v1, %v5976_v38 }
 0x4d5   : > { %v3052_v19 = vmul.f32 1.442695, %v3043_v5  ;;  %v3085_v60 = vsel %vm2138_vm6, %v8317_v17, 0.0  ;;  %v5795_v28 = vpack.c.bf16 %v5937_v27, %v5936_v9 }
 0x4d6   : > { %v3030_v10 = vpop.xlane.xlu1 %3029  ;;  %3086 = vadd.xlane.f32.xlu1 %v3085_v60 }
 0x4d7   : > { %6043 = vpow2.f32 %v3052_v19  ;;  %v3047_v40 = vsub.f32 %v8128_v2, %v3030_v10  ;;  %v5971_v2 = vunpack.i.l.bf16 %v8174_v46  ;;  %v3068_v46 = vmul.f32 1.442695, %v3051_v18 }
 0x4d8   : > { %6045 = vpow2.f32 %v3054_v63 }
 0x4d9   : > { %6047 = vpow2.f32 %v3056_v36  ;;  %v3060_v58 = vmul.f32 1.442695, %v3047_v40  ;;  %v5798_v15 = vpack.c.bf16 %v5972_v12, %v5971_v2 }
 0x4da   : > { %v3036_v39 = vpop.xlane.xlu1 %3035 }
 0x4db   : > { %v3049_v26 = vsub.f32 %v8148_v21, %v3036_v39  ;;  %6049 = vpow2.f32 %v3060_v58 }
 0x4dc   : > { %v8323_v62 = vpop.eup %6041 }
 0x4dd   : > { %v3091_v34 = vsel %vm2138_vm6, %v8323_v62, 0.0  ;;  %v3064_v0 = vmul.f32 1.442695, %v3049_v26 }
 0x4de   : > { %v3464_v32 = vpop.xlane.xlu1 %3463  ;;  %3092 = vadd.xlane.f32.xlu1 %v3091_v34 }
 0x4df   : > { %6051 = vpow2.f32 %v3064_v0  ;;  %v3489_v22 = vsub.f32 %v8160_v31, %v3464_v32 }
 0x4e0   : > { %6053 = vpow2.f32 %v3068_v46 }
 0x4e1   : > { %v6044_v11 = vpop.eup %6043  ;;  %v3498_v31 = vmul.f32 1.442695, %v3489_v22 }
 0x4e2   : > { %5431 = vmatmul.mubr.msk.f32.vlgmr.msra.gmra.mrb[72].mxu0 %vm2138_vm6, %v6044_v11  ;;  %v3467_v57 = vpop.xlane.xlu1 %3466  ;;  %v3070_v21 = vsel %vm2138_vm6, %v6044_v11, 0.0  ;;  %v6046_v37 = vpop.eup %6045 }
 0x4e3   : > { %5796 = vmatpush3.bf16.msra.mxu0 %v5795_v28  ;;  %3071 = vadd.xlane.f32.xlu0 %v3070_v21  ;;  %v3073_v13 = vsel %vm2138_vm6, %v6046_v37, 0.0  ;;  %v6048_v23 = vpop.eup %6047  ;;  %v3490_v56 = vsub.f32 %v8164_v44, %v3467_v57 }
 0x4e4   : > { %5433 = vmatprep.mubr.msk.f32.mxu0 %vm6205_vm2, %v9099_v29  ;;  %5797 = vmatprep.subr.bf16.mxu0 %v9152_v61  ;;  %v3076_v24 = vsel %vm2138_vm6, %v6048_v23, 0.0 }
 0x4e5   : > { %v3476_v41 = vpop.xlane.xlu0 %3475  ;;  %v6050_v55 = vpop.eup %6049  ;;  %v3500_v44 = vmul.f32 1.442695, %v3490_v56 }
 0x4e6   : > { %v3493_v42 = vsub.f32 %v8178_v43, %v3476_v41  ;;  %5434 = vmatmul.mubr.msk.f32.gmra.mrb[74].mxu0 %vm2138_vm6, %v6046_v37  ;;  %v3470_v25 = vpop.xlane.xlu1 %3469  ;;  %v3082_v20 = vsel %vm2138_vm6, %v6050_v55, 0.0 }
 0x4e7   : > { %5799 = vmatpush3.bf16.msra.mxu0 %v5798_v15  ;;  %3074 = vadd.xlane.f32.xlu0 %v3073_v13  ;;  %v3491_v51 = vsub.f32 %v8168_v54, %v3470_v25 }
 0x4e8   : > { %v3506_v35 = vmul.f32 1.442695, %v3493_v42  ;;  %5436 = vmatprep.mubr.msk.f32.mxu0 %vm6205_vm2, %v9099_v29  ;;  %5800 = vmatprep.subr.bf16.mxu0 %v9152_v61 }
 0x4e9   : > { %v5980_v43 = vpop.permute.xlu0 %5979  ;;  %v6052_v7 = vpop.eup %6051  ;;  %v3502_v45 = vmul.f32 1.442695, %v3491_v51 }
 0x4ea   : > { %6055 = vpow2.f32 %v3506_v35  ;;  %v5982_v47 = vunpack.i.h.bf16 %v5980_v43  ;;  %v5981_v6 = vunpack.i.l.bf16 %v5980_v43  ;;  %5437 = vmatmul.mubr.msk.f32.gmra.mrb[76].mxu0 %vm2138_vm6, %v6048_v23  ;;  %v3473_v49 = vpop.xlane.xlu1 %3472  ;;  %v6054_v63 = vpop.eup %6053 }
 0x4eb   : > { %5802 = vmatpush3.bf16.msra.mxu0 %v5801_v16  ;;  %3077 = vadd.xlane.f32.xlu0 %v3076_v24  ;;  %6057 = vpow2.f32 %v3498_v31  ;;  %v3492_v5 = vsub.f32 %v8172_v8, %v3473_v49  ;;  %v3094_v36 = vsel %vm2163_vm7, %v6054_v63, 0.0 }
 0x4ec   : > { %v5804_v53 = vpack.c.bf16 %v5982_v47, %v5981_v6  ;;  %5439 = vmatprep.mubr.msk.f32.mxu0 %vm6205_vm2, %v9099_v29  ;;  %5803 = vmatprep.subr.bf16.mxu0 %v9152_v61  ;;  %6059 = vpow2.f32 %v3500_v44 }
 0x4ed   : > { %6061 = vpow2.f32 %v3502_v45  ;;  %v3504_v19 = vmul.f32 1.442695, %v3492_v5 }
 0x4ee   : > { %5440 = vmatmul.mubr.msk.f32.gmra.mrb[78].mxu0 %vm2138_vm6, %v8308_v14  ;;  %v3479_v30 = vpop.xlane.xlu1 %3478  ;;  %v3088_v14 = vsel %vm2138_vm6, %v6052_v7, 0.0 }
 0x4ef   : > { %5805 = vmatpush3.bf16.msra.mxu0 %v5804_v53  ;;  %3083 = vadd.xlane.f32.xlu0 %v3082_v20  ;;  %v3494_v60 = vsub.f32 %v8186_v52, %v3479_v30  ;;  %6063 = vpow2.f32 %v3504_v19 }
 0x4f0   : > { %5442 = vmatprep.mubr.msk.f32.mxu0 %vm6205_vm2, %v9099_v29  ;;  %5518 = vmatprep.subr.mxu0 %v9099_v29 }
 0x4f1   : > { %v3508_v52 = vmul.f32 1.442695, %v3494_v60 }
 0x4f2   : > { %5443 = vmatmul.mubr.msk.f32.gmra.mrb[80].mxu0 %vm2138_vm6, %v6050_v55  ;;  %v3485_v54 = vpop.xlane.xlu1 %3484 }
 0x4f3   : > { %3089 = vadd.xlane.f32.xlu0 %v3088_v14  ;;  %5445 = vmatprep.mubr.msk.f32.mxu0 %vm6205_vm2, %v9099_v29  ;;  %v3496_v39 = vsub.f32 %v8196_v33, %v3485_v54  ;;  %6065 = vpow2.f32 %v3508_v52 }
 0x4f4   : > { %v6056_v3 = vpop.eup %6055 }
 0x4f5   : > { %v3528_v10 = vsel %vm2138_vm6, %v6056_v3, 0.0  ;;  %v6058_v40 = vpop.eup %6057  ;;  %v3512_v26 = vmul.f32 1.442695, %v3496_v39 }
 0x4f6   : > { %5446 = vmatmul.mubr.msk.f32.gmra.mrb[82].mxu0 %vm2138_vm6, %v8317_v17  ;;  %3529 = vadd.xlane.f32.xlu1 %v3528_v10  ;;  %v3560_v8 = vpop.permute.xlu1 %3559  ;;  %v3516_v17 = vsel %vm2138_vm6, %v6058_v40, 0.0  ;;  %v6060_v58 = vpop.eup %6059 }
 0x4f7   : > { %5519 = vmatpush3.msk.msra.mxu0 %vm2248_vm5, %v3560_v8  ;;  %3095 = vadd.xlane.f32.xlu0 %v3094_v36  ;;  %v3519_v33 = vsel %vm2138_vm6, %v6060_v58, 0.0  ;;  %v6062_v32 = vpop.eup %6061  ;;  %6067 = vpow2.f32 %v3512_v26 }
 0x4f8   : > { %5448 = vmatprep.mubr.msk.f32.mxu0 %vm6205_vm2, %v9099_v29  ;;  %5812 = vmatprep.subr.bf16.mxu0 %v9152_v61  ;;  %v3522_v2 = vsel %vm2138_vm6, %v6062_v32, 0.0 }
 0x4f9   : > { %v8375_v27 = vpop.f32.mrb[36].mxu0  ;;  %v6064_v28 = vpop.eup %6063 }
 0x4fa   : > { %5449 = vmatmul.mubr.msk.f32.gmra.mrb[84].mxu0 %vm2138_vm6, %v6052_v7  ;;  %v5252_v9 = vpop.f32.mrb[37].mxu0  ;;  %v3525_v18 = vsel %vm2138_vm6, %v6064_v28, 0.0 }
 0x4fb   : > { %3517 = vadd.xlane.f32.xlu0 %v3516_v17  ;;  %5451 = vmatprep.mubr.msk.f32.mxu0 %vm6205_vm2, %v9099_v29 }
 0x4fd   : > { %v8381_v34 = vpop.f32.mrb[38].mxu0  ;;  %v6066_v57 = vpop.eup %6065 }
 0x4fe   : > { %5452 = vmatmul.mubr.msk.f32.gmra.mrb[86].mxu0 %vm2138_vm6, %v8323_v62  ;;  %v5255_v59 = vpop.f32.mrb[39].mxu0  ;;  %v3531_v37 = vsel %vm2138_vm6, %v6066_v57, 0.0 }
 0x4ff   : > { %3520 = vadd.xlane.f32.xlu0 %v3519_v33  ;;  %5454 = vmatprep.mubr.msk.f32.mxu0 %vm6205_vm2, %v9099_v29 }
 0x501   : > { %v8388_v12 = vpop.f32.mrb[40].mxu0  ;;  %v6068_v1 = vpop.eup %6067 }
 0x502   : > { %5455 = vmatmul.mubr.msk.f32.gmra.mrb[88].mxu0 %vm2138_vm6, %v6054_v63  ;;  %v5258_v11 = vpop.f32.mrb[41].mxu0  ;;  %v3537_v38 = vsel %vm2138_vm6, %v6068_v1, 0.0 }
 0x503   : > { %3523 = vadd.xlane.f32.xlu0 %v3522_v2  ;;  %5520 = vmatprep.mubr.msk.f32.mxu0 %vm6205_vm2, %v9099_v29 }
 0x505   : > { %v8394_v62 = vpop.f32.mrb[42].mxu0 }
 0x506   : > { %5521 = vmatmul.mubr.msk.f32.vlgmr.msra.gmra.mrb[90].mxu0 %vm2138_vm6, %v6058_v40  ;;  %v5261_v0 = vpop.f32.mrb[43].mxu0 }
 0x507   : > { %3526 = vadd.xlane.f32.xlu0 %v3525_v18  ;;  %5523 = vmatprep.mubr.msk.f32.mxu0 %vm6205_vm2, %v9099_v29 }
 0x509   : > { %v2338_v21 = vpop.f32.mrb[44].mxu0 }
 0x50a   : > { %5524 = vmatmul.mubr.msk.f32.gmra.mrb[92].mxu0 %vm2138_vm6, %v6060_v58  ;;  %v5264_v15 = vpop.f32.mrb[45].mxu0 }
 0x50b   : > { %3532 = vadd.xlane.f32.xlu0 %v3531_v37  ;;  %5526 = vmatprep.mubr.msk.f32.mxu0 %vm6205_vm2, %v9099_v29 }
 0x50e   : > { %5527 = vmatmul.mubr.msk.f32.gmra.mrb[94].mxu0 %vm2138_vm6, %v6062_v32 }
 0x50f   : > { %3538 = vadd.xlane.f32.xlu0 %v3537_v38  ;;  %5529 = vmatprep.mubr.msk.f32.mxu0 %vm6205_vm2, %v9099_v29 }
 0x512   : > { %5530 = vmatmul.mubr.msk.f32.gmra.mrb[96].mxu0 %vm2138_vm6, %v6064_v28 }
 0x513   : > { %5532 = vmatprep.mubr.msk.f32.mxu0 %vm6205_vm2, %v9099_v29 }
 0x516   : > { %5533 = vmatmul.mubr.msk.f32.gmra.mrb[98].mxu0 %vm2138_vm6, %v6056_v3 }
 0x517   : > { %5535 = vmatprep.mubr.msk.f32.mxu0 %vm6205_vm2, %v9099_v29 }
 0x51a   : > { %v3482_v46 = vpop.xlane.xlu0 %3481  ;;  %5536 = vmatmul.mubr.msk.f32.gmra.mrb[100].mxu0 %vm2138_vm6, %v6066_v57 }
 0x51b   : > { %v3495_v22 = vsub.f32 %v8191_v50, %v3482_v46  ;;  %5538 = vmatprep.mubr.msk.f32.mxu0 %vm6205_vm2, %v9099_v29 }
 0x51d   : > { %v3510_v41 = vmul.f32 1.442695, %v3495_v22 }
 0x51e   : > { %v3488_v42 = vpop.xlane.xlu0 %3487 }
 0x51f   : > { %6069 = vpow2.f32 %v3510_v41  ;;  %v3497_v25 = vsub.f32 %v8202_v48, %v3488_v42 }
 0x521   : > { %v3514_v13 = vmul.f32 1.442695, %v3497_v25 }
 0x522   : > { %v8419_v23 = vpop.xlane.xlu0 %2195 }
 0x523   : > { %6071 = vpow2.f32 %v3514_v13 }
 0x526   : > { %v2202_v35 = vpop.xlane.xlu0 %2201 }
 0x527   : > { %6073 = vrcp.f32 %v2202_v35  ;;  %v2199_v16 = vpop.xlane.xlu1 %2198 }
 0x528   : > { %6075 = vrcp.f32 %v2199_v16 }
 0x529   : > { %v6070_v31 = vpop.eup %6069 }
 0x52a   : > { %5539 = vmatmul.mubr.msk.f32.gmra.mrb[102].mxu0 %vm2138_vm6, %v6070_v31  ;;  %v2208_v50 = vpop.xlane.xlu0 %2207  ;;  %v3534_v56 = vsel %vm2138_vm6, %v6070_v31, 0.0 }
 0x52b   : > { %6077 = vrcp.f32 %v2208_v50  ;;  %3535 = vadd.xlane.f32.xlu1 %v3534_v56  ;;  %v2205_v43 = vpop.xlane.xlu1 %2204  ;;  %5541 = vmatprep.mubr.msk.f32.mxu0 %vm6205_vm2, %v9099_v29 }
 0x52c   : > { %6079 = vrcp.f32 %v2205_v43 }
 0x52d   : > { %v6072_v48 = vpop.eup %6071 }
 0x52e   : > { %5542 = vmatmul.mubr.msk.f32.gmra.mrb[104].mxu0 %vm2138_vm6, %v6068_v1  ;;  %v3540_v47 = vsel %vm2163_vm7, %v6072_v48, 0.0  ;;  %v2214_v6 = vpop.xlane.xlu0 %2213 }
 0x52f   : > { %v2211_v49 = vpop.xlane.xlu1 %2210  ;;  %3541 = vadd.xlane.f32.xlu1 %v3540_v47  ;;  %5544 = vmatprep.mubr.msk.f32.mxu0 %vm6205_vm2, %v9099_v29 }
 0x530   : > { %6081 = vrcp.f32 %v2211_v49 }
 0x531   : > { %v6074_v24 = vpop.eup %6073  ;;  %6083 = vrcp.f32 %v2214_v6 }
 0x532   : > { %v6076_v55 = vpop.eup %6075  ;;  %5545 = vmatmul.mubr.msk.f32.gmra.mrb[106].mxu0 %vm2138_vm6, %v6072_v48  ;;  %v8431_v53 = vmul.f32 %v6074_v24, %v8388_v12  ;;  %v2217_v30 = vpop.xlane.xlu0 %2216 }
 0x533   : > { %v8434_v44 = vmul.f32 %v6076_v55, %v8381_v34  ;;  %5590 = vmatprep.mubr.msk.f32.mxu0 %vm6205_vm2, %v9099_v29  ;;  %6085 = vrcp.f32 %v2217_v30  ;;  %v2618_v9 = vpop.xlane.xlu1 %2617 }
 0x534   : > { %6087 = vrcp.f32 %v2618_v9 }
 0x535   : > { %v6078_v51 = vpop.eup %6077 }
 0x536   : > { %v6080_v20 = vpop.eup %6079  ;;  %v8438_v7 = vmul.f32 %v6078_v51, %v2338_v21  ;;  %v2621_v58 = vpop.xlane.xlu0 %2620 }
 0x537   : > { %v8441_v45 = vmul.f32 %v6080_v20, %v8394_v62  ;;  %6089 = vrcp.f32 %v2621_v58 }
 0x53a   : > { %v6082_v5 = vpop.eup %6081  ;;  %v2343_v54 = vpop.f32.mrb[46].mxu0 }
 0x53b   : > { %v8443_v14 = vmul.f32 %v6082_v5, %v2343_v54  ;;  %v5267_v63 = vpop.f32.mrb[47].mxu0  ;;  %v6084_v3 = vpop.eup %6083 }
 0x53c   : > { %v2624_v26 = vpop.xlane.xlu0 %2623  ;;  %v2630_v0 = vpop.xlane.xlu1 %2629 }
 0x53d   : > { %v6086_v8 = vpop.eup %6085 }
 0x53e   : > { %v2348_v19 = vpop.f32.mrb[48].mxu0  ;;  %v6088_v34 = vpop.eup %6087 }
 0x53f   : > { %v8445_v60 = vmul.f32 %v6084_v3, %v2348_v19  ;;  %v5270_v10 = vpop.f32.mrb[49].mxu0 }
 0x540   : > { %v2627_v11 = vpop.xlane.xlu0 %2626 }
 0x541   : > { %v6090_v12 = vpop.eup %6089 }
 0x542   : > { %v2353_v36 = vpop.f32.mrb[50].mxu0 }
 0x543   : > { %v8447_v40 = vmul.f32 %v6086_v8, %v2353_v36  ;;  %v5273_v52 = vpop.f32.mrb[51].mxu0  ;;  %v2636_v15 = vpop.xlane.xlu1 %2635 }
 0x544   : > { %v8453_v21 = vpop.xlane.xlu0 %2632  ;;  %6091 = vrcp.f32 %v2636_v15 }
 0x546   : > { %v8449_v39 = vpop.f32.mrb[52].mxu0 }
 0x547   : > { %v5276_v17 = vpop.f32.mrb[53].mxu0 }
 0x548   : > { %v2639_v38 = vpop.xlane.xlu0 %2638 }
 0x549   : > { %6093 = vrcp.f32 %v2639_v38  ;;  %v3863_v38 = vld [vmem:[%s8898_s8] sm:$0xff] }
 0x54b   : > { %v2642_v41 = vpop.xlane.xlu1 %2641 }
 0x54c   : > { %6095 = vrcp.f32 %v2642_v41 }
 0x54e   : > { %v6092_v13 = vpop.eup %6091 }
 0x553   : > { %v6094_v50 = vpop.eup %6093 }
 0x556   : > { %v6096_v47 = vpop.eup %6095 }
 0x55b   : > { %v3081_v17 = vpop.xlane.xlu1 %3080 }
 0x56f   : > { %v2772_v33 = vpop.f32.mrb[54].mxu0 }
 0x570   : > { %v2825_v59 = vmul.f32 %v6088_v34, %v2772_v33  ;;  %v5342_v32 = vpop.f32.mrb[55].mxu0  ;;  %v3072_v55 = vpop.xlane.xlu0 %3071 }
 0x571   : > { %6097 = vrcp.f32 %v3072_v55 }
 0x572   : > { %3735 = vrot.lane.b32.xlu1 %v2825_v59, %s6209_s18 }
 0x573   : > { %v2777_v2 = vpop.f32.mrb[56].mxu0 }
 0x574   : > { %v2826_v28 = vmul.f32 %v6090_v12, %v2777_v2  ;;  %v5345_v62 = vpop.f32.mrb[57].mxu0  ;;  %v3075_v51 = vpop.xlane.xlu0 %3074 }
 0x575   : > { %6099 = vrcp.f32 %v3075_v51 }
 0x576   : > { %3737 = vrot.lane.b32.xlu1 %v2826_v28, %s6209_s18  ;;  %6101 = vrcp.f32 %v2624_v26 }
 0x577   : > { %v2782_v18 = vpop.f32.mrb[58].mxu0 }
 0x578   : > { %v5348_v57 = vpop.f32.mrb[59].mxu0  ;;  %v3078_v30 = vpop.xlane.xlu0 %3077 }
 0x579   : > { %6103 = vrcp.f32 %v3078_v30 }
 0x57a   : > { %6105 = vrcp.f32 %v2627_v11 }
 0x57b   : > { %v8455_v37 = vpop.f32.mrb[60].mxu0  ;;  %v6098_v5 = vpop.eup %6097 }
 0x57c   : > { %v5351_v1 = vpop.f32.mrb[61].mxu0  ;;  %v3084_v20 = vpop.xlane.xlu0 %3083 }
 0x57d   : > { %6107 = vrcp.f32 %v3084_v20 }
 0x57e   : > { %6109 = vrcp.f32 %v3081_v17 }
 0x57f   : > { %v6100_v19 = vpop.eup %6099  ;;  %6111 = vrcp.f32 %v2630_v0  ;;  %v3864_v0 = vld [vmem:[%s8898_s8 + $0x8] sm:$0xff] }
 0x580   : > { %v3090_v8 = vpop.xlane.xlu0 %3089  ;;  %v6102_v9 = vpop.eup %6101  ;;  %6113 = vrcp.f32 %v8453_v21  ;;  %v5807_v41 = vpack.c.bf16 %v3864_v0, %v3863_v38  ;;  %v3865_v21 = vld [vmem:[%s8898_s8 + $0x10] sm:$0xff] }
 0x581   : > { %v8457_v46 = vpop.f32.mrb[62].mxu0  ;;  %v2827_v26 = vmul.f32 %v6102_v9, %v2782_v18 }
 0x582   : > { %v5354_v22 = vpop.f32.mrb[63].mxu0  ;;  %5808 = vmatpush3.bf16.msra.mxu1 %v5807_v41 }
 0x583   : > { %v6104_v59 = vpop.eup %6103  ;;  %v3087_v22 = vpop.xlane.xlu1 %3086  ;;  %5809 = vmatprep.subr.bf16.mxu1 %v9152_v61 }
 0x584   : > { %v8469_v33 = vpop.xlane.xlu0 %3095  ;;  %v6106_v11 = vpop.eup %6105  ;;  %6115 = vrcp.f32 %v3087_v22 }
 0x585   : > { %v8459_v42 = vpop.f32.mrb[64].mxu0  ;;  %v2828_v57 = vmul.f32 %v6106_v11, %v8455_v37  ;;  %6117 = vrcp.f32 %v3090_v8 }
 0x586   : > { %v5357_v25 = vpop.f32.mrb[65].mxu0 }
 0x587   : > { %v6108_v28 = vpop.eup %6107 }
 0x588   : > { %v3518_v15 = vpop.xlane.xlu0 %3517  ;;  %v6110_v25 = vpop.eup %6109 }
 0x589   : > { %v2802_v35 = vpop.f32.mrb[66].mxu0  ;;  %6119 = vrcp.f32 %v3518_v15 }
 0x58a   : > { %v8461_v16 = vmul.f32 %v6092_v13, %v2802_v35  ;;  %v5360_v31 = vpop.f32.mrb[67].mxu0 }
 0x58b   : > { %v3866_v31 = vld [vmem:[%s8898_s8 + $0x18] sm:$0xff] }
 0x58d   : > { %v2807_v56 = vpop.f32.mrb[68].mxu0 }
 0x58e   : > { %v8463_v43 = vmul.f32 %v6094_v50, %v2807_v56  ;;  %v5363_v48 = vpop.f32.mrb[69].mxu0  ;;  %v3521_v50 = vpop.xlane.xlu0 %3520  ;;  %v5810_v56 = vpack.c.bf16 %v3866_v31, %v3865_v21 }
 0x58f   : > { %v6112_v48 = vpop.eup %6111  ;;  %6121 = vrcp.f32 %v3521_v50 }
 0x590   : > { %5811 = vmatpush3.bf16.msra.mxu1 %v5810_v56  ;;  %v6114_v55 = vpop.eup %6113 }
 0x591   : > { %v2812_v6 = vpop.f32.mrb[70].mxu0  ;;  %5818 = vmatprep.subr.bf16.mxu1 %v9152_v61  ;;  %v2830_v30 = vmul.f32 %v6114_v55, %v8459_v42 }
 0x592   : > { %v8465_v49 = vmul.f32 %v6096_v47, %v2812_v6  ;;  %v5366_v24 = vpop.f32.mrb[71].mxu0  ;;  %v2829_v6 = vmul.f32 %v6112_v48, %v8457_v46  ;;  %v3524_v20 = vpop.xlane.xlu0 %3523  ;;  %v2218_v48 = vsel %vm2163_vm7, %v8219_v4, 0.0 }
 0x593   : > { %6123 = vrcp.f32 %v3524_v20 }
 0x596   : > { %v3527_v8 = vpop.xlane.xlu0 %3526 }
 0x597   : > { %6125 = vrcp.f32 %v3527_v8 }
 0x5b5   : > { %v3218_v54 = vpop.f32.mrb[72].mxu0 }
 0x5b6   : > { %v3271_v63 = vmul.f32 %v6098_v5, %v3218_v54  ;;  %v5432_v3 = vpop.f32.mrb[73].mxu0  ;;  %v6116_v54 = vpop.eup %6115 }
 0x5b8   : > { %3771 = vrot.lane.b32.xlu0 %v3271_v63, %s6210_s19 }
 0x5b9   : > { %v3223_v10 = vpop.f32.mrb[74].mxu0 }
 0x5ba   : > { %v3272_v36 = vmul.f32 %v6100_v19, %v3223_v10  ;;  %v5435_v52 = vpop.f32.mrb[75].mxu0  ;;  %v6118_v19 = vpop.eup %6117 }
 0x5bb   : > { %v3093_v10 = vpop.xlane.xlu1 %3092 }
 0x5bc   : > { %3773 = vrot.lane.b32.xlu0 %v3272_v36, %s6210_s19  ;;  %v6120_v36 = vpop.eup %6119 }
 0x5bd   : > { %v3228_v58 = vpop.f32.mrb[76].mxu0 }
 0x5be   : > { %v5438_v34 = vpop.f32.mrb[77].mxu0  ;;  %v3273_v12 = vmul.f32 %v6104_v59, %v3228_v58 }
 0x5bf   : > { %v3530_v58 = vpop.xlane.xlu1 %3529 }
 0x5c0   : > { %3739 = vrot.lane.b32.xlu0 %v2827_v26, %s6209_s18  ;;  %v6122_v26 = vpop.eup %6121  ;;  %6127 = vrcp.f32 %v3530_v58 }
 0x5c1   : > { %v3233_v32 = vpop.f32.mrb[78].mxu0 }
 0x5c2   : > { %v5441_v2 = vpop.f32.mrb[79].mxu0  ;;  %v3274_v13 = vmul.f32 %v6110_v25, %v3233_v32 }
 0x5c3   : > { %v6124_v2 = vpop.eup %6123 }
 0x5c4   : > { %3775 = vrot.lane.b32.xlu0 %v3273_v12, %s6210_s19  ;;  %v3533_v12 = vpop.xlane.xlu0 %3532 }
 0x5c5   : > { %v3238_v62 = vpop.f32.mrb[80].mxu0  ;;  %6129 = vrcp.f32 %v3533_v12 }
 0x5c6   : > { %v8474_v18 = vmul.f32 %v6108_v28, %v3238_v62  ;;  %v5444_v1 = vpop.f32.mrb[81].mxu0 }
 0x5c8   : > { %3741 = vrot.lane.b32.xlu0 %v2828_v57, %s6209_s18  ;;  %v6126_v57 = vpop.eup %6125  ;;  %v3539_v31 = vpop.xlane.xlu0 %3538 }
 0x5c9   : > { %v3243_v37 = vpop.f32.mrb[82].mxu0  ;;  %6131 = vrcp.f32 %v3539_v31 }
 0x5ca   : > { %v5447_v35 = vpop.f32.mrb[83].mxu0  ;;  %v3276_v63 = vmul.f32 %v6116_v54, %v3243_v37  ;;  %v6128_v0 = vpop.eup %6127  ;;  %6133 = vrcp.f32 %v8469_v33 }
 0x5cb   : > { %6135 = vrcp.f32 %v3093_v10 }
 0x5cc   : > { %3777 = vrot.lane.b32.xlu0 %v3274_v13, %s6210_s19 }
 0x5cd   : > { %v3248_v47 = vpop.f32.mrb[84].mxu0 }
 0x5ce   : > { %v5450_v24 = vpop.f32.mrb[85].mxu0  ;;  %v3277_v17 = vmul.f32 %v6118_v19, %v3248_v47 }
 0x5cf   : > { %v6130_v37 = vpop.eup %6129 }
 0x5d0   : > { %3743 = vrot.lane.b32.xlu0 %v2829_v6, %s6209_s18 }
 0x5d1   : > { %v8495_v51 = vpop.f32.mrb[86].mxu0 }
 0x5d2   : > { %v5453_v5 = vpop.f32.mrb[87].mxu0 }
 0x5d3   : > { %v6132_v47 = vpop.eup %6131 }
 0x5d4   : > { %3745 = vrot.lane.b32.xlu0 %v2830_v30, %s6209_s18  ;;  %v6134_v30 = vpop.eup %6133 }
 0x5d5   : > { %v3258_v46 = vpop.f32.mrb[88].mxu0  ;;  %v6136_v33 = vpop.eup %6135 }
 0x5d6   : > { %v5456_v3 = vpop.f32.mrb[89].mxu0  ;;  %v3279_v5 = vmul.f32 %v6134_v30, %v3258_v46 }
 0x5d8   : > { %3781 = vrot.lane.b32.xlu0 %v3276_v63, %s6210_s19  ;;  %v3278_v63 = vmul.f32 %v6136_v33, %v8495_v51 }
 0x5d9   : > { %v3664_v52 = vpop.f32.mrb[90].mxu0 }
 0x5da   : > { %v3717_v9 = vmul.f32 %v6120_v36, %v3664_v52  ;;  %v5522_v42 = vpop.f32.mrb[91].mxu0 }
 0x5dc   : > { %3783 = vrot.lane.b32.xlu0 %v3277_v17, %s6210_s19  ;;  %3807 = vrot.lane.b32.xlu1 %v3717_v9, %s6211_s17 }
 0x5dd   : > { %v3669_v34 = vpop.f32.mrb[92].mxu0 }
 0x5de   : > { %v3718_v59 = vmul.f32 %v6122_v26, %v3669_v34  ;;  %v5525_v32 = vpop.f32.mrb[93].mxu0 }
 0x5e0   : > { %3809 = vrot.lane.b32.xlu0 %v3718_v59, %s6211_s17 }
 0x5e1   : > { %v3674_v11 = vpop.f32.mrb[94].mxu0 }
 0x5e2   : > { %v3719_v28 = vmul.f32 %v6124_v2, %v3674_v11  ;;  %v5528_v62 = vpop.f32.mrb[95].mxu0 }
 0x5e4   : > { %3811 = vrot.lane.b32.xlu0 %v3719_v28, %s6211_s17 }
 0x5e5   : > { %v3679_v15 = vpop.f32.mrb[96].mxu0 }
 0x5e6   : > { %v3720_v1 = vmul.f32 %v6126_v57, %v3679_v15  ;;  %v5531_v38 = vpop.f32.mrb[97].mxu0 }
 0x5e8   : > { %3813 = vrot.lane.b32.xlu0 %v3720_v1, %s6211_s17 }
 0x5e9   : > { %v3684_v22 = vpop.f32.mrb[98].mxu0 }
 0x5ea   : > { %v3721_v41 = vmul.f32 %v6128_v0, %v3684_v22  ;;  %v5534_v25 = vpop.f32.mrb[99].mxu0 }
 0x5ec   : > { %3815 = vrot.lane.b32.xlu0 %v3721_v41, %s6211_s17 }
 0x5ed   : > { %v3689_v13 = vpop.f32.mrb[100].mxu0 }
 0x5ee   : > { %v3722_v35 = vmul.f32 %v6130_v37, %v3689_v13  ;;  %v5537_v21 = vpop.f32.mrb[101].mxu0 }
 0x5f0   : > { %3817 = vrot.lane.b32.xlu0 %v3722_v35, %s6211_s17 }
 0x5f4   : > { %3749 = vrot.lane.b32.xlu0 %v8463_v43, %s6209_s18  ;;  %v3536_v43 = vpop.xlane.xlu1 %3535 }
 0x5f5   : > { %6137 = vrcp.f32 %v3536_v43 }
 0x5f8   : > { %v3542_v4 = vpop.xlane.xlu1 %3541 }
 0x5f9   : > { %6139 = vrcp.f32 %v3542_v4 }
 0x5fa   : > { %6141 = vrcp.f32 %v8419_v23 }
 0x5fc   : > { %v3736_v42 = vpop.permute.xlu1 %3735 }
 0x5fd   : > { %v3694_v50 = vpop.f32.mrb[102].mxu0 }
 0x5fe   : > { %v5540_v56 = vpop.f32.mrb[103].mxu0 }
 0x5ff   : > { %v6138_v46 = vpop.eup %6137 }
 0x600   : > { %2219 = vadd.xlane.f32.xlu1 %v2218_v48  ;;  %v3723_v3 = vmul.f32 %v6138_v46, %v3694_v50  ;;  %v3738_v34 = vpop.permute.xlu1 %3737 }
 0x601   : > { %v3699_v6 = vpop.f32.mrb[104].mxu0 }
 0x602   : > { %v3724_v24 = vmul.f32 %v6132_v47, %v3699_v6  ;;  %v5543_v55 = vpop.f32.mrb[105].mxu0 }
 0x603   : > { %v6140_v19 = vpop.eup %6139 }
 0x604   : > { %3821 = vrot.lane.b32.xlu0 %v3724_v24, %s6211_s17  ;;  %v6142_v26 = vpop.eup %6141 }
 0x605   : > { %v3704_v20 = vpop.f32.mrb[106].mxu0  ;;  %v2371_v32 = vmul.f32 %v6142_v26, %v8375_v27 }
 0x606   : > { %v5546_v54 = vpop.f32.mrb[107].mxu0  ;;  %v3725_v10 = vmul.f32 %v6140_v19, %v3704_v20 }
 0x607   : > { %v3834_v23 = vsel %vm1973_vm3, %v2371_v32, %v3736_v42 }
 0x608   : > { %3787 = vrot.lane.b32.xlu0 %v3279_v5, %s6210_s19 }
 0x611   : > { %3779 = vrot.lane.b32.xlu1 %v8474_v18, %s6210_s19 }
 0x615   : > { %3747 = vrot.lane.b32.xlu1 %v8461_v16, %s6209_s18 }
 0x619   : > { %3785 = vrot.lane.b32.xlu1 %v3278_v63, %s6210_s19 }
 0x61d   : > { %3819 = vrot.lane.b32.xlu1 %v3723_v3, %s6211_s17  ;;  %v4823_v3 = vld [vmem:[%s8899_s9] ss:$0 sm:$0xff] }
 0x621   : > { %3751 = vrot.lane.b32.xlu1 %v8465_v49, %s6209_s18 }
 0x625   : > { %3823 = vrot.lane.b32.xlu1 %v3725_v10, %s6211_s17 }
 0x62a   : > { %v3772_v18 = vpop.permute.xlu0 %3771 }
 0x62b   : > { %v3844_v2 = vsel %vm3843_vm8, %v3834_v23, %v3772_v18 }
 0x62e   : > { %v3774_v8 = vpop.permute.xlu0 %3773 }
 0x632   : > { %v3740_v16 = vpop.permute.xlu0 %3739 }
 0x633   : > { %v3836_v15 = vsel %vm1973_vm3, %v8431_v53, %v3740_v16 }
 0x636   : > { %v3776_v36 = vpop.permute.xlu0 %3775 }
 0x637   : > { %v3846_v1 = vsel %vm3843_vm8, %v3836_v15, %v3776_v36  ;;  %v6189_v15 = vld [vmem:[%s6313_s27 + $0x20] sm:$0xff] }
 0x63a   : > { %v3742_v52 = vpop.permute.xlu0 %3741 }
 0x63b   : > { %v3837_v0 = vsel %vm1973_vm3, %v8441_v45, %v3742_v52 }
 0x63e   : > { %v3778_v51 = vpop.permute.xlu0 %3777 }
 0x63f   : > { %v3847_v22 = vsel %vm3843_vm8, %v3837_v0, %v3778_v51 }
 0x642   : > { %v3744_v17 = vpop.permute.xlu0 %3743 }
 0x643   : > { %v3838_v9 = vsel %vm1973_vm3, %v8438_v7, %v3744_v17 }
 0x646   : > { %v3746_v58 = vpop.permute.xlu0 %3745 }
 0x647   : > { %v3839_v49 = vsel %vm1973_vm3, %v8443_v14, %v3746_v58  ;;  %v3835_v14 = vsel %vm1973_vm3, %v8434_v44, %v3738_v34 }
 0x648   : > { %v3845_v27 = vsel %vm3843_vm8, %v3835_v14, %v3774_v8  ;;  %v6185_v8 = vld [vmem:[%s6313_s27] sm:$0xff] }
 0x64a   : > { %v3782_v59 = vpop.permute.xlu0 %3781 }
 0x64b   : > { %v3849_v12 = vsel %vm3843_vm8, %v3839_v49, %v3782_v59  ;;  %v6187_v59 = vld [vmem:[%s6313_s27 + $0x10] sm:$0xff] }
 0x64e   : > { %v3808_v11 = vpop.permute.xlu1 %3807  ;;  %v3784_v7 = vpop.permute.xlu0 %3783 }
 0x64f   : > { %v3854_v28 = vsel %vm3853_vm9, %v3844_v2, %v3808_v11 }
 0x650   : > { %5556 = vmatmul.mubr.msk.f32.vlgmr.msra.gmra.mrb[90].mxu1 %vm533_vm0, %v3854_v28 }
 0x651   : > { %5558 = vmatprep.mubr.msk.f32.mxu1 %vm6205_vm2, %v9099_v29 }
 0x652   : > { %v3810_v62 = vpop.permute.xlu0 %3809 }
 0x653   : > { %v3855_v57 = vsel %vm3853_vm9, %v3845_v27, %v3810_v62 }
 0x654   : > { %5559 = vmatmul.mubr.msk.f32.gmra.mrb[92].mxu1 %vm533_vm0, %v3855_v57 }
 0x655   : > { %5561 = vmatprep.mubr.msk.f32.mxu1 %vm6205_vm2, %v9099_v29 }
 0x656   : > { %v3812_v38 = vpop.permute.xlu0 %3811 }
 0x657   : > { %v3856_v44 = vsel %vm3853_vm9, %v3846_v1, %v3812_v38 }
 0x658   : > { %5562 = vmatmul.mubr.msk.f32.gmra.mrb[94].mxu1 %vm533_vm0, %v3856_v44 }
 0x659   : > { %5564 = vmatprep.mubr.msk.f32.mxu1 %vm6205_vm2, %v9099_v29 }
 0x65a   : > { %v3814_v41 = vpop.permute.xlu0 %3813 }
 0x65b   : > { %v3857_v53 = vsel %vm3853_vm9, %v3847_v22, %v3814_v41  ;;  %v6190_v41 = vld [vmem:[%s6313_s27 + $0x28] sm:$0xff] }
 0x65c   : > { %5565 = vmatmul.mubr.msk.f32.gmra.mrb[96].mxu1 %vm533_vm0, %v3857_v53 }
 0x65d   : > { %5567 = vmatprep.mubr.msk.f32.mxu1 %vm6205_vm2, %v9099_v29 }
 0x65e   : > { %v3816_v37 = vpop.permute.xlu0 %3815 }
 0x662   : > { %v3818_v21 = vpop.permute.xlu0 %3817 }
 0x663   : > { %v3859_v50 = vsel %vm3853_vm9, %v3849_v12, %v3818_v21 }
 0x666   : > { %v3750_v48 = vpop.permute.xlu0 %3749 }
 0x667   : > { %v3841_v30 = vsel %vm1973_vm3, %v8447_v40, %v3750_v48 }
 0x676   : > { %v3822_v20 = vpop.permute.xlu0 %3821 }
 0x67a   : > { %v3788_v40 = vpop.permute.xlu0 %3787 }
 0x68d   : > { %v2220_v25 = vpop.xlane.xlu1 %2219 }
 0x68e   : > { %6143 = vrcp.f32 %v2220_v25 }
 0x691   : > { %v3780_v13 = vpop.permute.xlu1 %3779 }
 0x692   : > { %v3848_v35 = vsel %vm3843_vm8, %v3838_v9, %v3780_v13  ;;  %v6186_v9 = vld [vmem:[%s6313_s27 + $0x8] sm:$0xff] }
 0x693   : > { %v3858_v45 = vsel %vm3853_vm9, %v3848_v35, %v3816_v37 }
 0x694   : > { %5568 = vmatmul.mubr.msk.f32.gmra.mrb[98].mxu1 %vm533_vm0, %v3858_v45  ;;  %v6191_v45 = vld [vmem:[%s6313_s27 + $0x30] sm:$0xff] }
 0x695   : > { %v3748_v31 = vpop.permute.xlu1 %3747  ;;  %5570 = vmatprep.mubr.msk.f32.mxu1 %vm6205_vm2, %v9099_v29 }
 0x696   : > { %v3840_v47 = vsel %vm1973_vm3, %v8445_v60, %v3748_v31 }
 0x697   : > { %v3850_v55 = vsel %vm3843_vm8, %v3840_v47, %v3784_v7  ;;  %v6188_v7 = vld [vmem:[%s6313_s27 + $0x18] sm:$0xff] }
 0x698   : > { %5571 = vmatmul.mubr.msk.f32.gmra.mrb[100].mxu1 %vm533_vm0, %v3859_v50  ;;  %v6144_v6 = vpop.eup %6143  ;;  %v6192_v47 = vld [vmem:[%s6313_s27 + $0x38] sm:$0xff] }
 0x699   : > { %v3786_v56 = vpop.permute.xlu1 %3785  ;;  %5573 = vmatprep.mubr.msk.f32.mxu1 %vm6205_vm2, %v9099_v29  ;;  %v2379_v43 = vmul.f32 %v6144_v6, %v8449_v39 }
 0x69a   : > { %v3851_v54 = vsel %vm3843_vm8, %v3841_v30, %v3786_v56 }
 0x69b   : > { %v3861_v33 = vsel %vm3853_vm9, %v3851_v54, %v3822_v20 }
 0x69d   : > { %v3820_v24 = vpop.permute.xlu1 %3819 }
 0x69e   : > { %v3860_v5 = vsel %vm3853_vm9, %v3850_v55, %v3820_v24 }
 0x69f   : > { %5574 = vmatmul.mubr.msk.f32.gmra.mrb[102].mxu1 %vm533_vm0, %v3860_v5  ;;  %v6193_v5 = vld [vmem:[%s6313_s27 + $0x40] sm:$0x1] }
 0x6a0   : > { %5576 = vmatprep.mubr.msk.f32.mxu1 %vm6205_vm2, %v9099_v29 }
 0x6a1   : > { %v3752_v60 = vpop.permute.xlu1 %3751 }
 0x6a2   : > { %v3842_v4 = vsel %vm1973_vm3, %v2379_v43, %v3752_v60 }
 0x6a3   : > { %5577 = vmatmul.mubr.msk.f32.gmra.mrb[104].mxu1 %vm533_vm0, %v3861_v33  ;;  %v3852_v46 = vsel %vm3843_vm8, %v3842_v4, %v3788_v40 }
 0x6a4   : > { %5579 = vmatprep.mubr.msk.f32.mxu1 %vm6205_vm2, %v9099_v29 }
 0x6a5   : > { %v3824_v63 = vpop.permute.xlu1 %3823 }
 0x6a6   : > { %v3862_v39 = vsel %vm3853_vm9, %v3852_v46, %v3824_v63 }
 0x6a7   : > { %5580 = vmatmul.mubr.msk.f32.gmra.mrb[106].mxu1 %vm533_vm0, %v3862_v39 }
 0x6a8   : > { %5649 = vmatprep.mubr.msk.f32.mxu1 %vm6205_vm2, %v9099_v29 }
 0x723   : > { %v3967_v19 = vpop.f32.mrb[90].mxu1 }
 0x724   : > { %v3968_v10 = vadd.f32 %v4823_v3, %v3967_v19  ;;  %v5557_v18 = vpop.f32.mrb[91].mxu1 }
 0x726   : > { %v8592_v16 = vadd.f32 %v6185_v8, %v3968_v10 }
 0x727   : > { %v3972_v36 = vpop.f32.mrb[92].mxu1 }
 0x728   : > { %v3973_v52 = vadd.f32 %v4823_v3, %v3972_v36  ;;  %v5560_v51 = vpop.f32.mrb[93].mxu1  ;;  %v4022_v17 = vsel %vm533_vm0, %v8592_v16, 0.0 }
 0x729   : > { %4023 = vadd.xlane.f32.xlu0 %v4022_v17 }
 0x72a   : > { %v8597_v42 = vadd.f32 %v6186_v9, %v3973_v52 }
 0x72b   : > { %v3977_v58 = vpop.f32.mrb[94].mxu1 }
 0x72c   : > { %v3978_v49 = vadd.f32 %v4823_v3, %v3977_v58  ;;  %v5563_v26 = vpop.f32.mrb[95].mxu1  ;;  %v4025_v34 = vsel %vm533_vm0, %v8597_v42, 0.0 }
 0x72d   : > { %4026 = vadd.xlane.f32.xlu1 %v4025_v34  ;;  %v4169_v34 = vld [vmem:[%s8902_s12] sm:$0xff] }
 0x72e   : > { %v8602_v32 = vadd.f32 %v6187_v59, %v3978_v49  ;;  %v4170_v59 = vld [vmem:[%s8902_s12 + $0x8] sm:$0xff] }
 0x72f   : > { %v3982_v12 = vpop.f32.mrb[96].mxu1 }
 0x730   : > { %v3983_v23 = vadd.f32 %v4823_v3, %v3982_v12  ;;  %v5566_v2 = vpop.f32.mrb[97].mxu1  ;;  %v4028_v11 = vsel %vm533_vm0, %v8602_v32, 0.0  ;;  %v4171_v12 = vld [vmem:[%s8902_s12 + $0x10] sm:$0xff] }
 0x731   : > { %4029 = vadd.xlane.f32.xlu0 %v4028_v11  ;;  %v4172_v2 = vld [vmem:[%s8902_s12 + $0x18] sm:$0xff] }
 0x732   : > { %v8607_v28 = vadd.f32 %v6188_v7, %v3983_v23  ;;  %v5813_v23 = vpack.c.bf16 %v4170_v59, %v4169_v34  ;;  %v5816_v11 = vpack.c.bf16 %v4172_v2, %v4171_v12  ;;  %v8719_v34 = vld [vmem:[%s8901_s11] ss:$0 sm:$0xff] }
 0x734   : > { %v4031_v14 = vsel %vm533_vm0, %v8607_v28, 0.0  ;;  %5814 = vmatpush3.bf16.msra.mxu0 %v5813_v23 }
 0x735   : > { %4032 = vadd.xlane.f32.xlu0 %v4031_v14  ;;  %5815 = vmatprep.subr.bf16.mxu0 %v9152_v61 }
 0x738   : > { %5817 = vmatpush3.bf16.msra.mxu0 %v5816_v11 }
 0x767   : > { %v3987_v27 = vpop.f32.mrb[98].mxu1 }
 0x768   : > { %v3988_v62 = vadd.f32 %v4823_v3, %v3987_v27  ;;  %v5569_v57 = vpop.f32.mrb[99].mxu1 }
 0x76a   : > { %v8612_v1 = vadd.f32 %v6189_v15, %v3988_v62 }
 0x76b   : > { %v3992_v38 = vpop.f32.mrb[100].mxu1 }
 0x76c   : > { %v3993_v44 = vadd.f32 %v4823_v3, %v3992_v38  ;;  %v5572_v0 = vpop.f32.mrb[101].mxu1  ;;  %v4034_v22 = vsel %vm533_vm0, %v8612_v1, 0.0 }
 0x76d   : > { %4035 = vadd.xlane.f32.xlu1 %v4034_v22 }
 0x76e   : > { %v8617_v53 = vadd.f32 %v6190_v41, %v3993_v44 }
 0x770   : > { %v4037_v25 = vsel %vm533_vm0, %v8617_v53, 0.0 }
 0x771   : > { %4038 = vadd.xlane.f32.xlu0 %v4037_v25 }
 0x772   : > { %v3997_v37 = vpop.f32.mrb[102].mxu1 }
 0x773   : > { %v3998_v13 = vadd.f32 %v4823_v3, %v3997_v37  ;;  %v5575_v35 = vpop.f32.mrb[103].mxu1 }
 0x775   : > { %v8622_v21 = vadd.f32 %v6191_v45, %v3998_v13 }
 0x776   : > { %v4002_v31 = vpop.f32.mrb[104].mxu1 }
 0x777   : > { %v4003_v50 = vadd.f32 %v4823_v3, %v4002_v31  ;;  %v5578_v56 = vpop.f32.mrb[105].mxu1  ;;  %v4040_v48 = vsel %vm533_vm0, %v8622_v21, 0.0 }
 0x778   : > { %4041 = vadd.xlane.f32.xlu1 %v4040_v48 }
 0x779   : > { %v8627_v6 = vadd.f32 %v6192_v47, %v4003_v50 }
 0x77a   : > { %v4007_v24 = vpop.f32.mrb[106].mxu1 }
 0x77b   : > { %v4008_v55 = vadd.f32 %v4823_v3, %v4007_v24  ;;  %v5581_v30 = vpop.f32.mrb[107].mxu1  ;;  %v4043_v20 = vsel %vm533_vm0, %v8627_v6, 0.0 }
 0x77c   : > { %4044 = vadd.xlane.f32.xlu0 %v4043_v20 }
 0x77d   : > { %v8632_v54 = vadd.f32 %v6193_v5, %v4008_v55  ;;  %v4398_v5 = vld [vmem:[%s8904_s14] sm:$0xff] }
 0x77f   : > { %v4046_v43 = vsel %vm558_vm1, %v8632_v54, 0.0 }
 0x780   : > { %4047 = vadd.xlane.f32.xlu1 %v4046_v43  ;;  %v4399_v43 = vld [vmem:[%s8904_s14 + $0x8] sm:$0xff] }
 0x7b6   : > { %v4024_v60 = vpop.xlane.xlu0 %4023 }
 0x7b7   : > { %v4049_v4 = vmul.f32 0.03125, %v4024_v60  ;;  %v5819_v60 = vpack.c.bf16 %v4399_v43, %v4398_v5 }
 0x7b9   : > { %v8637_v33 = vsub.f32 %v8592_v16, %v4049_v4  ;;  %5820 = vmatpush3.bf16.msra.mxu1 %v5819_v60 }
 0x7ba   : > { %v4027_v40 = vpop.xlane.xlu1 %4026  ;;  %5821 = vmatprep.subr.bf16.mxu1 %v9152_v61 }
 0x7bb   : > { %v4050_v63 = vmul.f32 0.03125, %v4027_v40  ;;  %v4067_v46 = vmul.f32 %v8637_v33, %v8637_v33 }
 0x7bd   : > { %v8642_v39 = vsub.f32 %v8597_v42, %v4050_v63  ;;  %v4076_v3 = vsel %vm533_vm0, %v4067_v46, 0.0 }
 0x7be   : > { %v4030_v19 = vpop.xlane.xlu0 %4029  ;;  %4077 = vadd.xlane.f32.xlu0 %v4076_v3 }
 0x7bf   : > { %v4051_v10 = vmul.f32 0.03125, %v4030_v19  ;;  %v4068_v18 = vmul.f32 %v8642_v39, %v8642_v39 }
 0x7c1   : > { %v8648_v8 = vsub.f32 %v8602_v32, %v4051_v10  ;;  %v4079_v36 = vsel %vm533_vm0, %v4068_v18, 0.0 }
 0x7c2   : > { %v4033_v52 = vpop.xlane.xlu0 %4032  ;;  %4080 = vadd.xlane.f32.xlu1 %v4079_v36 }
 0x7c3   : > { %v4052_v51 = vmul.f32 0.03125, %v4033_v52  ;;  %v4069_v17 = vmul.f32 %v8648_v8, %v8648_v8 }
 0x7c5   : > { %v8654_v9 = vsub.f32 %v8607_v28, %v4052_v51  ;;  %v4082_v58 = vsel %vm533_vm0, %v4069_v17, 0.0 }
 0x7c6   : > { %4083 = vadd.xlane.f32.xlu0 %v4082_v58  ;;  %v8713_v58 = vld [vmem:[%s8900_s10] ss:$0 sm:$0xff] }
 0x7c7   : > { %v4070_v49 = vmul.f32 %v8654_v9, %v8654_v9 }
 0x7c9   : > { %v4085_v26 = vsel %vm533_vm0, %v4070_v49, 0.0 }
 0x7ca   : > { %4086 = vadd.xlane.f32.xlu1 %v4085_v26 }
 0x7fa   : > { %v4036_v7 = vpop.xlane.xlu1 %4035 }
 0x7fb   : > { %v4053_v14 = vmul.f32 0.03125, %v4036_v7 }
 0x7fd   : > { %v8674_v27 = vsub.f32 %v8612_v1, %v4053_v14 }
 0x7fe   : > { %v4039_v62 = vpop.xlane.xlu0 %4038 }
 0x7ff   : > { %v4054_v57 = vmul.f32 0.03125, %v4039_v62  ;;  %v4071_v15 = vmul.f32 %v8674_v27, %v8674_v27 }
 0x801   : > { %v8679_v38 = vsub.f32 %v8617_v53, %v4054_v57  ;;  %v4088_v44 = vsel %vm533_vm0, %v4071_v15, 0.0 }
 0x802   : > { %4089 = vadd.xlane.f32.xlu0 %v4088_v44 }
 0x803   : > { %v4072_v0 = vmul.f32 %v8679_v38, %v8679_v38 }
 0x805   : > { %v4042_v22 = vpop.xlane.xlu1 %4041  ;;  %v4091_v41 = vsel %vm533_vm0, %v4072_v0, 0.0 }
 0x806   : > { %v4055_v25 = vmul.f32 0.03125, %v4042_v22  ;;  %4092 = vadd.xlane.f32.xlu1 %v4091_v41 }
 0x808   : > { %v8686_v37 = vsub.f32 %v8622_v21, %v4055_v25 }
 0x809   : > { %v4045_v13 = vpop.xlane.xlu0 %4044 }
 0x80a   : > { %v4056_v35 = vmul.f32 0.03125, %v4045_v13  ;;  %v4073_v45 = vmul.f32 %v8686_v37, %v8686_v37 }
 0x80c   : > { %v8691_v31 = vsub.f32 %v8627_v6, %v4056_v35  ;;  %v4094_v50 = vsel %vm533_vm0, %v4073_v45, 0.0 }
 0x80d   : > { %4095 = vadd.xlane.f32.xlu0 %v4094_v50  ;;  %v4048_v56 = vpop.xlane.xlu1 %4047 }
 0x80e   : > { %v4057_v48 = vmul.f32 0.03125, %v4048_v56  ;;  %v4074_v47 = vmul.f32 %v8691_v31, %v8691_v31 }
 0x810   : > { %v8697_v24 = vsub.f32 %v8632_v54, %v4057_v48  ;;  %v4097_v55 = vsel %vm533_vm0, %v4074_v47, 0.0 }
 0x811   : > { %4098 = vadd.xlane.f32.xlu1 %v4097_v55 }
 0x812   : > { %v4075_v30 = vmul.f32 %v8697_v24, %v8697_v24 }
 0x814   : > { %v4100_v20 = vsel %vm558_vm1, %v4075_v30, 0.0 }
 0x815   : > { %4101 = vadd.xlane.f32.xlu0 %v4100_v20 }
 0x84b   : > { %v4078_v4 = vpop.xlane.xlu0 %4077 }
 0x84c   : > { %v4103_v40 = vmul.f32 0.03125, %v4078_v4 }
 0x84e   : > { %v4112_v63 = vadd.f32 1e-05, %v4103_v40 }
 0x84f   : > { %v4081_v46 = vpop.xlane.xlu1 %4080 }
 0x850   : > { %6145 = vrsqrt.f32 %v4112_v63  ;;  %v4104_v3 = vmul.f32 0.03125, %v4081_v46 }
 0x852   : > { %v4113_v19 = vadd.f32 1e-05, %v4104_v3 }
 0x853   : > { %v4084_v10 = vpop.xlane.xlu0 %4083 }
 0x854   : > { %6147 = vrsqrt.f32 %v4113_v19  ;;  %v4105_v18 = vmul.f32 0.03125, %v4084_v10 }
 0x856   : > { %v4114_v36 = vadd.f32 1e-05, %v4105_v18 }
 0x857   : > { %v4087_v52 = vpop.xlane.xlu1 %4086 }
 0x858   : > { %6149 = vrsqrt.f32 %v4114_v36  ;;  %v4106_v51 = vmul.f32 0.03125, %v4087_v52 }
 0x85a   : > { %v6146_v17 = vpop.eup %6145  ;;  %v4115_v49 = vadd.f32 1e-05, %v4106_v51 }
 0x85b   : > { %v4130_v26 = vmul.f32 %v6146_v17, %v8637_v33 }
 0x85c   : > { %6151 = vrsqrt.f32 %v4115_v49 }
 0x85d   : > { %v4145_v59 = vmul.f32 %v8713_v58, %v4130_v26  ;;  %v4400_v26 = vld [vmem:[%s8904_s14 + $0x10] sm:$0xff] }
 0x85e   : > { %v6148_v12 = vpop.eup %6147 }
 0x85f   : > { %v4160_v23 = vadd.f32 %v8719_v34, %v4145_v59  ;;  %v4131_v2 = vmul.f32 %v6148_v12, %v8642_v39  ;;  %v4401_v59 = vld [vmem:[%s8904_s14 + $0x18] sm:$0xff]  ;;  %v4403_v12 = vld [vmem:[%s8904_s14 + $0x28] sm:$0xff] }
 0x861   : > { %5591 = vmatmul.mubr.msk.f32.vlgmr.msra.gmra.mrb[108].mxu0 %vm533_vm0, %v4160_v23  ;;  %v4146_v11 = vmul.f32 %v8713_v58, %v4131_v2  ;;  %v4404_v23 = vld [vmem:[%s8904_s14 + $0x30] sm:$0xff]  ;;  %v4405_v2 = vld [vmem:[%s8904_s14 + $0x38] sm:$0xff] }
 0x862   : > { %v6150_v7 = vpop.eup %6149  ;;  %5593 = vmatprep.mubr.msk.f32.mxu0 %vm6205_vm2, %v9099_v29 }
 0x863   : > { %v4161_v33 = vadd.f32 %v8719_v34, %v4146_v11  ;;  %v4132_v14 = vmul.f32 %v6150_v7, %v8648_v8  ;;  %v5828_v11 = vpack.c.bf16 %v4405_v2, %v4404_v23  ;;  %v4406_v7 = vld [vmem:[%s8904_s14 + $0x40] sm:$0xff] }
 0x865   : > { %5594 = vmatmul.mubr.msk.f32.gmra.mrb[110].mxu0 %vm533_vm0, %v4161_v33  ;;  %v4147_v62 = vmul.f32 %v8713_v58, %v4132_v14  ;;  %v4407_v33 = vld [vmem:[%s8904_s14 + $0x48] sm:$0xff] }
 0x866   : > { %v6152_v57 = vpop.eup %6151  ;;  %5596 = vmatprep.mubr.msk.f32.mxu0 %vm6205_vm2, %v9099_v29  ;;  %v5831_v14 = vpack.c.bf16 %v4407_v33, %v4406_v7 }
 0x867   : > { %v4162_v39 = vadd.f32 %v8719_v34, %v4147_v62  ;;  %v4133_v15 = vmul.f32 %v6152_v57, %v8654_v9  ;;  %v4408_v62 = vld [vmem:[%s8904_s14 + $0x50] sm:$0xff]  ;;  %v4409_v57 = vld [vmem:[%s8904_s14 + $0x58] sm:$0xff] }
 0x869   : > { %5597 = vmatmul.mubr.msk.f32.gmra.mrb[112].mxu0 %vm533_vm0, %v4162_v39  ;;  %v4148_v44 = vmul.f32 %v8713_v58, %v4133_v15  ;;  %v5834_v39 = vpack.c.bf16 %v4409_v57, %v4408_v62  ;;  %v4410_v15 = vld [vmem:[%s8904_s14 + $0x60] sm:$0xff] }
 0x86a   : > { %5599 = vmatprep.mubr.msk.f32.mxu0 %vm6205_vm2, %v9099_v29 }
 0x86b   : > { %v4163_v8 = vadd.f32 %v8719_v34, %v4148_v44  ;;  %v4411_v44 = vld [vmem:[%s8904_s14 + $0x68] sm:$0xff] }
 0x86d   : > { %5600 = vmatmul.mubr.msk.f32.gmra.mrb[114].mxu0 %vm533_vm0, %v4163_v8  ;;  %v5837_v8 = vpack.c.bf16 %v4411_v44, %v4410_v15 }
 0x86e   : > { %5602 = vmatprep.mubr.msk.f32.mxu0 %vm6205_vm2, %v9099_v29 }
 0x88f   : > { %v4090_v0 = vpop.xlane.xlu0 %4089 }
 0x890   : > { %v4107_v22 = vmul.f32 0.03125, %v4090_v0  ;;  %v4412_v0 = vld [vmem:[%s8904_s14 + $0x70] sm:$0xff] }
 0x892   : > { %v4116_v41 = vadd.f32 1e-05, %v4107_v22  ;;  %v4413_v22 = vld [vmem:[%s8904_s14 + $0x78] sm:$0xff] }
 0x893   : > { %v4093_v25 = vpop.xlane.xlu1 %4092 }
 0x894   : > { %6153 = vrsqrt.f32 %v4116_v41  ;;  %v4108_v9 = vmul.f32 0.03125, %v4093_v25  ;;  %v5840_v41 = vpack.c.bf16 %v4413_v22, %v4412_v0  ;;  %v8823_v25 = vld [vmem:[%s8903_s13] ss:$0 sm:$0xff] }
 0x896   : > { %v4117_v13 = vadd.f32 1e-05, %v4108_v9 }
 0x898   : > { %6155 = vrsqrt.f32 %v4117_v13 }
 0x89a   : > { %v4096_v35 = vpop.xlane.xlu0 %4095 }
 0x89b   : > { %v4109_v45 = vmul.f32 0.03125, %v4096_v35 }
 0x89d   : > { %v4118_v50 = vadd.f32 1e-05, %v4109_v45 }
 0x89e   : > { %v6154_v56 = vpop.eup %6153  ;;  %v4099_v48 = vpop.xlane.xlu1 %4098 }
 0x89f   : > { %6157 = vrsqrt.f32 %v4118_v50  ;;  %v4110_v47 = vmul.f32 0.03125, %v4099_v48  ;;  %v4134_v55 = vmul.f32 %v6154_v56, %v8674_v27 }
 0x8a1   : > { %v4119_v30 = vadd.f32 1e-05, %v4110_v47  ;;  %v4149_v20 = vmul.f32 %v8713_v58, %v4134_v55 }
 0x8a2   : > { %v6156_v5 = vpop.eup %6155  ;;  %v4102_v43 = vpop.xlane.xlu0 %4101 }
 0x8a3   : > { %6159 = vrsqrt.f32 %v4119_v30  ;;  %v4111_v60 = vmul.f32 0.03125, %v4102_v43  ;;  %v4164_v4 = vadd.f32 %v8719_v34, %v4149_v20  ;;  %v4135_v40 = vmul.f32 %v6156_v5, %v8679_v38 }
 0x8a5   : > { %v4120_v63 = vadd.f32 1e-05, %v4111_v60  ;;  %5603 = vmatmul.mubr.msk.f32.gmra.mrb[116].mxu0 %vm533_vm0, %v4164_v4  ;;  %v4150_v46 = vmul.f32 %v8713_v58, %v4135_v40 }
 0x8a6   : > { %5605 = vmatprep.mubr.msk.f32.mxu0 %vm6205_vm2, %v9099_v29 }
 0x8a7   : > { %6161 = vrsqrt.f32 %v4120_v63  ;;  %v4165_v27 = vadd.f32 %v8719_v34, %v4150_v46 }
 0x8a9   : > { %v6158_v3 = vpop.eup %6157  ;;  %5606 = vmatmul.mubr.msk.f32.gmra.mrb[118].mxu0 %vm533_vm0, %v4165_v27 }
 0x8aa   : > { %5608 = vmatprep.mubr.msk.f32.mxu0 %vm6205_vm2, %v9099_v29  ;;  %v4136_v19 = vmul.f32 %v6158_v3, %v8686_v37 }
 0x8ac   : > { %v4151_v38 = vmul.f32 %v8713_v58, %v4136_v19 }
 0x8ad   : > { %v6160_v10 = vpop.eup %6159 }
 0x8ae   : > { %v4166_v18 = vadd.f32 %v8719_v34, %v4151_v38  ;;  %v4137_v36 = vmul.f32 %v6160_v10, %v8691_v31 }
 0x8b0   : > { %5609 = vmatmul.mubr.msk.f32.gmra.mrb[120].mxu0 %vm533_vm0, %v4166_v18  ;;  %v4152_v52 = vmul.f32 %v8713_v58, %v4137_v36 }
 0x8b1   : > { %v6162_v51 = vpop.eup %6161  ;;  %5611 = vmatprep.mubr.msk.f32.mxu0 %vm6205_vm2, %v9099_v29 }
 0x8b2   : > { %v4167_v17 = vadd.f32 %v8719_v34, %v4152_v52  ;;  %v4138_v49 = vmul.f32 %v6162_v51, %v8697_v24  ;;  %v4402_v24 = vld [vmem:[%s8904_s14 + $0x20] sm:$0xff] }
 0x8b4   : > { %5612 = vmatmul.mubr.msk.f32.gmra.mrb[122].mxu0 %vm533_vm0, %v4167_v17  ;;  %v4153_v37 = vmul.f32 %v8713_v58, %v4138_v49  ;;  %v5822_v58 = vpack.c.bf16 %v4401_v59, %v4400_v26 }
 0x8b5   : > { %5614 = vmatprep.mubr.msk.f32.mxu0 %vm6205_vm2, %v9099_v29 }
 0x8b6   : > { %v4168_v31 = vadd.f32 %v8719_v34, %v4153_v37  ;;  %5823 = vmatpush3.bf16.msra.mxu1 %v5822_v58  ;;  %v5825_v34 = vpack.c.bf16 %v4403_v12, %v4402_v24 }
 0x8b7   : > { %5824 = vmatprep.subr.bf16.mxu1 %v9152_v61 }
 0x8b8   : > { %5615 = vmatmul.mubr.msk.f32.gmra.mrb[124].mxu0 %vm533_vm0, %v4168_v31 }
 0x8ba   : > { %5826 = vmatpush3.bf16.msra.mxu1 %v5825_v34 }
 0x8bb   : > { %5827 = vmatprep.subr.bf16.mxu1 %v9152_v61 }
 0x8be   : > { %5829 = vmatpush3.bf16.msra.mxu1 %v5828_v11 }
 0x8bf   : > { %5830 = vmatprep.subr.bf16.mxu1 %v9152_v61 }
 0x8c2   : > { %5832 = vmatpush3.bf16.msra.mxu1 %v5831_v14 }
 0x8c3   : > { %5833 = vmatprep.subr.bf16.mxu1 %v9152_v61 }
 0x8c6   : > { %5835 = vmatpush3.bf16.msra.mxu1 %v5834_v39 }
 0x8c7   : > { %5836 = vmatprep.subr.bf16.mxu1 %v9152_v61 }
 0x8ca   : > { %5838 = vmatpush3.bf16.msra.mxu1 %v5837_v8 }
 0x8cb   : > { %5839 = vmatprep.subr.bf16.mxu1 %v9152_v61 }
 0x8ce   : > { %5841 = vmatpush3.bf16.msra.mxu1 %v5840_v41 }
 0x934   : > { %v4273_v9 = vpop.f32.mrb[108].mxu0 }
 0x935   : > { %v4274_v13 = vadd.f32 %v8823_v25, %v4273_v9  ;;  %v5592_v35 = vpop.f32.mrb[109].mxu0 }
 0x937   : > { %v4326_v45 = vmul.f32 0.044715, %v4274_v13  ;;  %v4317_v59 = vmul.f32 0.5, %v4274_v13 }
 0x938   : > { %v4278_v50 = vpop.f32.mrb[110].mxu0 }
 0x939   : > { %v4335_v56 = vmul.f32 %v4326_v45, %v4274_v13  ;;  %v4279_v48 = vadd.f32 %v8823_v25, %v4278_v50  ;;  %v5595_v47 = vpop.f32.mrb[111].mxu0 }
 0x93b   : > { %v4344_v55 = vmul.f32 %v4335_v56, %v4274_v13  ;;  %v4327_v30 = vmul.f32 0.044715, %v4279_v48  ;;  %v4318_v34 = vmul.f32 0.5, %v4279_v48 }
 0x93c   : > { %v4283_v20 = vpop.f32.mrb[112].mxu0 }
 0x93d   : > { %v4353_v61 = vadd.f32 %v4344_v55, %v4274_v13  ;;  %v4336_v5 = vmul.f32 %v4327_v30, %v4279_v48  ;;  %v4284_v43 = vadd.f32 %v8823_v25, %v4283_v20  ;;  %v5598_v60 = vpop.f32.mrb[113].mxu0 }
 0x93f   : > { %v4362_v4 = vmul.f32 0.7978846, %v4353_v61  ;;  %v4328_v40 = vmul.f32 0.044715, %v4284_v43  ;;  %v4345_v63 = vmul.f32 %v4336_v5, %v4279_v48  ;;  %v4319_v7 = vmul.f32 0.5, %v4284_v43 }
 0x940   : > { %v4288_v46 = vpop.f32.mrb[114].mxu0 }
 0x941   : > { %6163 = vtanh.f32 %v4362_v4  ;;  %v4337_v27 = vmul.f32 %v4328_v40, %v4284_v43  ;;  %v4289_v3 = vadd.f32 %v8823_v25, %v4288_v46  ;;  %v5601_v19 = vpop.f32.mrb[115].mxu0  ;;  %v4354_v38 = vadd.f32 %v4345_v63, %v4279_v48 }
 0x943   : > { %v4329_v10 = vmul.f32 0.044715, %v4289_v3  ;;  %v4363_v18 = vmul.f32 0.7978846, %v4354_v38  ;;  %v4346_v36 = vmul.f32 %v4337_v27, %v4284_v43  ;;  %v4320_v57 = vmul.f32 0.5, %v4289_v3 }
 0x945   : > { %v4338_v52 = vmul.f32 %v4329_v10, %v4289_v3  ;;  %6165 = vtanh.f32 %v4363_v18  ;;  %v4355_v51 = vadd.f32 %v4346_v36, %v4284_v43 }
 0x947   : > { %v4364_v17 = vmul.f32 0.7978846, %v4355_v51  ;;  %v4347_v49 = vmul.f32 %v4338_v52, %v4289_v3 }
 0x949   : > { %6167 = vtanh.f32 %v4364_v17  ;;  %v4356_v37 = vadd.f32 %v4347_v49, %v4289_v3 }
 0x94b   : > { %v6164_v31 = vpop.eup %6163  ;;  %v4365_v26 = vmul.f32 0.7978846, %v4356_v37 }
 0x94c   : > { %v4380_v24 = vadd.f32 1.0, %v6164_v31 }
 0x94d   : > { %6169 = vtanh.f32 %v4365_v26 }
 0x94e   : > { %v4389_v58 = vmul.f32 %v4380_v24, %v4317_v59 }
 0x94f   : > { %v6166_v12 = vpop.eup %6165 }
 0x950   : > { %5650 = vmatmul.mubr.f32.vlgmr.msra.gmra.mrb[108].mxu1 %v4389_v58  ;;  %v4381_v23 = vadd.f32 1.0, %v6166_v12 }
 0x951   : > { %5652 = vmatprep.mubr.msk.f32.mxu1 %vm6205_vm2, %v9099_v29 }
 0x952   : > { %v4390_v2 = vmul.f32 %v4381_v23, %v4318_v34 }
 0x953   : > { %v6168_v11 = vpop.eup %6167 }
 0x954   : > { %5653 = vmatmul.mubr.f32.gmra.mrb[110].mxu1 %v4390_v2  ;;  %v4382_v33 = vadd.f32 1.0, %v6168_v11 }
 0x955   : > { %5655 = vmatprep.mubr.msk.f32.mxu1 %vm6205_vm2, %v9099_v29 }
 0x956   : > { %v4391_v14 = vmul.f32 %v4382_v33, %v4319_v7 }
 0x957   : > { %v6170_v62 = vpop.eup %6169 }
 0x958   : > { %5656 = vmatmul.mubr.f32.gmra.mrb[112].mxu1 %v4391_v14  ;;  %v4383_v39 = vadd.f32 1.0, %v6170_v62 }
 0x959   : > { %5658 = vmatprep.mubr.msk.f32.mxu1 %vm6205_vm2, %v9099_v29 }
 0x95a   : > { %v4392_v15 = vmul.f32 %v4383_v39, %v4320_v57 }
 0x95c   : > { %5659 = vmatmul.mubr.f32.gmra.mrb[114].mxu1 %v4392_v15 }
 0x95d   : > { %5661 = vmatprep.mubr.msk.f32.mxu1 %vm6205_vm2, %v9099_v29 }
 0x978   : > { %v4293_v44 = vpop.f32.mrb[116].mxu0 }
 0x979   : > { %v4294_v8 = vadd.f32 %v8823_v25, %v4293_v44  ;;  %v5604_v0 = vpop.f32.mrb[117].mxu0 }
 0x97b   : > { %v4330_v22 = vmul.f32 0.044715, %v4294_v8  ;;  %v4321_v37 = vmul.f32 0.5, %v4294_v8 }
 0x97c   : > { %v4298_v41 = vpop.f32.mrb[118].mxu0 }
 0x97d   : > { %v4339_v9 = vmul.f32 %v4330_v22, %v4294_v8  ;;  %v4299_v13 = vadd.f32 %v8823_v25, %v4298_v41  ;;  %v5607_v35 = vpop.f32.mrb[119].mxu0 }
 0x97f   : > { %v4331_v45 = vmul.f32 0.044715, %v4299_v13  ;;  %v4348_v50 = vmul.f32 %v4339_v9, %v4294_v8  ;;  %v4322_v23 = vmul.f32 0.5, %v4299_v13 }
 0x981   : > { %v4340_v56 = vmul.f32 %v4331_v45, %v4299_v13  ;;  %v4357_v48 = vadd.f32 %v4348_v50, %v4294_v8 }
 0x983   : > { %v4303_v47 = vpop.f32.mrb[120].mxu0  ;;  %v4366_v55 = vmul.f32 0.7978846, %v4357_v48  ;;  %v4349_v30 = vmul.f32 %v4340_v56, %v4299_v13 }
 0x984   : > { %v4304_v20 = vadd.f32 %v8823_v25, %v4303_v47  ;;  %v5610_v61 = vpop.f32.mrb[121].mxu0 }
 0x985   : > { %6171 = vtanh.f32 %v4366_v55  ;;  %v4358_v5 = vadd.f32 %v4349_v30, %v4299_v13  ;;  %v4845_v13 = vld [vmem:[%s8905_s15] ss:$0 sm:$0xff] }
 0x986   : > { %v4332_v43 = vmul.f32 0.044715, %v4304_v20  ;;  %v4323_v14 = vmul.f32 0.5, %v4304_v20 }
 0x987   : > { %v4308_v60 = vpop.f32.mrb[122].mxu0  ;;  %v4367_v4 = vmul.f32 0.7978846, %v4358_v5 }
 0x988   : > { %v4341_v40 = vmul.f32 %v4332_v43, %v4304_v20  ;;  %v4309_v63 = vadd.f32 %v8823_v25, %v4308_v60  ;;  %v5613_v46 = vpop.f32.mrb[123].mxu0 }
 0x989   : > { %6173 = vtanh.f32 %v4367_v4 }
 0x98a   : > { %v4333_v27 = vmul.f32 0.044715, %v4309_v63  ;;  %v4350_v3 = vmul.f32 %v4341_v40, %v4304_v20  ;;  %v4324_v15 = vmul.f32 0.5, %v4309_v63 }
 0x98b   : > { %v4313_v19 = vpop.f32.mrb[124].mxu0 }
 0x98c   : > { %v4342_v38 = vmul.f32 %v4333_v27, %v4309_v63  ;;  %v4314_v10 = vadd.f32 %v8823_v25, %v4313_v19  ;;  %v5616_v18 = vpop.f32.mrb[125].mxu0  ;;  %v4359_v36 = vadd.f32 %v4350_v3, %v4304_v20 }
 0x98e   : > { %v4334_v52 = vmul.f32 0.044715, %v4314_v10  ;;  %v4368_v51 = vmul.f32 0.7978846, %v4359_v36  ;;  %v4351_v17 = vmul.f32 %v4342_v38, %v4309_v63  ;;  %v4325_v22 = vmul.f32 0.5, %v4314_v10 }
 0x98f   : > { %v6172_v49 = vpop.eup %6171 }
 0x990   : > { %v4343_v31 = vmul.f32 %v4334_v52, %v4314_v10  ;;  %v4384_v26 = vadd.f32 1.0, %v6172_v49  ;;  %6175 = vtanh.f32 %v4368_v51  ;;  %v4360_v59 = vadd.f32 %v4351_v17, %v4309_v63 }
 0x992   : > { %v4393_v24 = vmul.f32 %v4384_v26, %v4321_v37  ;;  %v4369_v58 = vmul.f32 0.7978846, %v4360_v59  ;;  %v4352_v12 = vmul.f32 %v4343_v31, %v4314_v10 }
 0x993   : > { %v6174_v34 = vpop.eup %6173 }
 0x994   : > { %5662 = vmatmul.mubr.f32.gmra.mrb[116].mxu1 %v4393_v24  ;;  %v4385_v2 = vadd.f32 1.0, %v6174_v34  ;;  %6177 = vtanh.f32 %v4369_v58  ;;  %v4361_v25 = vadd.f32 %v4352_v12, %v4314_v10 }
 0x995   : > { %5664 = vmatprep.mubr.msk.f32.mxu1 %vm6205_vm2, %v9099_v29 }
 0x996   : > { %v4394_v11 = vmul.f32 %v4385_v2, %v4322_v23  ;;  %v4370_v7 = vmul.f32 0.7978846, %v4361_v25 }
 0x998   : > { %5665 = vmatmul.mubr.f32.gmra.mrb[118].mxu1 %v4394_v11  ;;  %6179 = vtanh.f32 %v4370_v7 }
 0x999   : > { %5667 = vmatprep.mubr.msk.f32.mxu1 %vm6205_vm2, %v9099_v29 }
 0x99a   : > { %v6176_v33 = vpop.eup %6175 }
 0x99b   : > { %v4386_v62 = vadd.f32 1.0, %v6176_v33 }
 0x99d   : > { %v4395_v57 = vmul.f32 %v4386_v62, %v4323_v14 }
 0x99e   : > { %v6178_v39 = vpop.eup %6177 }
 0x99f   : > { %5668 = vmatmul.mubr.f32.gmra.mrb[120].mxu1 %v4395_v57  ;;  %v4387_v44 = vadd.f32 1.0, %v6178_v39 }
 0x9a0   : > { %5670 = vmatprep.mubr.msk.f32.mxu1 %vm6205_vm2, %v9099_v29 }
 0x9a1   : > { %v4396_v8 = vmul.f32 %v4387_v44, %v4324_v15 }
 0x9a2   : > { %v6180_v0 = vpop.eup %6179 }
 0x9a3   : > { %5671 = vmatmul.mubr.f32.gmra.mrb[122].mxu1 %v4396_v8  ;;  %v4388_v41 = vadd.f32 1.0, %v6180_v0 }
 0x9a4   : > { %5673 = vmatprep.mubr.msk.f32.mxu1 %vm6205_vm2, %v9099_v29 }
 0x9a5   : > { %v4397_v9 = vmul.f32 %v4388_v41, %v4325_v22 }
 0x9a7   : > { %5674 = vmatmul.mubr.f32.gmra.mrb[124].mxu1 %v4397_v9 }
 0xa23   : > { %v4487_v35 = vpop.f32.mrb[108].mxu1 }
 0xa24   : > { %v4488_v45 = vadd.f32 %v4845_v13, %v4487_v35  ;;  %v5651_v50 = vpop.f32.mrb[109].mxu1 }
 0xa26   : > { %v4531_v29 = vadd.f32 %v4488_v45, %v8592_v16 }
 0xa27   : > { %v4492_v56 = vpop.f32.mrb[110].mxu1 }
 0xa28   : > { %4540 = vst.msk [vmem:[%s8858_s24] sm:$0xff] %vm533_vm0, %v4531_v29  ;;  %v4493_v48 = vadd.f32 %v4845_v13, %v4492_v56  ;;  %v5654_v47 = vpop.f32.mrb[111].mxu1 }
 0xa2a   : > { %v4532_v55 = vadd.f32 %v4493_v48, %v8597_v42 }
 0xa2b   : > { %v4497_v30 = vpop.f32.mrb[112].mxu1 }
 0xa2c   : > { %4541 = vst.msk [vmem:[%s8858_s24 + $0x8] sm:$0xff] %vm533_vm0, %v4532_v55  ;;  %v4498_v20 = vadd.f32 %v4845_v13, %v4497_v30  ;;  %v5657_v61 = vpop.f32.mrb[113].mxu1 }
 0xa2e   : > { %v4533_v5 = vadd.f32 %v4498_v20, %v8602_v32 }
 0xa2f   : > { %v4502_v43 = vpop.f32.mrb[114].mxu1 }
 0xa30   : > { %4542 = vst.msk [vmem:[%s8858_s24 + $0x10] sm:$0xff] %vm533_vm0, %v4533_v5  ;;  %v4503_v16 = vadd.f32 %v4845_v13, %v4502_v43  ;;  %v5660_v60 = vpop.f32.mrb[115].mxu1 }
 0xa32   : > { %v4534_v4 = vadd.f32 %v4503_v16, %v8607_v28 }
 0xa34   : > { %4543 = vst.msk [vmem:[%s8858_s24 + $0x18] sm:$0xff] %vm533_vm0, %v4534_v4 }
 0xa67   : > { %v4507_v42 = vpop.f32.mrb[116].mxu1 }
 0xa68   : > { %v4508_v40 = vadd.f32 %v4845_v13, %v4507_v42  ;;  %v5663_v63 = vpop.f32.mrb[117].mxu1 }
 0xa6a   : > { %v4535_v46 = vadd.f32 %v4508_v40, %v8612_v1 }
 0xa6b   : > { %v4512_v27 = vpop.f32.mrb[118].mxu1 }
 0xa6c   : > { %4544 = vst.msk [vmem:[%s8858_s24 + $0x20] sm:$0xff] %vm533_vm0, %v4535_v46  ;;  %v4513_v32 = vadd.f32 %v4845_v13, %v4512_v27  ;;  %v5666_v3 = vpop.f32.mrb[119].mxu1 }
 0xa6e   : > { %v4536_v19 = vadd.f32 %v4513_v32, %v8617_v53 }
 0xa70   : > { %4545 = vst.msk [vmem:[%s8858_s24 + $0x28] sm:$0xff] %vm533_vm0, %v4536_v19 }
 0xa72   : > { %v4517_v28 = vpop.f32.mrb[120].mxu1 }
 0xa73   : > { %v4518_v38 = vadd.f32 %v4845_v13, %v4517_v28  ;;  %v5669_v10 = vpop.f32.mrb[121].mxu1 }
 0xa75   : > { %v4537_v18 = vadd.f32 %v4518_v38, %v8622_v21 }
 0xa76   : > { %v4522_v36 = vpop.f32.mrb[122].mxu1 }
 0xa77   : > { %4546 = vst.msk [vmem:[%s8858_s24 + $0x30] sm:$0xff] %vm533_vm0, %v4537_v18  ;;  %v4523_v1 = vadd.f32 %v4845_v13, %v4522_v36  ;;  %v5672_v52 = vpop.f32.mrb[123].mxu1 }
 0xa79   : > { %v4538_v51 = vadd.f32 %v4523_v1, %v8627_v6 }
 0xa7a   : > { %v4527_v17 = vpop.f32.mrb[124].mxu1 }
 0xa7b   : > { %4547 = vst.msk [vmem:[%s8858_s24 + $0x38] sm:$0xff] %vm533_vm0, %v4538_v51  ;;  %v4528_v49 = vadd.f32 %v4845_v13, %v4527_v17  ;;  %v5675_v53 = vpop.f32.mrb[125].mxu1 }
 0xa7d   : > { %v4539_v37 = vadd.f32 %v4528_v49, %v8632_v54 }
 0xa7f   : > { %4548 = vst.msk [vmem:[%s8858_s24 + $0x40] sm:$0x1] %vm558_vm1, %v4539_v37 }
 0xa80 PF: > { %s26_s21 = sadd.s32 1, %s6200_s21  }
 0xa81   : > { %p23_p4 = scmp.ge.s32.totalorder %s26_s21, 4  }
 0xa83   :  { %25 = sbr.rel (!%p23_p4) target bundleno = 2 (0x2), region = 123 }

</bundles_post_ra>
